<compile_context>
chip_gen: v7x
topology: tpu7x:2x2x1
jax: 0.10.0
libtpu: 0.0.40
codegen_flags: <defaults>
</compile_context>

<pallas_src>
import jax
import jax.numpy as jnp
from jax.experimental import pallas as pl
from jax.experimental.pallas import tpu as pltpu

IN_FEATURES = 9216
HIDDEN = 100
HIDDEN_PAD = 128          # lane-dense hidden dimension
OUT_FEATURES = 30


def mlp_kernel(x_ref, w1_ref, b1_ref, w2_ref, b2_ref, o_ref):
    # Entire K resident in VMEM: one MXU matmul, bias+ReLU on the VPU, then the
    # tiny second matmul, all in f32.
    h = jnp.dot(x_ref[...], w1_ref[...], preferred_element_type=jnp.float32)
    h = jnp.maximum(h + b1_ref[...], 0.0)
    out = jnp.dot(h, w2_ref[...], preferred_element_type=jnp.float32) + b2_ref[...]
    o_ref[...] = out.astype(o_ref.dtype)


def model_p3q2_forward(x, w1, b1, w2, b2):
    """x: (B, 9216) f32. w1: (9216, 100), b1: (100,), w2: (100, 30), b2: (30,)."""
    B, K = x.shape
    assert K == IN_FEATURES

    # Zero-pad the hidden axis 100 -> 128 (exact: padded units are identically 0
    # after ReLU and contribute 0 through the zero-padded W2 rows).
    w1_p = jnp.zeros((K, HIDDEN_PAD), dtype=w1.dtype).at[:, :HIDDEN].set(w1)
    b1_p = jnp.zeros((1, HIDDEN_PAD), dtype=b1.dtype).at[0, :HIDDEN].set(b1)
    w2_p = jnp.zeros((HIDDEN_PAD, OUT_FEATURES), dtype=w2.dtype).at[:HIDDEN, :].set(w2)
    b2_2d = b2.reshape(1, OUT_FEATURES)

    bytes_f32 = 4
    cost = pl.CostEstimate(
        flops=2 * B * K * HIDDEN_PAD + 2 * B * HIDDEN_PAD * OUT_FEATURES,
        transcendentals=0,
        bytes_accessed=(
            x.size + w1_p.size + b1_p.size + w2_p.size + b2_2d.size
            + B * OUT_FEATURES
        ) * bytes_f32,
    )

    return pl.pallas_call(
        mlp_kernel,
        out_shape=jax.ShapeDtypeStruct((B, OUT_FEATURES), x.dtype),
        grid_spec=pltpu.PrefetchScalarGridSpec(
            num_scalar_prefetch=0,
            grid=(1,),  # single step: full-K block, no reduction accumulator
            in_specs=[
                pl.BlockSpec((B, K), lambda k: (0, 0)),                    # x
                pl.BlockSpec((K, HIDDEN_PAD), lambda k: (0, 0)),           # W1 (padded)
                pl.BlockSpec((1, HIDDEN_PAD), lambda k: (0, 0)),           # b1 (padded)
                pl.BlockSpec((HIDDEN_PAD, OUT_FEATURES), lambda k: (0, 0)),# W2 (padded)
                pl.BlockSpec((1, OUT_FEATURES), lambda k: (0, 0)),         # b2
            ],
            out_specs=pl.BlockSpec((B, OUT_FEATURES), lambda k: (0, 0)),
        ),
        compiler_params=pltpu.CompilerParams(
            dimension_semantics=("arbitrary",),
            vmem_limit_bytes=32 * 1024 * 1024,
        ),
        cost_estimate=cost,
    )(x, w1_p, b1_p, w2_p, b2_2d)


def reference_forward(x, w1, b1, w2, b2):
    h = jnp.maximum(x @ w1 + b1, 0.0)
    return h @ w2 + b2


if __name__ == "__main__":
    key = jax.random.PRNGKey(0)
    kx, k1, k2, k3, k4 = jax.random.split(key, 5)

    B = 2
    # Deterministic synthetic parameters (same shapes as the nn.Linear layers).
    x = jax.random.normal(kx, (B, IN_FEATURES), dtype=jnp.float32)
    w1 = jax.random.normal(k1, (IN_FEATURES, HIDDEN), dtype=jnp.float32) * 0.01
    b1 = jax.random.normal(k2, (HIDDEN,), dtype=jnp.float32) * 0.01
    w2 = jax.random.normal(k3, (HIDDEN, OUT_FEATURES), dtype=jnp.float32) * 0.1
    b2 = jax.random.normal(k4, (OUT_FEATURES,), dtype=jnp.float32) * 0.01

    out = model_p3q2_forward(x, w1, b1, w2, b2)
    out = jax.block_until_ready(out)

    ref = reference_forward(x, w1, b1, w2, b2)
    assert out.shape == (B, OUT_FEATURES)
    assert jnp.allclose(out, ref, atol=1e-3, rtol=1e-3), "mismatch vs reference"

    print("KERNEL_OK")
</pallas_src>

<mosaic_0001>
module attributes {stable_mosaic.version = 11 : i64} {
  func.func @mlp_kernel(%arg0: i32, %arg1: memref<2x9216xf32, #tpu.memory_space<vmem>>, %arg2: memref<9216x128xf32, #tpu.memory_space<vmem>>, %arg3: memref<1x128xf32, #tpu.memory_space<vmem>>, %arg4: memref<128x30xf32, #tpu.memory_space<vmem>>, %arg5: memref<1x30xf32, #tpu.memory_space<vmem>>, %arg6: memref<2x30xf32, #tpu.memory_space<vmem>>) attributes {dimension_semantics = [#tpu.dimension_semantics<arbitrary>], iteration_bounds = array<i64: 1>, scalar_prefetch = 0 : i64, scratch_operands = 0 : i64, tpu.core_type = #tpu.core_type<tc>, window_params = [{pipeline_mode = #tpu.pipeline_mode<synchronous>, transform_indices = @transform_0, window_bounds = array<i64: 2, 9216>}, {pipeline_mode = #tpu.pipeline_mode<synchronous>, transform_indices = @transform_1, window_bounds = array<i64: 9216, 128>}, {pipeline_mode = #tpu.pipeline_mode<synchronous>, transform_indices = @transform_2, window_bounds = array<i64: 1, 128>}, {pipeline_mode = #tpu.pipeline_mode<synchronous>, transform_indices = @transform_3, window_bounds = array<i64: 128, 30>}, {pipeline_mode = #tpu.pipeline_mode<synchronous>, transform_indices = @transform_4, window_bounds = array<i64: 1, 30>}, {pipeline_mode = #tpu.pipeline_mode<synchronous>, transform_indices = @transform_5, window_bounds = array<i64: 2, 30>}]} {
    %c0 = arith.constant 0 : index
    %c0_0 = arith.constant 0 : index
    %0 = vector.load %arg1[%c0, %c0_0] : memref<2x9216xf32, #tpu.memory_space<vmem>>, vector<2x9216xf32>
    %c0_1 = arith.constant 0 : index
    %c0_2 = arith.constant 0 : index
    %1 = vector.load %arg2[%c0_1, %c0_2] : memref<9216x128xf32, #tpu.memory_space<vmem>>, vector<9216x128xf32>
    %cst = arith.constant dense<0.000000e+00> : vector<2x128xf32>
    %2 = tpu.matmul %0, %1, %cst {dimension_numbers = #tpu.dot_dimension_numbers<[1], [0], [0], [1], [0, 0, 1, 1], [], []>} : vector<2x9216xf32>, vector<9216x128xf32>, vector<2x128xf32> -> vector<2x128xf32>
    %c0_3 = arith.constant 0 : index
    %c0_4 = arith.constant 0 : index
    %3 = vector.load %arg3[%c0_3, %c0_4] : memref<1x128xf32, #tpu.memory_space<vmem>>, vector<1x128xf32>
    %4 = vector.broadcast %3 : vector<1x128xf32> to vector<2x128xf32>
    %5 = arith.addf %2, %4 : vector<2x128xf32>
    %cst_5 = arith.constant 0.000000e+00 : f32
    %6 = vector.broadcast %cst_5 : f32 to vector<2x128xf32>
    %7 = arith.maximumf %5, %6 : vector<2x128xf32>
    %c0_6 = arith.constant 0 : index
    %c0_7 = arith.constant 0 : index
    %8 = vector.load %arg4[%c0_6, %c0_7] : memref<128x30xf32, #tpu.memory_space<vmem>>, vector<128x30xf32>
    %cst_8 = arith.constant dense<0.000000e+00> : vector<2x30xf32>
    %9 = tpu.matmul %7, %8, %cst_8 {dimension_numbers = #tpu.dot_dimension_numbers<[1], [0], [0], [1], [0, 0, 1, 1], [], []>} : vector<2x128xf32>, vector<128x30xf32>, vector<2x30xf32> -> vector<2x30xf32>
    %c0_9 = arith.constant 0 : index
    %c0_10 = arith.constant 0 : index
    %10 = vector.load %arg5[%c0_9, %c0_10] : memref<1x30xf32, #tpu.memory_space<vmem>>, vector<1x30xf32>
    %11 = vector.broadcast %10 : vector<1x30xf32> to vector<2x30xf32>
    %12 = arith.addf %9, %11 : vector<2x30xf32>
    %c0_11 = arith.constant 0 : index
    %c0_12 = arith.constant 0 : index
    %13 = vector.load %arg6[%c0_11, %c0_12] : memref<2x30xf32, #tpu.memory_space<vmem>>, vector<2x30xf32>
    tpu.vector_store %arg6[%c0_11, %c0_12], %12 {strides = array<i32>} : memref<2x30xf32, #tpu.memory_space<vmem>>, vector<2x30xf32>,
    return
  }
  func.func @transform_0(%arg0: i32) -> (i32, i32) {
    %c0_i32 = arith.constant 0 : i32
    %c0_i32_0 = arith.constant 0 : i32
    %c0_i32_1 = arith.constant 0 : i32
    return %c0_i32, %c0_i32_0 : i32, i32
  }
  func.func @transform_1(%arg0: i32) -> (i32, i32) {
    %c0_i32 = arith.constant 0 : i32
    %c0_i32_0 = arith.constant 0 : i32
    %c0_i32_1 = arith.constant 0 : i32
    return %c0_i32, %c0_i32_0 : i32, i32
  }
  func.func @transform_2(%arg0: i32) -> (i32, i32) {
    %c0_i32 = arith.constant 0 : i32
    %c0_i32_0 = arith.constant 0 : i32
    %c0_i32_1 = arith.constant 0 : i32
    return %c0_i32, %c0_i32_0 : i32, i32
  }
  func.func @transform_3(%arg0: i32) -> (i32, i32) {
    %c0_i32 = arith.constant 0 : i32
    %c0_i32_0 = arith.constant 0 : i32
    %c0_i32_1 = arith.constant 0 : i32
    return %c0_i32, %c0_i32_0 : i32, i32
  }
  func.func @transform_4(%arg0: i32) -> (i32, i32) {
    %c0_i32 = arith.constant 0 : i32
    %c0_i32_0 = arith.constant 0 : i32
    %c0_i32_1 = arith.constant 0 : i32
    return %c0_i32, %c0_i32_0 : i32, i32
  }
  func.func @transform_5(%arg0: i32) -> (i32, i32) {
    %c0_i32 = arith.constant 0 : i32
    %c0_i32_0 = arith.constant 0 : i32
    %c0_i32_1 = arith.constant 0 : i32
    return %c0_i32, %c0_i32_0 : i32, i32
  }
}

</mosaic_0001>

<bundles_post_ra>
// kernel: tpu_custom_call.1
= control target key start
LH: loop header
LB: loop body
LE: loop exit
PB: predicated region body
PF: predicated region fallthrough
CT: control target
= control target key end

     0   :  { %10 = vsyncpa [#allocation3], 0  ;;  %s7300_s0 = inlined_call_operand.hbm [shape: f32[2,9216], index: 0, kind: input, shape index: {}]   ;;  %s7301_s1 = inlined_call_operand.hbm [shape: f32[9216,128], index: 1, kind: input, shape index: {}]   ;;  %s7302_s2 = inlined_call_operand.hbm [shape: f32[1,128], index: 2, kind: input, shape index: {}]   ;;  %s7303_s3 = inlined_call_operand.vmem [shape: f32[128,30], index: 3, kind: input, shape index: {}]   ;;  %s7304_s4 = inlined_call_operand.hbm [shape: f32[1,30], index: 4, kind: input, shape index: {}]   ;;  %s7305_s5 = inlined_call_operand.hbm [shape: f32[2,30], index: 5, kind: output, shape index: {}]  }
   0x1   :  { %11 = vsyncpa [#allocation6], 0 }
   0x2   :  { %12 = vsyncpa [#allocation9], 0 }
   0x3   :  { %13 = vsyncpa [#allocation4], 0  ;;  %s6913_s18 = smov [#allocation5]   ;;  %s6795_s22 = scalar_lea.hbm %s7301_s1, 147456 }
   0x4   :  { %s29_s19 = sshll.u32 %s6913_s18, 4  ;;  %p6796_p0 = scmp.ne.s32.totalorder %s7301_s1, %s6795_s22  ;;  %s30_s19 = int_to_ptr.vmem [resolvable:$true] %s29_s19 }
   0x5   :  { %p6799_p1 = scmp.lt.u32.totalorder %s6795_s22, %s7301_s1 }
   0x7   :  { %p6801_p2 = pnand %p6799_p1, %p6796_p0 }
   0x9   :  { %6804 = shalt.err (!%p6801_p2)
}
   0xa   :  { %s6805_s27 = scalar_lea.vmem %s30_s19, 147456  ;;  %p6810_p4 = scmp.lt.s32.totalorder %s30_s19, %s30_s19 }
   0xb   :  { %p6806_p3 = scmp.ne.s32.totalorder %s30_s19, %s6805_s27  ;;  %p6811_p5 = scmp.lt.s32.totalorder %s6805_s27, %s6805_s27 }
   0xd   :  { %p6812_p6 = por %p6811_p5, %p6810_p4 }
   0xf   :  { %p6813_p7 = pnand %p6812_p6, %p6806_p3 }
  0x11   :  { %6816 = shalt.err (!%p6813_p7)
}
  0x12   :  { %s6914_s28 = smov 128   ;;  %s6915_s29 = smov 8  }
  0x13   :  { %35 = dma.hbm_to_vmem [thread:$0]  %s7301_s1, 147456, %s30_s19, [#allocation6], %s6914_s28, %s6914_s28, %s6915_s29  }
  0x14   :  { %s6916_s7 = smov [#allocation2]   ;;  %s6917_s9 = smov [#allocation7]  }
  0x15   :  { %s20_s8 = sshll.u32 %s6916_s7, 4  ;;  %s42_s10 = sshll.u32 %s6917_s9, 4  ;;  %s21_s8 = int_to_ptr.vmem [resolvable:$true] %s20_s8  ;;  %s43_s10 = int_to_ptr.vmem [resolvable:$true] %s42_s10 }
  0x16   :  { %s6817_s13 = scalar_lea.hbm %s7300_s0, 2304 }
  0x17   :  { %p6818_p8 = scmp.ne.s32.totalorder %s7300_s0, %s6817_s13  ;;  %p6821_p9 = scmp.lt.u32.totalorder %s6817_s13, %s7300_s0 }
  0x19   :  { %p6823_p10 = pnand %p6821_p9, %p6818_p8 }
  0x1b   :  { %6826 = shalt.err (!%p6823_p10)
}
  0x1c   :  { %s6827_s1 = scalar_lea.vmem %s21_s8, 2304  ;;  %p6832_p12 = scmp.lt.s32.totalorder %s21_s8, %s21_s8 }
  0x1d   :  { %p6828_p11 = scmp.ne.s32.totalorder %s21_s8, %s6827_s1  ;;  %p6833_p13 = scmp.lt.s32.totalorder %s6827_s1, %s6827_s1 }
  0x1f   :  { %p6834_p0 = por %p6833_p13, %p6832_p12 }
  0x21   :  { %p6835_p1 = pnand %p6834_p0, %p6828_p11 }
  0x23   :  { %6838 = shalt.err (!%p6835_p1)
}
  0x24   :  { %23 = dma.hbm_to_vmem [thread:$0]  %s7300_s0, 2304, %s21_s8, [#allocation3]  }
  0x25   :  { %s6839_s22 = scalar_lea.hbm %s7302_s2, 16 }
  0x26   :  { %p6840_p2 = scmp.ne.s32.totalorder %s7302_s2, %s6839_s22  ;;  %p6843_p3 = scmp.lt.u32.totalorder %s6839_s22, %s7302_s2 }
  0x28   :  { %p6845_p4 = pnand %p6843_p3, %p6840_p2 }
  0x2a   :  { %6848 = shalt.err (!%p6845_p4)
}
  0x2b   :  { %s6849_s27 = scalar_lea.vmem %s43_s10, 16  ;;  %s6853_s28 = scalar_lea.vmem %s43_s10, 32 }
  0x2c   :  { %p6850_p5 = scmp.ne.s32.totalorder %s43_s10, %s6849_s27  ;;  %p6854_p6 = scmp.lt.s32.totalorder %s43_s10, %s43_s10 }
  0x2d   :  { %p6855_p7 = scmp.lt.s32.totalorder %s6853_s28, %s6849_s27 }
  0x2f   :  { %p6856_p8 = por %p6855_p7, %p6854_p6 }
  0x31   :  { %p6857_p9 = pnand %p6856_p8, %p6850_p5 }
  0x33   :  { %6860 = shalt.err (!%p6857_p9)
}
  0x34   :  { %45 = dma.hbm_to_vmem [thread:$0]  %s7302_s2, 16, %s43_s10, [#allocation6]  }
  0x35   :  { %s6918_s30 = smov [#allocation8]   ;;  %s6861_s9 = scalar_lea.hbm %s7304_s4, 16 }
  0x36   :  { %s54_s6 = sshll.u32 %s6918_s30, 4  ;;  %p6862_p10 = scmp.ne.s32.totalorder %s7304_s4, %s6861_s9  ;;  %s55_s6 = int_to_ptr.vmem [resolvable:$true] %s54_s6 }
  0x37   :  { %p6865_p11 = scmp.lt.u32.totalorder %s6861_s9, %s7304_s4 }
  0x39   :  { %p6867_p12 = pnand %p6865_p11, %p6862_p10 }
  0x3b   :  { %6870 = shalt.err (!%p6867_p12)
}
  0x3c   :  { %s6871_s15 = scalar_lea.vmem %s55_s6, 16  ;;  %s6875_s2 = scalar_lea.vmem %s55_s6, 32 }
  0x3d   :  { %p6872_p13 = scmp.ne.s32.totalorder %s55_s6, %s6871_s15  ;;  %p6876_p0 = scmp.lt.s32.totalorder %s55_s6, %s55_s6 }
  0x3e   :  { %p6877_p1 = scmp.lt.s32.totalorder %s6875_s2, %s6871_s15 }
  0x40   :  { %p6878_p2 = por %p6877_p1, %p6876_p0 }
  0x42   :  { %p6879_p3 = pnand %p6878_p2, %p6872_p13 }
  0x44   :  { %6882 = shalt.err (!%p6879_p3)
}
  0x45   :  { %57 = dma.hbm_to_vmem [thread:$0]  %s7304_s4, 16, %s55_s6, [#allocation9]  }
  0x46   :  { %6905 = dma.done.wait [#allocation3], 2304  }
  0x47   :  { %6906 = vsyncadd [#allocation3], 4294964992 }
  0x48   :  { %6907 = dma.done.wait [#allocation6], 147472  }
  0x49   :  { %6908 = vsyncadd [#allocation6], 4294819824 }
  0x4a   :  { %6909 = dma.done.wait [#allocation9], 16  }
  0x4b   :  { %6910 = vsyncadd [#allocation9], 4294967280  ;;  %v104_v0 = vld [vmem:[#allocation5 + $0x80] sm:$0xff]  ;;  %v105_v1 = vld [vmem:[#allocation5 + $0x88] sm:$0xff]  ;;  %v6919_v47 = vmov 1983009808   ;;  %v1269_v49 = vlaneseq }
  0x4c   :  { %v88_v2 = vld [vmem:[#allocation5] sm:$0xff]  ;;  %v5590_v3 = vpack.c.bf16 %v105_v1, %v104_v0  ;;  %v89_v4 = vld [vmem:[#allocation5 + $0x8] sm:$0xff]  ;;  %v106_v11 = vld [vmem:[#allocation5 + $0x90] sm:$0xff]  ;;  %v1267_v48 = vunpack.c.l.s4 %v6919_v47  ;;  %vm6921_vm0 = vmmov 0   ;;  %vm4257_vm1 = vcmask 238592  }
  0x4d   :  { %v136_v5 = vld [vmem:[#allocation5 + $0x180] sm:$0xff]  ;;  %v137_v6 = vld [vmem:[#allocation5 + $0x188] sm:$0xff]  ;;  %v5592_v7 = vpack.c.bf16 %v89_v4, %v88_v2  ;;  %v107_v13 = vld [vmem:[#allocation5 + $0x98] sm:$0xff]  ;;  %v1270_v0 = vshrl.u32 %v1269_v49, 7 }
  0x4e   :  { %v5622_v8 = vpack.c.bf16 %v137_v6, %v136_v5  ;;  %v120_v9 = vld [vmem:[#allocation5 + $0x100] sm:$0xff]  ;;  %v121_v10 = vld [vmem:[#allocation5 + $0x108] sm:$0xff]  ;;  %5591 = vmatprep.subr.bf16.mxu0 %v5590_v3  ;;  %v90_v14 = vld [vmem:[#allocation5 + $0x10] sm:$0xff]  ;;  %v5594_v16 = vpack.c.bf16 %v107_v13, %v106_v11  ;;  %v1268_v63 = vunpack.c.0.s8 %v1267_v48 }
  0x4f   :  { %v5624_v12 = vpack.c.bf16 %v121_v10, %v120_v9  ;;  %v91_v15 = vld [vmem:[#allocation5 + $0x18] sm:$0xff]  ;;  %5593 = vmatpush3.bf16.msra.mxu0 %v5592_v7  ;;  %v138_v18 = vld [vmem:[#allocation5 + $0x190] sm:$0xff]  ;;  %v108_v23 = vld [vmem:[#allocation5 + $0xa0] sm:$0xff] }
  0x50   :  { %5623 = vmatprep.subr.bf16.mxu1 %v5622_v8  ;;  %v5596_v17 = vpack.c.bf16 %v91_v15, %v90_v14  ;;  %v139_v19 = vld [vmem:[#allocation5 + $0x198] sm:$0xff]  ;;  %v122_v20 = vld [vmem:[#allocation5 + $0x110] sm:$0xff]  ;;  %v109_v24 = vld [vmem:[#allocation5 + $0xa8] sm:$0xff]  ;;  %5595 = vmatprep.subr.bf16.mxu0 %v5594_v16  ;;  %v7002_v13 = vsub.s32 %v1268_v63, %v1270_v0 }
  0x51   :  { %5625 = vmatpush3.bf16.msra.mxu1 %v5624_v12  ;;  %v5626_v21 = vpack.c.bf16 %v139_v19, %v138_v18  ;;  %v123_v22 = vld [vmem:[#allocation5 + $0x118] sm:$0xff]  ;;  %v5598_v26 = vpack.c.bf16 %v109_v24, %v108_v23  ;;  %v92_v27 = vld [vmem:[#allocation5 + $0x20] sm:$0xff]  ;;  %v93_v28 = vld [vmem:[#allocation5 + $0x28] sm:$0xff] }
  0x52   :  { %v5628_v25 = vpack.c.bf16 %v123_v22, %v122_v20  ;;  %v140_v29 = vld [vmem:[#allocation5 + $0x1a0] sm:$0xff]  ;;  %v141_v30 = vld [vmem:[#allocation5 + $0x1a8] sm:$0xff]  ;;  %v5600_v33 = vpack.c.bf16 %v93_v28, %v92_v27  ;;  %v110_v35 = vld [vmem:[#allocation5 + $0xb0] sm:$0xff] }
  0x53   :  { %5627 = vmatprep.subr.bf16.mxu1 %v5626_v21  ;;  %v124_v31 = vld [vmem:[#allocation5 + $0x120] sm:$0xff]  ;;  %v125_v32 = vld [vmem:[#allocation5 + $0x128] sm:$0xff]  ;;  %5597 = vmatpush3.bf16.msra.mxu0 %v5596_v17  ;;  %v5630_v34 = vpack.c.bf16 %v141_v30, %v140_v29  ;;  %v111_v36 = vld [vmem:[#allocation5 + $0xb8] sm:$0xff] }
  0x54   :  { %v94_v37 = vld [vmem:[#allocation5 + $0x30] sm:$0xff]  ;;  %5599 = vmatprep.subr.bf16.mxu0 %v5598_v26  ;;  %v5632_v38 = vpack.c.bf16 %v125_v32, %v124_v31  ;;  %v5602_v39 = vpack.c.bf16 %v111_v36, %v110_v35  ;;  %v95_v40 = vld [vmem:[#allocation5 + $0x38] sm:$0xff]  ;;  %v112_v46 = vld [vmem:[#allocation5 + $0xc0] sm:$0xff] }
  0x55   :  { %5629 = vmatpush3.bf16.msra.mxu1 %v5628_v25  ;;  %v142_v41 = vld [vmem:[#allocation5 + $0x1b0] sm:$0xff]  ;;  %v143_v42 = vld [vmem:[#allocation5 + $0x1b8] sm:$0xff]  ;;  %v113_v50 = vld [vmem:[#allocation5 + $0xc8] sm:$0xff]  ;;  %v5604_v51 = vpack.c.bf16 %v95_v40, %v94_v37 }
  0x56   :  { %5631 = vmatprep.subr.bf16.mxu1 %v5630_v34  ;;  %v5634_v43 = vpack.c.bf16 %v143_v42, %v142_v41  ;;  %v126_v44 = vld [vmem:[#allocation5 + $0x130] sm:$0xff]  ;;  %v127_v45 = vld [vmem:[#allocation5 + $0x138] sm:$0xff]  ;;  %v144_v52 = vld [vmem:[#allocation5 + $0x1c0] sm:$0xff]  ;;  %v5606_v55 = vpack.c.bf16 %v113_v50, %v112_v46 }
  0x57   :  { %5601 = vmatpush3.bf16.msra.mxu0 %v5600_v33  ;;  %v145_v53 = vld [vmem:[#allocation5 + $0x1c8] sm:$0xff]  ;;  %v5636_v54 = vpack.c.bf16 %v127_v45, %v126_v44  ;;  %v96_v56 = vld [vmem:[#allocation5 + $0x40] sm:$0xff]  ;;  %v114_v61 = vld [vmem:[#allocation5 + $0xd0] sm:$0xff] }
  0x58   :  { %5603 = vmatprep.subr.bf16.mxu0 %v5602_v39  ;;  %v97_v57 = vld [vmem:[#allocation5 + $0x48] sm:$0xff]  ;;  %v128_v58 = vld [vmem:[#allocation5 + $0x140] sm:$0xff]  ;;  %v5638_v59 = vpack.c.bf16 %v145_v53, %v144_v52  ;;  %v115_v62 = vld [vmem:[#allocation5 + $0xd8] sm:$0xff] }
  0x59   :  { %5633 = vmatpush3.bf16.msra.mxu1 %v5632_v38  ;;  %v129_v60 = vld [vmem:[#allocation5 + $0x148] sm:$0xff]  ;;  %v146_v1 = vld [vmem:[#allocation5 + $0x1d0] sm:$0xff]  ;;  %v147_v2 = vld [vmem:[#allocation5 + $0x1d8] sm:$0xff]  ;;  %v5608_v3 = vpack.c.bf16 %v97_v57, %v96_v56  ;;  %v5610_v5 = vpack.c.bf16 %v115_v62, %v114_v61 }
  0x5a   :  { %5635 = vmatprep.subr.bf16.mxu1 %v5634_v43  ;;  %v5640_v4 = vpack.c.bf16 %v129_v60, %v128_v58  ;;  %v98_v6 = vld [vmem:[#allocation5 + $0x50] sm:$0xff]  ;;  %v99_v7 = vld [vmem:[#allocation5 + $0x58] sm:$0xff]  ;;  %v5642_v9 = vpack.c.bf16 %v147_v2, %v146_v1  ;;  %v116_v11 = vld [vmem:[#allocation5 + $0xe0] sm:$0xff] }
  0x5b   :  { %5605 = vmatpush3.bf16.msra.mxu0 %v5604_v51  ;;  %v130_v8 = vld [vmem:[#allocation5 + $0x150] sm:$0xff]  ;;  %v131_v10 = vld [vmem:[#allocation5 + $0x158] sm:$0xff]  ;;  %v117_v12 = vld [vmem:[#allocation5 + $0xe8] sm:$0xff]  ;;  %v5612_v16 = vpack.c.bf16 %v99_v7, %v98_v6 }
  0x5c   :  { %5607 = vmatprep.subr.bf16.mxu0 %v5606_v55  ;;  %v148_v14 = vld [vmem:[#allocation5 + $0x1e0] sm:$0xff]  ;;  %v149_v15 = vld [vmem:[#allocation5 + $0x1e8] sm:$0xff]  ;;  %v5644_v18 = vpack.c.bf16 %v131_v10, %v130_v8  ;;  %v5614_v19 = vpack.c.bf16 %v117_v12, %v116_v11  ;;  %v70_v22 = vld [vmem:[#allocation2] sm:$0xff] }
  0x5d   :  { %5637 = vmatpush3.bf16.msra.mxu1 %v5636_v54  ;;  %v100_v17 = vld [vmem:[#allocation5 + $0x60] sm:$0xff]  ;;  %v101_v20 = vld [vmem:[#allocation5 + $0x68] sm:$0xff]  ;;  %v5646_v23 = vpack.c.bf16 %v149_v15, %v148_v14  ;;  %v118_v25 = vld [vmem:[#allocation5 + $0xf0] sm:$0xff]  ;;  %v1272_v27 = vrot.slane %v70_v22, %v7002_v13  ;;  %v1265_v28 = vcombine.high %v70_v22, %v70_v22 }
  0x5e   :  { %5639 = vmatprep.subr.bf16.mxu1 %v5638_v59  ;;  %v132_v21 = vld [vmem:[#allocation5 + $0x160] sm:$0xff]  ;;  %v133_v24 = vld [vmem:[#allocation5 + $0x168] sm:$0xff]  ;;  %v119_v26 = vld [vmem:[#allocation5 + $0xf8] sm:$0xff]  ;;  %v5616_v31 = vpack.c.bf16 %v101_v20, %v100_v17 }
  0x5f   :  { %5609 = vmatpush3.bf16.msra.mxu0 %v5608_v3  ;;  %v150_v29 = vld [vmem:[#allocation5 + $0x1f0] sm:$0xff]  ;;  %v151_v30 = vld [vmem:[#allocation5 + $0x1f8] sm:$0xff]  ;;  %v1280_v32 = vcombine.high %v1272_v27, %v1272_v27  ;;  %v1279_v33 = vrot.slane %v1265_v28, %v7002_v13  ;;  %v5648_v34 = vpack.c.bf16 %v133_v24, %v132_v21  ;;  %v5618_v35 = vpack.c.bf16 %v119_v26, %v118_v25  ;;  %v168_v41 = vld [vmem:[#allocation5 + $0x280] sm:$0xff] }
  0x60   :  { %5611 = vmatprep.subr.bf16.mxu0 %v5610_v5  ;;  %v102_v36 = vld [vmem:[#allocation5 + $0x70] sm:$0xff]  ;;  %v103_v37 = vld [vmem:[#allocation5 + $0x78] sm:$0xff]  ;;  %v5650_v39 = vpack.c.bf16 %v151_v30, %v150_v29  ;;  %v169_v42 = vld [vmem:[#allocation5 + $0x288] sm:$0xff] }
  0x61   :  { %5641 = vmatpush3.bf16.msra.mxu1 %v5640_v4  ;;  %v134_v38 = vld [vmem:[#allocation5 + $0x170] sm:$0xff]  ;;  %v135_v40 = vld [vmem:[#allocation5 + $0x178] sm:$0xff]  ;;  %1707 = vmatprep.mubr.f32.mxu0 %v1280_v32  ;;  %v1281_v43 = vcombine.high %v1279_v33, %v1279_v33  ;;  %v200_v44 = vld [vmem:[#allocation5 + $0x380] sm:$0xff]  ;;  %v5620_v46 = vpack.c.bf16 %v103_v37, %v102_v36  ;;  %v5654_v48 = vpack.c.bf16 %v169_v42, %v168_v41 }
  0x62   :  { %5643 = vmatprep.subr.bf16.mxu1 %v5642_v9  ;;  %v201_v45 = vld [vmem:[#allocation5 + $0x388] sm:$0xff]  ;;  %v5652_v47 = vpack.c.bf16 %v135_v40, %v134_v38  ;;  %v152_v49 = vld [vmem:[#allocation5 + $0x200] sm:$0xff]  ;;  %v170_v54 = vld [vmem:[#allocation5 + $0x290] sm:$0xff] }
  0x63   :  { %5613 = vmatpush3.bf16.msra.mxu0 %v5612_v16  ;;  %1777 = vmatprep.mubr.f32.mxu1 %v1281_v43  ;;  %v153_v50 = vld [vmem:[#allocation5 + $0x208] sm:$0xff]  ;;  %v184_v51 = vld [vmem:[#allocation5 + $0x300] sm:$0xff]  ;;  %v5686_v52 = vpack.c.bf16 %v201_v45, %v200_v44  ;;  %v171_v55 = vld [vmem:[#allocation5 + $0x298] sm:$0xff] }
  0x64   :  { %5615 = vmatprep.subr.bf16.mxu0 %v5614_v19  ;;  %v185_v53 = vld [vmem:[#allocation5 + $0x308] sm:$0xff]  ;;  %v202_v56 = vld [vmem:[#allocation5 + $0x390] sm:$0xff]  ;;  %v203_v57 = vld [vmem:[#allocation5 + $0x398] sm:$0xff]  ;;  %v5656_v58 = vpack.c.bf16 %v153_v50, %v152_v49  ;;  %v5658_v60 = vpack.c.bf16 %v171_v55, %v170_v54 }
  0x65   :  { %5645 = vmatpush3.bf16.msra.mxu1 %v5644_v18  ;;  %v5688_v59 = vpack.c.bf16 %v185_v53, %v184_v51  ;;  %v154_v61 = vld [vmem:[#allocation5 + $0x210] sm:$0xff]  ;;  %v155_v62 = vld [vmem:[#allocation5 + $0x218] sm:$0xff]  ;;  %v5690_v0 = vpack.c.bf16 %v203_v57, %v202_v56  ;;  %v172_v2 = vld [vmem:[#allocation5 + $0x2a0] sm:$0xff] }
  0x66   :  { %5647 = vmatprep.subr.bf16.mxu1 %v5646_v23  ;;  %v186_v63 = vld [vmem:[#allocation5 + $0x310] sm:$0xff]  ;;  %v187_v1 = vld [vmem:[#allocation5 + $0x318] sm:$0xff]  ;;  %v173_v3 = vld [vmem:[#allocation5 + $0x2a8] sm:$0xff]  ;;  %v5660_v6 = vpack.c.bf16 %v155_v62, %v154_v61 }
  0x67   :  { %5617 = vmatpush3.bf16.msra.mxu0 %v5616_v31  ;;  %v204_v4 = vld [vmem:[#allocation5 + $0x3a0] sm:$0xff]  ;;  %v205_v5 = vld [vmem:[#allocation5 + $0x3a8] sm:$0xff]  ;;  %v5692_v7 = vpack.c.bf16 %v187_v1, %v186_v63  ;;  %v5662_v8 = vpack.c.bf16 %v173_v3, %v172_v2  ;;  %v174_v15 = vld [vmem:[#allocation5 + $0x2b0] sm:$0xff] }
  0x68   :  { %5619 = vmatprep.subr.bf16.mxu0 %v5618_v35  ;;  %v156_v9 = vld [vmem:[#allocation5 + $0x220] sm:$0xff]  ;;  %v157_v10 = vld [vmem:[#allocation5 + $0x228] sm:$0xff]  ;;  %v5694_v12 = vpack.c.bf16 %v205_v5, %v204_v4  ;;  %v175_v16 = vld [vmem:[#allocation5 + $0x2b8] sm:$0xff] }
  0x69   :  { %5649 = vmatpush3.bf16.msra.mxu1 %v5648_v34  ;;  %v188_v11 = vld [vmem:[#allocation5 + $0x320] sm:$0xff]  ;;  %v189_v14 = vld [vmem:[#allocation5 + $0x328] sm:$0xff]  ;;  %v206_v17 = vld [vmem:[#allocation5 + $0x3b0] sm:$0xff]  ;;  %v5664_v19 = vpack.c.bf16 %v157_v10, %v156_v9  ;;  %v5666_v21 = vpack.c.bf16 %v175_v16, %v174_v15 }
  0x6a   :  { %5651 = vmatprep.subr.bf16.mxu1 %v5650_v39  ;;  %v207_v18 = vld [vmem:[#allocation5 + $0x3b8] sm:$0xff]  ;;  %v5696_v20 = vpack.c.bf16 %v189_v14, %v188_v11  ;;  %v158_v22 = vld [vmem:[#allocation5 + $0x230] sm:$0xff]  ;;  %v177_v28 = vld [vmem:[#allocation5 + $0x2c8] sm:$0xff] }
  0x6b   :  { %5621 = vmatpush3.bf16.msra.mxu0 %v5620_v46  ;;  %v159_v23 = vld [vmem:[#allocation5 + $0x238] sm:$0xff]  ;;  %v190_v24 = vld [vmem:[#allocation5 + $0x330] sm:$0xff]  ;;  %v5698_v25 = vpack.c.bf16 %v207_v18, %v206_v17  ;;  %v208_v29 = vld [vmem:[#allocation5 + $0x3c0] sm:$0xff] }
  0x6c   :  { %5655 = vmatprep.subr.bf16.mxu0 %v5654_v48  ;;  %v191_v26 = vld [vmem:[#allocation5 + $0x338] sm:$0xff]  ;;  %v209_v30 = vld [vmem:[#allocation5 + $0x3c8] sm:$0xff]  ;;  %v5668_v32 = vpack.c.bf16 %v159_v23, %v158_v22  ;;  %v160_v37 = vld [vmem:[#allocation5 + $0x240] sm:$0xff] }
  0x6d   :  { %5653 = vmatpush3.bf16.msra.mxu1 %v5652_v47  ;;  %v71_v31 = vld [vmem:[#allocation2 + $0x8] sm:$0xff]  ;;  %v5700_v35 = vpack.c.bf16 %v191_v26, %v190_v24  ;;  %v161_v38 = vld [vmem:[#allocation5 + $0x248] sm:$0xff]  ;;  %v192_v39 = vld [vmem:[#allocation5 + $0x340] sm:$0xff]  ;;  %v5702_v40 = vpack.c.bf16 %v209_v30, %v208_v29 }
  0x6e   :  { %5687 = vmatprep.subr.bf16.mxu1 %v5686_v52  ;;  %1708 = vmatmul.mubr.f32.vlgmr.msra.gmra.mrb[0].mxu0 %v1272_v27  ;;  %v176_v27 = vld [vmem:[#allocation5 + $0x2c0] sm:$0xff]  ;;  %v1282_v34 = vcombine.high %v71_v31, %v71_v31  ;;  %v193_v41 = vld [vmem:[#allocation5 + $0x348] sm:$0xff]  ;;  %v178_v42 = vld [vmem:[#allocation5 + $0x2d0] sm:$0xff]  ;;  %v5672_v48 = vpack.c.bf16 %v161_v38, %v160_v37 }
  0x6f   :  { %5657 = vmatpush3.bf16.msra.mxu0 %v5656_v58  ;;  %v5670_v36 = vpack.c.bf16 %v177_v28, %v176_v27  ;;  %v179_v43 = vld [vmem:[#allocation5 + $0x2d8] sm:$0xff]  ;;  %v210_v46 = vld [vmem:[#allocation5 + $0x3d0] sm:$0xff]  ;;  %v5704_v50 = vpack.c.bf16 %v193_v41, %v192_v39  ;;  %v180_v57 = vld [vmem:[#allocation5 + $0x2e0] sm:$0xff] }
  0x70   :  { %1778 = vmatmul.mubr.f32.vlgmr.msra.gmra.mrb[0].mxu1 %v1279_v33  ;;  %5659 = vmatprep.subr.bf16.mxu0 %v5658_v60  ;;  %v7007_v33 = vrot.slane %v71_v31, %v7002_v13  ;;  %v7012_v45 = vrot.slane %v1282_v34, %v7002_v13  ;;  %v211_v47 = vld [vmem:[#allocation5 + $0x3d8] sm:$0xff]  ;;  %v5674_v51 = vpack.c.bf16 %v179_v43, %v178_v42  ;;  %v162_v52 = vld [vmem:[#allocation5 + $0x250] sm:$0xff]  ;;  %v181_v58 = vld [vmem:[#allocation5 + $0x2e8] sm:$0xff] }
  0x71   :  { %5689 = vmatpush3.bf16.msra.mxu1 %v5688_v59  ;;  %v163_v53 = vld [vmem:[#allocation5 + $0x258] sm:$0xff]  ;;  %v194_v54 = vld [vmem:[#allocation5 + $0x350] sm:$0xff]  ;;  %v5706_v55 = vpack.c.bf16 %v211_v47, %v210_v46  ;;  %v212_v59 = vld [vmem:[#allocation5 + $0x3e0] sm:$0xff]  ;;  %v5678_v63 = vpack.c.bf16 %v181_v58, %v180_v57 }
  0x72   :  { %5691 = vmatprep.subr.bf16.mxu1 %v5690_v0  ;;  %v1297_v44 = vcombine.high %v7007_v33, %v7007_v33  ;;  %v1298_v49 = vcombine.high %v7012_v45, %v7012_v45  ;;  %v195_v56 = vld [vmem:[#allocation5 + $0x358] sm:$0xff]  ;;  %v213_v60 = vld [vmem:[#allocation5 + $0x3e8] sm:$0xff]  ;;  %v5676_v61 = vpack.c.bf16 %v163_v53, %v162_v52  ;;  %v164_v0 = vld [vmem:[#allocation5 + $0x260] sm:$0xff] }
  0x73   :  { %5661 = vmatpush3.bf16.msra.mxu0 %v5660_v6  ;;  %v5708_v62 = vpack.c.bf16 %v195_v56, %v194_v54  ;;  %v165_v1 = vld [vmem:[#allocation5 + $0x268] sm:$0xff]  ;;  %v196_v2 = vld [vmem:[#allocation5 + $0x360] sm:$0xff]  ;;  %v5710_v3 = vpack.c.bf16 %v213_v60, %v212_v59  ;;  %v182_v5 = vld [vmem:[#allocation5 + $0x2f0] sm:$0xff] }
  0x74   :  { %5663 = vmatprep.subr.bf16.mxu0 %v5662_v8  ;;  %1847 = vmatprep.mubr.f32.mxu0 %v1297_v44  ;;  %v197_v4 = vld [vmem:[#allocation5 + $0x368] sm:$0xff]  ;;  %v183_v6 = vld [vmem:[#allocation5 + $0x2f8] sm:$0xff]  ;;  %v5680_v9 = vpack.c.bf16 %v165_v1, %v164_v0  ;;  %v198_v15 = vld [vmem:[#allocation5 + $0x370] sm:$0xff] }
  0x75   :  { %5693 = vmatpush3.bf16.msra.mxu1 %v5692_v7  ;;  %1917 = vmatprep.mubr.f32.mxu1 %v1298_v49  ;;  %v214_v7 = vld [vmem:[#allocation5 + $0x3f0] sm:$0xff]  ;;  %v215_v8 = vld [vmem:[#allocation5 + $0x3f8] sm:$0xff]  ;;  %v5712_v10 = vpack.c.bf16 %v197_v4, %v196_v2  ;;  %v5682_v11 = vpack.c.bf16 %v183_v6, %v182_v5  ;;  %v232_v18 = vld [vmem:[#allocation5 + $0x480] sm:$0xff] }
  0x76   :  { %5695 = vmatprep.subr.bf16.mxu1 %v5694_v12  ;;  %v166_v12 = vld [vmem:[#allocation5 + $0x270] sm:$0xff]  ;;  %v167_v14 = vld [vmem:[#allocation5 + $0x278] sm:$0xff]  ;;  %v5714_v16 = vpack.c.bf16 %v215_v8, %v214_v7  ;;  %v216_v23 = vld [vmem:[#allocation5 + $0x400] sm:$0xff] }
  0x77   :  { %5665 = vmatpush3.bf16.msra.mxu0 %v5664_v19  ;;  %v199_v17 = vld [vmem:[#allocation5 + $0x378] sm:$0xff]  ;;  %v233_v19 = vld [vmem:[#allocation5 + $0x488] sm:$0xff]  ;;  %v5684_v22 = vpack.c.bf16 %v167_v14, %v166_v12  ;;  %v248_v27 = vld [vmem:[#allocation5 + $0x500] sm:$0xff] }
  0x78   :  { %5667 = vmatprep.subr.bf16.mxu0 %v5666_v21  ;;  %v265_v21 = vld [vmem:[#allocation5 + $0x588] sm:$0xff]  ;;  %v5716_v24 = vpack.c.bf16 %v199_v17, %v198_v15  ;;  %v234_v30 = vld [vmem:[#allocation5 + $0x490] sm:$0xff]  ;;  %v235_v31 = vld [vmem:[#allocation5 + $0x498] sm:$0xff] }
  0x79   :  { %5697 = vmatpush3.bf16.msra.mxu1 %v5696_v20  ;;  %v264_v20 = vld [vmem:[#allocation5 + $0x580] sm:$0xff]  ;;  %v217_v26 = vld [vmem:[#allocation5 + $0x408] sm:$0xff]  ;;  %v267_v34 = vld [vmem:[#allocation5 + $0x598] sm:$0xff]  ;;  %v5722_v38 = vpack.c.bf16 %v235_v31, %v234_v30 }
  0x7a   :  { %5699 = vmatprep.subr.bf16.mxu1 %v5698_v25  ;;  %v5718_v25 = vpack.c.bf16 %v233_v19, %v232_v18  ;;  %v249_v28 = vld [vmem:[#allocation5 + $0x508] sm:$0xff]  ;;  %v5750_v29 = vpack.c.bf16 %v265_v21, %v264_v20  ;;  %v72_v37 = vld [vmem:[#allocation2 + $0x10] sm:$0xff]  ;;  %v218_v39 = vld [vmem:[#allocation5 + $0x410] sm:$0xff] }
  0x7b   :  { %5669 = vmatpush3.bf16.msra.mxu0 %v5668_v32  ;;  %v266_v32 = vld [vmem:[#allocation5 + $0x590] sm:$0xff]  ;;  %v7017_v42 = vrot.slane %v72_v37, %v7002_v13  ;;  %v1299_v43 = vcombine.high %v72_v37, %v72_v37  ;;  %v251_v46 = vld [vmem:[#allocation5 + $0x518] sm:$0xff]  ;;  %v236_v47 = vld [vmem:[#allocation5 + $0x4a0] sm:$0xff] }
  0x7c   :  { %5671 = vmatprep.subr.bf16.mxu0 %v5670_v36  ;;  %v5752_v36 = vpack.c.bf16 %v249_v28, %v248_v27  ;;  %v250_v41 = vld [vmem:[#allocation5 + $0x510] sm:$0xff]  ;;  %v5754_v44 = vpack.c.bf16 %v267_v34, %v266_v32  ;;  %v268_v49 = vld [vmem:[#allocation5 + $0x5a0] sm:$0xff]  ;;  %v221_v57 = vld [vmem:[#allocation5 + $0x428] sm:$0xff] }
  0x7d   :  { %5701 = vmatpush3.bf16.msra.mxu1 %v5700_v35  ;;  %v5720_v35 = vpack.c.bf16 %v217_v26, %v216_v23  ;;  %v7023_v52 = vrot.slane %v1299_v43, %v7002_v13  ;;  %v5756_v54 = vpack.c.bf16 %v251_v46, %v250_v41  ;;  %v220_v56 = vld [vmem:[#allocation5 + $0x420] sm:$0xff]  ;;  %v253_v60 = vld [vmem:[#allocation5 + $0x528] sm:$0xff]  ;;  %v271_v0 = vld [vmem:[#allocation5 + $0x5b8] sm:$0xff] }
  0x7e   :  { %5703 = vmatprep.subr.bf16.mxu1 %v5702_v40  ;;  %v219_v40 = vld [vmem:[#allocation5 + $0x418] sm:$0xff]  ;;  %v252_v58 = vld [vmem:[#allocation5 + $0x520] sm:$0xff]  ;;  %v254_v5 = vld [vmem:[#allocation5 + $0x530] sm:$0xff] }
  0x7f   :  { %5673 = vmatpush3.bf16.msra.mxu0 %v5672_v48  ;;  %v237_v48 = vld [vmem:[#allocation5 + $0x4a8] sm:$0xff]  ;;  %v5724_v53 = vpack.c.bf16 %v219_v40, %v218_v39  ;;  %v5760_v1 = vpack.c.bf16 %v253_v60, %v252_v58  ;;  %v223_v4 = vld [vmem:[#allocation5 + $0x438] sm:$0xff]  ;;  %v240_v8 = vld [vmem:[#allocation5 + $0x4c0] sm:$0xff] }
  0x80   :  { %5675 = vmatprep.subr.bf16.mxu0 %v5674_v51  ;;  %v1314_v51 = vcombine.high %v7017_v42, %v7017_v42  ;;  %v255_v7 = vld [vmem:[#allocation5 + $0x538] sm:$0xff]  ;;  %v225_v17 = vld [vmem:[#allocation5 + $0x448] sm:$0xff]  ;;  %v256_v18 = vld [vmem:[#allocation5 + $0x540] sm:$0xff] }
  0x81   :  { %5705 = vmatpush3.bf16.msra.mxu1 %v5704_v50  ;;  %v269_v50 = vld [vmem:[#allocation5 + $0x5a8] sm:$0xff]  ;;  %v5764_v14 = vpack.c.bf16 %v255_v7, %v254_v5  ;;  %v242_v21 = vld [vmem:[#allocation5 + $0x4d0] sm:$0xff]  ;;  %v259_v32 = vld [vmem:[#allocation5 + $0x558] sm:$0xff] }
  0x82   :  { %5707 = vmatprep.subr.bf16.mxu1 %v5706_v55  ;;  %v5726_v55 = vpack.c.bf16 %v237_v48, %v236_v47  ;;  %v5758_v59 = vpack.c.bf16 %v269_v50, %v268_v49  ;;  %v257_v20 = vld [vmem:[#allocation5 + $0x548] sm:$0xff]  ;;  %v274_v23 = vld [vmem:[#allocation5 + $0x5d0] sm:$0xff]  ;;  %v244_v34 = vld [vmem:[#allocation5 + $0x4e0] sm:$0xff] }
  0x83   :  { %5677 = vmatpush3.bf16.msra.mxu0 %v5676_v61  ;;  %v238_v61 = vld [vmem:[#allocation5 + $0x4b0] sm:$0xff]  ;;  %v5768_v26 = vpack.c.bf16 %v257_v20, %v256_v18  ;;  %v277_v37 = vld [vmem:[#allocation5 + $0x5e8] sm:$0xff]  ;;  %v228_v41 = vld [vmem:[#allocation5 + $0x460] sm:$0xff] }
  0x84   :  { %5679 = vmatprep.subr.bf16.mxu0 %v5678_v63  ;;  %v270_v63 = vld [vmem:[#allocation5 + $0x5b0] sm:$0xff]  ;;  %v229_v43 = vld [vmem:[#allocation5 + $0x468] sm:$0xff]  ;;  %v247_v49 = vld [vmem:[#allocation5 + $0x4f8] sm:$0xff] }
  0x85   :  { %5709 = vmatpush3.bf16.msra.mxu1 %v5708_v62  ;;  %v239_v62 = vld [vmem:[#allocation5 + $0x4b8] sm:$0xff]  ;;  %v5762_v6 = vpack.c.bf16 %v271_v0, %v270_v63  ;;  %v226_v28 = vld [vmem:[#allocation5 + $0x450] sm:$0xff]  ;;  %v261_v47 = vld [vmem:[#allocation5 + $0x568] sm:$0xff] }
  0x86   :  { %5711 = vmatprep.subr.bf16.mxu1 %v5710_v3  ;;  %v5730_v2 = vpack.c.bf16 %v239_v62, %v238_v61  ;;  %v222_v3 = vld [vmem:[#allocation5 + $0x430] sm:$0xff]  ;;  %v231_v58 = vld [vmem:[#allocation5 + $0x478] sm:$0xff]  ;;  %v296_v61 = vld [vmem:[#allocation5 + $0x680] sm:$0xff] }
  0x87   :  { %5681 = vmatpush3.bf16.msra.mxu0 %v5680_v9  ;;  %v241_v9 = vld [vmem:[#allocation5 + $0x4c8] sm:$0xff]  ;;  %v5732_v12 = vpack.c.bf16 %v223_v4, %v222_v3  ;;  %v258_v30 = vld [vmem:[#allocation5 + $0x550] sm:$0xff]  ;;  %v263_v60 = vld [vmem:[#allocation5 + $0x578] sm:$0xff] }
  0x88   :  { %5683 = vmatprep.subr.bf16.mxu0 %v5682_v11  ;;  %v273_v11 = vld [vmem:[#allocation5 + $0x5c8] sm:$0xff]  ;;  %v5734_v15 = vpack.c.bf16 %v241_v9, %v240_v8  ;;  %v5772_v39 = vpack.c.bf16 %v259_v32, %v258_v30  ;;  %v246_v48 = vld [vmem:[#allocation5 + $0x4f0] sm:$0xff]  ;;  %v328_v63 = vld [vmem:[#allocation5 + $0x780] sm:$0xff] }
  0x89   :  { %5713 = vmatpush3.bf16.msra.mxu1 %v5712_v10  ;;  %v272_v10 = vld [vmem:[#allocation5 + $0x5c0] sm:$0xff]  ;;  %v278_v50 = vld [vmem:[#allocation5 + $0x5f0] sm:$0xff]  ;;  %v297_v62 = vld [vmem:[#allocation5 + $0x688] sm:$0xff] }
  0x8a   :  { %5715 = vmatprep.subr.bf16.mxu1 %v5714_v16  ;;  %v224_v16 = vld [vmem:[#allocation5 + $0x440] sm:$0xff]  ;;  %v5766_v19 = vpack.c.bf16 %v273_v11, %v272_v10  ;;  %v329_v0 = vld [vmem:[#allocation5 + $0x788] sm:$0xff]  ;;  %v5782_v3 = vpack.c.bf16 %v297_v62, %v296_v61  ;;  %v298_v9 = vld [vmem:[#allocation5 + $0x690] sm:$0xff] }
  0x8b   :  { %5685 = vmatpush3.bf16.msra.mxu0 %v5684_v22  ;;  %v243_v22 = vld [vmem:[#allocation5 + $0x4d8] sm:$0xff]  ;;  %v280_v4 = vld [vmem:[#allocation5 + $0x600] sm:$0xff]  ;;  %v281_v5 = vld [vmem:[#allocation5 + $0x608] sm:$0xff]  ;;  %v5814_v7 = vpack.c.bf16 %v329_v0, %v328_v63 }
  0x8c   :  { %5719 = vmatprep.subr.bf16.mxu0 %v5718_v25  ;;  %v5736_v25 = vpack.c.bf16 %v225_v17, %v224_v16  ;;  %v5738_v27 = vpack.c.bf16 %v243_v22, %v242_v21  ;;  %v313_v8 = vld [vmem:[#allocation5 + $0x708] sm:$0xff]  ;;  %v299_v10 = vld [vmem:[#allocation5 + $0x698] sm:$0xff]  ;;  %v5784_v16 = vpack.c.bf16 %v281_v5, %v280_v4  ;;  %v314_v21 = vld [vmem:[#allocation5 + $0x710] sm:$0xff] }
  0x8d   :  { %5717 = vmatpush3.bf16.msra.mxu1 %v5716_v24  ;;  %v275_v24 = vld [vmem:[#allocation5 + $0x5d8] sm:$0xff]  ;;  %v5786_v18 = vpack.c.bf16 %v299_v10, %v298_v9  ;;  %v321_v62 = vld [vmem:[#allocation5 + $0x748] sm:$0xff]  ;;  %v306_v63 = vld [vmem:[#allocation5 + $0x6d0] sm:$0xff] }
  0x8e   :  { %5751 = vmatprep.subr.bf16.mxu1 %v5750_v29  ;;  %1848 = vmatmul.mubr.f32.vlgmr.msra.gmra.mrb[2].mxu0 %v7007_v33  ;;  %v1315_v33 = vcombine.high %v7023_v52, %v7023_v52  ;;  %v227_v29 = vld [vmem:[#allocation5 + $0x458] sm:$0xff]  ;;  %v5770_v31 = vpack.c.bf16 %v275_v24, %v274_v23  ;;  %v300_v24 = vld [vmem:[#allocation5 + $0x6a0] sm:$0xff]  ;;  %v290_v5 = vld [vmem:[#allocation5 + $0x650] sm:$0xff] }
  0x8f   :  { %5721 = vmatpush3.bf16.msra.mxu0 %v5720_v35  ;;  %1987 = vmatprep.mubr.f32.mxu0 %v1314_v51  ;;  %v245_v35 = vld [vmem:[#allocation5 + $0x4e8] sm:$0xff]  ;;  %v279_v51 = vld [vmem:[#allocation5 + $0x5f8] sm:$0xff]  ;;  %v308_v10 = vld [vmem:[#allocation5 + $0x6e0] sm:$0xff] }
  0x90   :  { %1918 = vmatmul.mubr.f32.vlgmr.msra.gmra.mrb[2].mxu1 %v7012_v45  ;;  %5723 = vmatprep.subr.bf16.mxu0 %v5722_v38  ;;  %v5728_v45 = vpack.c.bf16 %v221_v57, %v220_v56  ;;  %v5740_v38 = vpack.c.bf16 %v227_v29, %v226_v28  ;;  %v5742_v40 = vpack.c.bf16 %v245_v35, %v244_v34  ;;  %v230_v57 = vld [vmem:[#allocation5 + $0x470] sm:$0xff]  ;;  %v283_v20 = vld [vmem:[#allocation5 + $0x618] sm:$0xff]  ;;  %v333_v28 = vld [vmem:[#allocation5 + $0x7a8] sm:$0xff] }
  0x91   :  { %5753 = vmatpush3.bf16.msra.mxu1 %v5752_v36  ;;  %2057 = vmatprep.mubr.f32.mxu1 %v1315_v33  ;;  %v276_v36 = vld [vmem:[#allocation5 + $0x5e0] sm:$0xff]  ;;  %v5746_v56 = vpack.c.bf16 %v247_v49, %v246_v48  ;;  %v262_v33 = vld [vmem:[#allocation5 + $0x570] sm:$0xff]  ;;  %v315_v23 = vld [vmem:[#allocation5 + $0x718] sm:$0xff] }
  0x92   :  { %5755 = vmatprep.subr.bf16.mxu1 %v5754_v44  ;;  %v260_v44 = vld [vmem:[#allocation5 + $0x560] sm:$0xff]  ;;  %v5774_v46 = vpack.c.bf16 %v277_v37, %v276_v36  ;;  %v285_v35 = vld [vmem:[#allocation5 + $0x628] sm:$0xff]  ;;  %v318_v48 = vld [vmem:[#allocation5 + $0x730] sm:$0xff] }
  0x93   :  { %5725 = vmatpush3.bf16.msra.mxu0 %v5724_v53  ;;  %v5744_v53 = vpack.c.bf16 %v229_v43, %v228_v41  ;;  %v284_v34 = vld [vmem:[#allocation5 + $0x620] sm:$0xff]  ;;  %v335_v41 = vld [vmem:[#allocation5 + $0x7b8] sm:$0xff] }
  0x94   :  { %5727 = vmatprep.subr.bf16.mxu0 %v5726_v55  ;;  %v5776_v55 = vpack.c.bf16 %v261_v47, %v260_v44  ;;  %v316_v36 = vld [vmem:[#allocation5 + $0x720] sm:$0xff]  ;;  %v5792_v43 = vpack.c.bf16 %v285_v35, %v284_v34  ;;  %v287_v47 = vld [vmem:[#allocation5 + $0x638] sm:$0xff]  ;;  %v294_v34 = vld [vmem:[#allocation5 + $0x670] sm:$0xff] }
  0x95   :  { %5757 = vmatpush3.bf16.msra.mxu1 %v5756_v54  ;;  %v73_v54 = vld [vmem:[#allocation2 + $0x18] sm:$0xff]  ;;  %v307_v0 = vld [vmem:[#allocation5 + $0x6d8] sm:$0xff] }
  0x96   :  { %5759 = vmatprep.subr.bf16.mxu1 %v5758_v59  ;;  %v5778_v59 = vpack.c.bf16 %v279_v51, %v278_v50  ;;  %v7029_v11 = vrot.slane %v73_v54, %v7002_v13  ;;  %v319_v50 = vld [vmem:[#allocation5 + $0x738] sm:$0xff]  ;;  %v304_v51 = vld [vmem:[#allocation5 + $0x6c0] sm:$0xff]  ;;  %v5802_v4 = vpack.c.bf16 %v307_v0, %v306_v63  ;;  %v378_v63 = vld [vmem:[#allocation5 + $0x910] sm:$0xff] }
  0x97   :  { %5729 = vmatpush3.bf16.msra.mxu0 %v5728_v45  ;;  %v1316_v45 = vcombine.high %v73_v54, %v73_v54  ;;  %v336_v54 = vld [vmem:[#allocation5 + $0x7c0] sm:$0xff]  ;;  %v323_v9 = vld [vmem:[#allocation5 + $0x758] sm:$0xff] }
  0x98   :  { %5731 = vmatprep.subr.bf16.mxu0 %v5730_v2  ;;  %v5780_v2 = vpack.c.bf16 %v263_v60, %v262_v33  ;;  %v288_v33 = vld [vmem:[#allocation5 + $0x640] sm:$0xff]  ;;  %v295_v35 = vld [vmem:[#allocation5 + $0x678] sm:$0xff] }
  0x99   :  { %5761 = vmatpush3.bf16.msra.mxu1 %v5760_v1  ;;  %v5748_v1 = vpack.c.bf16 %v231_v58, %v230_v57  ;;  %v5828_v57 = vpack.c.bf16 %v319_v50, %v318_v48  ;;  %v320_v60 = vld [vmem:[#allocation5 + $0x740] sm:$0xff]  ;;  %v345_v48 = vld [vmem:[#allocation5 + $0x808] sm:$0xff] }
  0x9a   :  { %5763 = vmatprep.subr.bf16.mxu1 %v5762_v6  ;;  %v312_v6 = vld [vmem:[#allocation5 + $0x700] sm:$0xff] }
  0x9b   :  { %5733 = vmatpush3.bf16.msra.mxu0 %v5732_v12  ;;  %v330_v12 = vld [vmem:[#allocation5 + $0x790] sm:$0xff]  ;;  %v5816_v17 = vpack.c.bf16 %v313_v8, %v312_v6  ;;  %v291_v6 = vld [vmem:[#allocation5 + $0x658] sm:$0xff] }
  0x9c   :  { %5735 = vmatprep.subr.bf16.mxu0 %v5734_v15  ;;  %v7032_v15 = vrot.slane %v1316_v45, %v7002_v13  ;;  %v338_v45 = vld [vmem:[#allocation5 + $0x7d0] sm:$0xff] }
  0x9d   :  { %5765 = vmatpush3.bf16.msra.mxu1 %v5764_v14  ;;  %v331_v14 = vld [vmem:[#allocation5 + $0x798] sm:$0xff] }
  0x9e   :  { %5767 = vmatprep.subr.bf16.mxu1 %v5766_v19  ;;  %v282_v19 = vld [vmem:[#allocation5 + $0x610] sm:$0xff]  ;;  %v5818_v22 = vpack.c.bf16 %v331_v14, %v330_v12  ;;  %v1332_v29 = vcombine.high %v7032_v15, %v7032_v15  ;;  %v309_v12 = vld [vmem:[#allocation5 + $0x6e8] sm:$0xff]  ;;  %v340_v14 = vld [vmem:[#allocation5 + $0x7e0] sm:$0xff] }
  0x9f   :  { %5737 = vmatpush3.bf16.msra.mxu0 %v5736_v25  ;;  %v301_v25 = vld [vmem:[#allocation5 + $0x6a8] sm:$0xff]  ;;  %v5788_v30 = vpack.c.bf16 %v283_v20, %v282_v19  ;;  %v5806_v19 = vpack.c.bf16 %v309_v12, %v308_v10  ;;  %v292_v20 = vld [vmem:[#allocation5 + $0x660] sm:$0xff] }
  0xa0   :  { %5739 = vmatprep.subr.bf16.mxu0 %v5738_v27  ;;  %v332_v27 = vld [vmem:[#allocation5 + $0x7a0] sm:$0xff]  ;;  %v5790_v32 = vpack.c.bf16 %v301_v25, %v300_v24  ;;  %v325_v24 = vld [vmem:[#allocation5 + $0x768] sm:$0xff]  ;;  %v310_v25 = vld [vmem:[#allocation5 + $0x6f0] sm:$0xff] }
  0xa1   :  { %5769 = vmatpush3.bf16.msra.mxu1 %v5768_v26  ;;  %v1331_v26 = vcombine.high %v7029_v11, %v7029_v11  ;;  %v5822_v37 = vpack.c.bf16 %v333_v28, %v332_v27  ;;  %v342_v27 = vld [vmem:[#allocation5 + $0x7f0] sm:$0xff]  ;;  %v343_v28 = vld [vmem:[#allocation5 + $0x7f8] sm:$0xff]  ;;  %v348_v10 = vld [vmem:[#allocation5 + $0x820] sm:$0xff] }
  0xa2   :  { %5771 = vmatprep.subr.bf16.mxu1 %v5770_v31  ;;  %v5820_v31 = vpack.c.bf16 %v315_v23, %v314_v21  ;;  %v293_v21 = vld [vmem:[#allocation5 + $0x668] sm:$0xff] }
  0xa3   :  { %5741 = vmatpush3.bf16.msra.mxu0 %v5740_v38  ;;  %v317_v38 = vld [vmem:[#allocation5 + $0x728] sm:$0xff] }
  0xa4   :  { %5743 = vmatprep.subr.bf16.mxu0 %v5742_v40  ;;  %v334_v40 = vld [vmem:[#allocation5 + $0x7b0] sm:$0xff]  ;;  %v349_v12 = vld [vmem:[#allocation5 + $0x828] sm:$0xff] }
  0xa5   :  { %5773 = vmatpush3.bf16.msra.mxu1 %v5772_v39  ;;  %v303_v39 = vld [vmem:[#allocation5 + $0x6b8] sm:$0xff]  ;;  %v5826_v49 = vpack.c.bf16 %v335_v41, %v334_v40  ;;  %v392_v40 = vld [vmem:[#allocation5 + $0x980] sm:$0xff]  ;;  %v393_v41 = vld [vmem:[#allocation5 + $0x988] sm:$0xff] }
  0xa6   :  { %5775 = vmatprep.subr.bf16.mxu1 %v5774_v46  ;;  %v286_v46 = vld [vmem:[#allocation5 + $0x630] sm:$0xff]  ;;  %v5878_v50 = vpack.c.bf16 %v393_v41, %v392_v40  ;;  %v371_v41 = vld [vmem:[#allocation5 + $0x8d8] sm:$0xff] }
  0xa7   :  { %5745 = vmatpush3.bf16.msra.mxu0 %v5744_v53  ;;  %v305_v53 = vld [vmem:[#allocation5 + $0x6c8] sm:$0xff]  ;;  %v370_v40 = vld [vmem:[#allocation5 + $0x8d0] sm:$0xff] }
  0xa8   :  { %5747 = vmatprep.subr.bf16.mxu0 %v5746_v56  ;;  %v5796_v56 = vpack.c.bf16 %v287_v47, %v286_v46  ;;  %v5798_v58 = vpack.c.bf16 %v305_v53, %v304_v51  ;;  %v344_v47 = vld [vmem:[#allocation5 + $0x800] sm:$0xff]  ;;  %v377_v51 = vld [vmem:[#allocation5 + $0x908] sm:$0xff]  ;;  %v362_v53 = vld [vmem:[#allocation5 + $0x890] sm:$0xff] }
  0xa9   :  { %5777 = vmatpush3.bf16.msra.mxu1 %v5776_v55  ;;  %v337_v55 = vld [vmem:[#allocation5 + $0x7c8] sm:$0xff] }
  0xaa   :  { %5779 = vmatprep.subr.bf16.mxu1 %v5778_v59  ;;  %v289_v59 = vld [vmem:[#allocation5 + $0x648] sm:$0xff]  ;;  %v5830_v61 = vpack.c.bf16 %v337_v55, %v336_v54  ;;  %v363_v54 = vld [vmem:[#allocation5 + $0x898] sm:$0xff] }
  0xab   :  { %5749 = vmatpush3.bf16.msra.mxu0 %v5748_v1  ;;  %v339_v1 = vld [vmem:[#allocation5 + $0x7d8] sm:$0xff] }
  0xac   :  { %5783 = vmatprep.subr.bf16.mxu0 %v5782_v3  ;;  %v5832_v3 = vpack.c.bf16 %v321_v62, %v320_v60  ;;  %v5834_v8 = vpack.c.bf16 %v339_v1, %v338_v45  ;;  %v5850_v60 = vpack.c.bf16 %v363_v54, %v362_v53  ;;  %v347_v62 = vld [vmem:[#allocation5 + $0x818] sm:$0xff]  ;;  %v364_v1 = vld [vmem:[#allocation5 + $0x8a0] sm:$0xff] }
  0xad   :  { %5781 = vmatpush3.bf16.msra.mxu1 %v5780_v2  ;;  %v5800_v2 = vpack.c.bf16 %v289_v59, %v288_v33  ;;  %v5848_v33 = vpack.c.bf16 %v345_v48, %v344_v47  ;;  %v379_v45 = vld [vmem:[#allocation5 + $0x918] sm:$0xff]  ;;  %v5866_v47 = vpack.c.bf16 %v371_v41, %v370_v40  ;;  %v354_v48 = vld [vmem:[#allocation5 + $0x850] sm:$0xff]  ;;  %v372_v54 = vld [vmem:[#allocation5 + $0x8e0] sm:$0xff] }
  0xae   :  { %5815 = vmatprep.subr.bf16.mxu1 %v5814_v7  ;;  %1988 = vmatmul.mubr.f32.vlgmr.msra.gmra.mrb[4].mxu0 %v7017_v42  ;;  %v302_v42 = vld [vmem:[#allocation5 + $0x6b0] sm:$0xff]  ;;  %v387_v53 = vld [vmem:[#allocation5 + $0x958] sm:$0xff] }
  0xaf   :  { %5785 = vmatpush3.bf16.msra.mxu0 %v5784_v16  ;;  %2127 = vmatprep.mubr.f32.mxu0 %v1331_v26  ;;  %v5794_v44 = vpack.c.bf16 %v303_v39, %v302_v42  ;;  %v322_v7 = vld [vmem:[#allocation5 + $0x750] sm:$0xff]  ;;  %v341_v16 = vld [vmem:[#allocation5 + $0x7e8] sm:$0xff]  ;;  %v311_v26 = vld [vmem:[#allocation5 + $0x6f8] sm:$0xff] }
  0xb0   :  { %2058 = vmatmul.mubr.f32.vlgmr.msra.gmra.mrb[4].mxu1 %v7023_v52  ;;  %5787 = vmatprep.subr.bf16.mxu0 %v5786_v18  ;;  %v5824_v52 = vpack.c.bf16 %v317_v38, %v316_v36  ;;  %v5836_v18 = vpack.c.bf16 %v323_v9, %v322_v7  ;;  %v5838_v23 = vpack.c.bf16 %v341_v16, %v340_v14  ;;  %v326_v36 = vld [vmem:[#allocation5 + $0x770] sm:$0xff]  ;;  %v327_v38 = vld [vmem:[#allocation5 + $0x778] sm:$0xff]  ;;  %v360_v42 = vld [vmem:[#allocation5 + $0x880] sm:$0xff] }
  0xb1   :  { %5817 = vmatpush3.bf16.msra.mxu1 %v5816_v17  ;;  %2197 = vmatprep.mubr.f32.mxu1 %v1332_v29  ;;  %v5804_v17 = vpack.c.bf16 %v291_v6, %v290_v5  ;;  %v5808_v29 = vpack.c.bf16 %v293_v21, %v292_v20  ;;  %v361_v39 = vld [vmem:[#allocation5 + $0x888] sm:$0xff]  ;;  %v380_v14 = vld [vmem:[#allocation5 + $0x920] sm:$0xff]  ;;  %v399_v20 = vld [vmem:[#allocation5 + $0x9b8] sm:$0xff]  ;;  %v5856_v21 = vpack.c.bf16 %v349_v12, %v348_v10 }
  0xb2   :  { %5819 = vmatprep.subr.bf16.mxu1 %v5818_v22  ;;  %v324_v22 = vld [vmem:[#allocation5 + $0x760] sm:$0xff]  ;;  %v5846_v46 = vpack.c.bf16 %v361_v39, %v360_v42  ;;  %v397_v5 = vld [vmem:[#allocation5 + $0x9a8] sm:$0xff]  ;;  %v358_v10 = vld [vmem:[#allocation5 + $0x870] sm:$0xff] }
  0xb3   :  { %5789 = vmatpush3.bf16.msra.mxu0 %v5788_v30  ;;  %v74_v30 = vld [vmem:[#allocation2 + $0x20] sm:$0xff]  ;;  %v385_v39 = vld [vmem:[#allocation5 + $0x948] sm:$0xff]  ;;  %v359_v12 = vld [vmem:[#allocation5 + $0x878] sm:$0xff] }
  0xb4   :  { %5791 = vmatprep.subr.bf16.mxu0 %v5790_v32  ;;  %v5810_v32 = vpack.c.bf16 %v311_v26, %v310_v25  ;;  %v7041_v55 = vrot.slane %v74_v30, %v7002_v13  ;;  %v382_v25 = vld [vmem:[#allocation5 + $0x930] sm:$0xff] }
  0xb5   :  { %5821 = vmatpush3.bf16.msra.mxu1 %v5820_v31  ;;  %v5840_v31 = vpack.c.bf16 %v325_v24, %v324_v22  ;;  %v351_v24 = vld [vmem:[#allocation5 + $0x838] sm:$0xff]  ;;  %v442_v40 = vld [vmem:[#allocation5 + $0xb10] sm:$0xff] }
  0xb6   :  { %5823 = vmatprep.subr.bf16.mxu1 %v5822_v37  ;;  %v5842_v37 = vpack.c.bf16 %v343_v28, %v342_v27  ;;  %v383_v27 = vld [vmem:[#allocation5 + $0x938] sm:$0xff]  ;;  %v368_v28 = vld [vmem:[#allocation5 + $0x8c0] sm:$0xff] }
  0xb7   :  { %5793 = vmatpush3.bf16.msra.mxu0 %v5792_v43  ;;  %v1333_v43 = vcombine.high %v74_v30, %v74_v30  ;;  %v400_v30 = vld [vmem:[#allocation5 + $0x9c0] sm:$0xff] }
  0xb8   :  { %5795 = vmatprep.subr.bf16.mxu0 %v5794_v44  ;;  %v5844_v44 = vpack.c.bf16 %v327_v38, %v326_v36  ;;  %v352_v36 = vld [vmem:[#allocation5 + $0x840] sm:$0xff] }
  0xb9   :  { %5825 = vmatpush3.bf16.msra.mxu1 %v5824_v52  ;;  %v5812_v52 = vpack.c.bf16 %v295_v35, %v294_v34  ;;  %v5892_v34 = vpack.c.bf16 %v383_v27, %v382_v25  ;;  %v384_v38 = vld [vmem:[#allocation5 + $0x940] sm:$0xff]  ;;  %v409_v25 = vld [vmem:[#allocation5 + $0xa08] sm:$0xff] }
  0xba   :  { %5827 = vmatprep.subr.bf16.mxu1 %v5826_v49  ;;  %v376_v49 = vld [vmem:[#allocation5 + $0x900] sm:$0xff] }
  0xbb   :  { %5797 = vmatpush3.bf16.msra.mxu0 %v5796_v56  ;;  %v394_v56 = vld [vmem:[#allocation5 + $0x990] sm:$0xff]  ;;  %v5880_v59 = vpack.c.bf16 %v377_v51, %v376_v49  ;;  %v355_v49 = vld [vmem:[#allocation5 + $0x858] sm:$0xff] }
  0xbc   :  { %5799 = vmatprep.subr.bf16.mxu0 %v5798_v58  ;;  %v7044_v58 = vrot.slane %v1333_v43, %v7002_v13  ;;  %v402_v43 = vld [vmem:[#allocation5 + $0x9d0] sm:$0xff] }
  0xbd   :  { %5829 = vmatpush3.bf16.msra.mxu1 %v5828_v57  ;;  %v395_v57 = vld [vmem:[#allocation5 + $0x998] sm:$0xff] }
  0xbe   :  { %5831 = vmatprep.subr.bf16.mxu1 %v5830_v61  ;;  %v346_v61 = vld [vmem:[#allocation5 + $0x810] sm:$0xff]  ;;  %v5882_v0 = vpack.c.bf16 %v395_v57, %v394_v56  ;;  %v1349_v6 = vcombine.high %v7044_v58, %v7044_v58  ;;  %v373_v56 = vld [vmem:[#allocation5 + $0x8e8] sm:$0xff]  ;;  %v404_v57 = vld [vmem:[#allocation5 + $0x9e0] sm:$0xff] }
  0xbf   :  { %5801 = vmatpush3.bf16.msra.mxu0 %v5800_v2  ;;  %v365_v2 = vld [vmem:[#allocation5 + $0x8a8] sm:$0xff]  ;;  %v5852_v7 = vpack.c.bf16 %v347_v62, %v346_v61  ;;  %v5870_v61 = vpack.c.bf16 %v373_v56, %v372_v54  ;;  %v356_v62 = vld [vmem:[#allocation5 + $0x860] sm:$0xff] }
  0xc0   :  { %5803 = vmatprep.subr.bf16.mxu0 %v5802_v4  ;;  %v396_v4 = vld [vmem:[#allocation5 + $0x9a0] sm:$0xff]  ;;  %v5854_v9 = vpack.c.bf16 %v365_v2, %v364_v1  ;;  %v389_v1 = vld [vmem:[#allocation5 + $0x968] sm:$0xff]  ;;  %v374_v2 = vld [vmem:[#allocation5 + $0x8f0] sm:$0xff] }
  0xc1   :  { %5833 = vmatpush3.bf16.msra.mxu1 %v5832_v3  ;;  %v1348_v3 = vcombine.high %v7041_v55, %v7041_v55  ;;  %v5886_v16 = vpack.c.bf16 %v397_v5, %v396_v4  ;;  %v406_v4 = vld [vmem:[#allocation5 + $0x9f0] sm:$0xff]  ;;  %v407_v5 = vld [vmem:[#allocation5 + $0x9f8] sm:$0xff]  ;;  %v412_v54 = vld [vmem:[#allocation5 + $0xa20] sm:$0xff] }
  0xc2   :  { %5835 = vmatprep.subr.bf16.mxu1 %v5834_v8  ;;  %v5884_v8 = vpack.c.bf16 %v379_v45, %v378_v63  ;;  %v357_v63 = vld [vmem:[#allocation5 + $0x868] sm:$0xff] }
  0xc3   :  { %5805 = vmatpush3.bf16.msra.mxu0 %v5804_v17  ;;  %v381_v17 = vld [vmem:[#allocation5 + $0x928] sm:$0xff] }
  0xc4   :  { %5807 = vmatprep.subr.bf16.mxu0 %v5806_v19  ;;  %v398_v19 = vld [vmem:[#allocation5 + $0x9b0] sm:$0xff]  ;;  %v413_v56 = vld [vmem:[#allocation5 + $0xa28] sm:$0xff] }
  0xc5   :  { %5837 = vmatpush3.bf16.msra.mxu1 %v5836_v18  ;;  %v367_v18 = vld [vmem:[#allocation5 + $0x8b8] sm:$0xff]  ;;  %v5890_v26 = vpack.c.bf16 %v399_v20, %v398_v19  ;;  %v456_v19 = vld [vmem:[#allocation5 + $0xb80] sm:$0xff]  ;;  %v457_v20 = vld [vmem:[#allocation5 + $0xb88] sm:$0xff] }
  0xc6   :  { %5839 = vmatprep.subr.bf16.mxu1 %v5838_v23  ;;  %v350_v23 = vld [vmem:[#allocation5 + $0x830] sm:$0xff]  ;;  %v5942_v27 = vpack.c.bf16 %v457_v20, %v456_v19  ;;  %v435_v20 = vld [vmem:[#allocation5 + $0xad8] sm:$0xff] }
  0xc7   :  { %5809 = vmatpush3.bf16.msra.mxu0 %v5808_v29  ;;  %v369_v29 = vld [vmem:[#allocation5 + $0x8c8] sm:$0xff]  ;;  %v434_v19 = vld [vmem:[#allocation5 + $0xad0] sm:$0xff] }
  0xc8   :  { %5811 = vmatprep.subr.bf16.mxu0 %v5810_v32  ;;  %v5860_v32 = vpack.c.bf16 %v351_v24, %v350_v23  ;;  %v5862_v35 = vpack.c.bf16 %v369_v29, %v368_v28  ;;  %v408_v24 = vld [vmem:[#allocation5 + $0xa00] sm:$0xff]  ;;  %v441_v28 = vld [vmem:[#allocation5 + $0xb08] sm:$0xff]  ;;  %v426_v29 = vld [vmem:[#allocation5 + $0xa90] sm:$0xff] }
  0xc9   :  { %5841 = vmatpush3.bf16.msra.mxu1 %v5840_v31  ;;  %v401_v31 = vld [vmem:[#allocation5 + $0x9c8] sm:$0xff] }
  0xca   :  { %5843 = vmatprep.subr.bf16.mxu1 %v5842_v37  ;;  %v353_v37 = vld [vmem:[#allocation5 + $0x848] sm:$0xff]  ;;  %v5894_v42 = vpack.c.bf16 %v401_v31, %v400_v30  ;;  %v427_v30 = vld [vmem:[#allocation5 + $0xa98] sm:$0xff] }
  0xcb   :  { %5813 = vmatpush3.bf16.msra.mxu0 %v5812_v52  ;;  %v403_v52 = vld [vmem:[#allocation5 + $0x9d8] sm:$0xff] }
  0xcc   :  { %5847 = vmatprep.subr.bf16.mxu0 %v5846_v46  ;;  %v5896_v46 = vpack.c.bf16 %v385_v39, %v384_v38  ;;  %v5898_v51 = vpack.c.bf16 %v403_v52, %v402_v43  ;;  %v5914_v38 = vpack.c.bf16 %v427_v30, %v426_v29  ;;  %v411_v39 = vld [vmem:[#allocation5 + $0xa18] sm:$0xff]  ;;  %v428_v52 = vld [vmem:[#allocation5 + $0xaa0] sm:$0xff] }
  0xcd   :  { %5845 = vmatpush3.bf16.msra.mxu1 %v5844_v44  ;;  %v5864_v44 = vpack.c.bf16 %v353_v37, %v352_v36  ;;  %v5912_v36 = vpack.c.bf16 %v409_v25, %v408_v24  ;;  %v443_v43 = vld [vmem:[#allocation5 + $0xb18] sm:$0xff]  ;;  %v5930_v24 = vpack.c.bf16 %v435_v20, %v434_v19  ;;  %v418_v25 = vld [vmem:[#allocation5 + $0xa50] sm:$0xff]  ;;  %v436_v30 = vld [vmem:[#allocation5 + $0xae0] sm:$0xff] }
  0xce   :  { %5879 = vmatprep.subr.bf16.mxu1 %v5878_v50  ;;  %2128 = vmatmul.mubr.f32.vlgmr.msra.gmra.mrb[6].mxu0 %v7029_v11  ;;  %v366_v11 = vld [vmem:[#allocation5 + $0x8b0] sm:$0xff]  ;;  %v451_v29 = vld [vmem:[#allocation5 + $0xb58] sm:$0xff] }
  0xcf   :  { %5849 = vmatpush3.bf16.msra.mxu0 %v5848_v33  ;;  %2267 = vmatprep.mubr.f32.mxu0 %v1348_v3  ;;  %v5858_v22 = vpack.c.bf16 %v367_v18, %v366_v11  ;;  %v386_v50 = vld [vmem:[#allocation5 + $0x950] sm:$0xff]  ;;  %v405_v33 = vld [vmem:[#allocation5 + $0x9e8] sm:$0xff]  ;;  %v375_v3 = vld [vmem:[#allocation5 + $0x8f8] sm:$0xff] }
  0xd0   :  { %2198 = vmatmul.mubr.f32.vlgmr.msra.gmra.mrb[6].mxu1 %v7032_v15  ;;  %5851 = vmatprep.subr.bf16.mxu0 %v5850_v60  ;;  %v5888_v15 = vpack.c.bf16 %v381_v17, %v380_v14  ;;  %v5900_v60 = vpack.c.bf16 %v387_v53, %v386_v50  ;;  %v5902_v45 = vpack.c.bf16 %v405_v33, %v404_v57  ;;  %v390_v14 = vld [vmem:[#allocation5 + $0x970] sm:$0xff]  ;;  %v391_v17 = vld [vmem:[#allocation5 + $0x978] sm:$0xff]  ;;  %v424_v11 = vld [vmem:[#allocation5 + $0xa80] sm:$0xff] }
  0xd1   :  { %5881 = vmatpush3.bf16.msra.mxu1 %v5880_v59  ;;  %2337 = vmatprep.mubr.f32.mxu1 %v1349_v6  ;;  %v5868_v59 = vpack.c.bf16 %v355_v49, %v354_v48  ;;  %v5872_v6 = vpack.c.bf16 %v357_v63, %v356_v62  ;;  %v425_v18 = vld [vmem:[#allocation5 + $0xa88] sm:$0xff]  ;;  %v444_v57 = vld [vmem:[#allocation5 + $0xb20] sm:$0xff]  ;;  %v463_v62 = vld [vmem:[#allocation5 + $0xbb8] sm:$0xff]  ;;  %v5920_v63 = vpack.c.bf16 %v413_v56, %v412_v54 }
  0xd2   :  { %5883 = vmatprep.subr.bf16.mxu1 %v5882_v0  ;;  %v388_v0 = vld [vmem:[#allocation5 + $0x960] sm:$0xff]  ;;  %v5910_v23 = vpack.c.bf16 %v425_v18, %v424_v11  ;;  %v461_v48 = vld [vmem:[#allocation5 + $0xba8] sm:$0xff]  ;;  %v422_v54 = vld [vmem:[#allocation5 + $0xa70] sm:$0xff] }
  0xd3   :  { %5853 = vmatpush3.bf16.msra.mxu0 %v5852_v7  ;;  %v75_v7 = vld [vmem:[#allocation2 + $0x28] sm:$0xff]  ;;  %v449_v18 = vld [vmem:[#allocation5 + $0xb48] sm:$0xff]  ;;  %v506_v19 = vld [vmem:[#allocation5 + $0xd10] sm:$0xff] }
  0xd4   :  { %5855 = vmatprep.subr.bf16.mxu0 %v5854_v9  ;;  %v5874_v9 = vpack.c.bf16 %v375_v3, %v374_v2  ;;  %v7053_v31 = vrot.slane %v75_v7, %v7002_v13  ;;  %v446_v2 = vld [vmem:[#allocation5 + $0xb30] sm:$0xff]  ;;  %v423_v56 = vld [vmem:[#allocation5 + $0xa78] sm:$0xff] }
  0xd5   :  { %5885 = vmatpush3.bf16.msra.mxu1 %v5884_v8  ;;  %v5904_v8 = vpack.c.bf16 %v389_v1, %v388_v0  ;;  %v415_v1 = vld [vmem:[#allocation5 + $0xa38] sm:$0xff] }
  0xd6   :  { %5887 = vmatprep.subr.bf16.mxu1 %v5886_v16  ;;  %v5906_v16 = vpack.c.bf16 %v407_v5, %v406_v4  ;;  %v447_v4 = vld [vmem:[#allocation5 + $0xb38] sm:$0xff]  ;;  %v432_v5 = vld [vmem:[#allocation5 + $0xac0] sm:$0xff] }
  0xd7   :  { %5857 = vmatpush3.bf16.msra.mxu0 %v5856_v21  ;;  %v1350_v21 = vcombine.high %v75_v7, %v75_v7  ;;  %v464_v7 = vld [vmem:[#allocation5 + $0xbc0] sm:$0xff] }
  0xd8   :  { %5859 = vmatprep.subr.bf16.mxu0 %v5858_v22  ;;  %v5908_v22 = vpack.c.bf16 %v391_v17, %v390_v14  ;;  %v416_v14 = vld [vmem:[#allocation5 + $0xa40] sm:$0xff] }
  0xd9   :  { %5889 = vmatpush3.bf16.msra.mxu1 %v5888_v15  ;;  %v5876_v15 = vpack.c.bf16 %v359_v12, %v358_v10  ;;  %v5956_v10 = vpack.c.bf16 %v447_v4, %v446_v2  ;;  %v448_v17 = vld [vmem:[#allocation5 + $0xb40] sm:$0xff]  ;;  %v473_v2 = vld [vmem:[#allocation5 + $0xc08] sm:$0xff] }
  0xda   :  { %5891 = vmatprep.subr.bf16.mxu1 %v5890_v26  ;;  %v440_v26 = vld [vmem:[#allocation5 + $0xb00] sm:$0xff] }
  0xdb   :  { %5861 = vmatpush3.bf16.msra.mxu0 %v5860_v32  ;;  %v458_v32 = vld [vmem:[#allocation5 + $0xb90] sm:$0xff]  ;;  %v5944_v37 = vpack.c.bf16 %v441_v28, %v440_v26  ;;  %v419_v26 = vld [vmem:[#allocation5 + $0xa58] sm:$0xff] }
  0xdc   :  { %5863 = vmatprep.subr.bf16.mxu0 %v5862_v35  ;;  %v7056_v35 = vrot.slane %v1350_v21, %v7002_v13  ;;  %v466_v21 = vld [vmem:[#allocation5 + $0xbd0] sm:$0xff] }
  0xdd   :  { %5893 = vmatpush3.bf16.msra.mxu1 %v5892_v34  ;;  %v459_v34 = vld [vmem:[#allocation5 + $0xb98] sm:$0xff] }
  0xde   :  { %5895 = vmatprep.subr.bf16.mxu1 %v5894_v42  ;;  %v410_v42 = vld [vmem:[#allocation5 + $0xa10] sm:$0xff]  ;;  %v5946_v41 = vpack.c.bf16 %v459_v34, %v458_v32  ;;  %v1366_v49 = vcombine.high %v7056_v35, %v7056_v35  ;;  %v437_v32 = vld [vmem:[#allocation5 + $0xae8] sm:$0xff]  ;;  %v468_v34 = vld [vmem:[#allocation5 + $0xbe0] sm:$0xff] }
  0xdf   :  { %5865 = vmatpush3.bf16.msra.mxu0 %v5864_v44  ;;  %v429_v44 = vld [vmem:[#allocation5 + $0xaa8] sm:$0xff]  ;;  %v5916_v50 = vpack.c.bf16 %v411_v39, %v410_v42  ;;  %v5934_v42 = vpack.c.bf16 %v437_v32, %v436_v30  ;;  %v420_v39 = vld [vmem:[#allocation5 + $0xa60] sm:$0xff] }
  0xe0   :  { %5867 = vmatprep.subr.bf16.mxu0 %v5866_v47  ;;  %v460_v47 = vld [vmem:[#allocation5 + $0xba0] sm:$0xff]  ;;  %v5918_v53 = vpack.c.bf16 %v429_v44, %v428_v52  ;;  %v453_v52 = vld [vmem:[#allocation5 + $0xb68] sm:$0xff]  ;;  %v438_v44 = vld [vmem:[#allocation5 + $0xaf0] sm:$0xff] }
  0xe1   :  { %5897 = vmatpush3.bf16.msra.mxu1 %v5896_v46  ;;  %v1365_v46 = vcombine.high %v7053_v31, %v7053_v31  ;;  %v5950_v33 = vpack.c.bf16 %v461_v48, %v460_v47  ;;  %v470_v47 = vld [vmem:[#allocation5 + $0xbf0] sm:$0xff]  ;;  %v471_v48 = vld [vmem:[#allocation5 + $0xbf8] sm:$0xff]  ;;  %v476_v30 = vld [vmem:[#allocation5 + $0xc20] sm:$0xff] }
  0xe2   :  { %5899 = vmatprep.subr.bf16.mxu1 %v5898_v51  ;;  %v5948_v51 = vpack.c.bf16 %v443_v43, %v442_v40  ;;  %v421_v40 = vld [vmem:[#allocation5 + $0xa68] sm:$0xff] }
  0xe3   :  { %5869 = vmatpush3.bf16.msra.mxu0 %v5868_v59  ;;  %v445_v59 = vld [vmem:[#allocation5 + $0xb28] sm:$0xff] }
  0xe4   :  { %5871 = vmatprep.subr.bf16.mxu0 %v5870_v61  ;;  %v462_v61 = vld [vmem:[#allocation5 + $0xbb0] sm:$0xff]  ;;  %v477_v32 = vld [vmem:[#allocation5 + $0xc28] sm:$0xff] }
  0xe5   :  { %5901 = vmatpush3.bf16.msra.mxu1 %v5900_v60  ;;  %v431_v60 = vld [vmem:[#allocation5 + $0xab8] sm:$0xff]  ;;  %v5954_v3 = vpack.c.bf16 %v463_v62, %v462_v61  ;;  %v520_v61 = vld [vmem:[#allocation5 + $0xd80] sm:$0xff]  ;;  %v521_v62 = vld [vmem:[#allocation5 + $0xd88] sm:$0xff] }
  0xe6   :  { %5903 = vmatprep.subr.bf16.mxu1 %v5902_v45  ;;  %v414_v45 = vld [vmem:[#allocation5 + $0xa30] sm:$0xff]  ;;  %v6006_v4 = vpack.c.bf16 %v521_v62, %v520_v61  ;;  %v499_v62 = vld [vmem:[#allocation5 + $0xcd8] sm:$0xff] }
  0xe7   :  { %5873 = vmatpush3.bf16.msra.mxu0 %v5872_v6  ;;  %v433_v6 = vld [vmem:[#allocation5 + $0xac8] sm:$0xff]  ;;  %v498_v61 = vld [vmem:[#allocation5 + $0xcd0] sm:$0xff] }
  0xe8   :  { %5875 = vmatprep.subr.bf16.mxu0 %v5874_v9  ;;  %v5924_v9 = vpack.c.bf16 %v415_v1, %v414_v45  ;;  %v5926_v12 = vpack.c.bf16 %v433_v6, %v432_v5  ;;  %v472_v1 = vld [vmem:[#allocation5 + $0xc00] sm:$0xff]  ;;  %v505_v5 = vld [vmem:[#allocation5 + $0xd08] sm:$0xff]  ;;  %v490_v6 = vld [vmem:[#allocation5 + $0xc90] sm:$0xff] }
  0xe9   :  { %5905 = vmatpush3.bf16.msra.mxu1 %v5904_v8  ;;  %v465_v8 = vld [vmem:[#allocation5 + $0xbc8] sm:$0xff] }
  0xea   :  { %5907 = vmatprep.subr.bf16.mxu1 %v5906_v16  ;;  %v417_v16 = vld [vmem:[#allocation5 + $0xa48] sm:$0xff]  ;;  %v5958_v11 = vpack.c.bf16 %v465_v8, %v464_v7  ;;  %v491_v7 = vld [vmem:[#allocation5 + $0xc98] sm:$0xff] }
  0xeb   :  { %5877 = vmatpush3.bf16.msra.mxu0 %v5876_v15  ;;  %v467_v15 = vld [vmem:[#allocation5 + $0xbd8] sm:$0xff] }
  0xec   :  { %5911 = vmatprep.subr.bf16.mxu0 %v5910_v23  ;;  %v5960_v23 = vpack.c.bf16 %v449_v18, %v448_v17  ;;  %v5962_v28 = vpack.c.bf16 %v467_v15, %v466_v21  ;;  %v5978_v17 = vpack.c.bf16 %v491_v7, %v490_v6  ;;  %v475_v18 = vld [vmem:[#allocation5 + $0xc18] sm:$0xff]  ;;  %v492_v15 = vld [vmem:[#allocation5 + $0xca0] sm:$0xff] }
  0xed   :  { %5909 = vmatpush3.bf16.msra.mxu1 %v5908_v22  ;;  %v5928_v22 = vpack.c.bf16 %v417_v16, %v416_v14  ;;  %v5976_v14 = vpack.c.bf16 %v473_v2, %v472_v1  ;;  %v507_v21 = vld [vmem:[#allocation5 + $0xd18] sm:$0xff]  ;;  %v5994_v1 = vpack.c.bf16 %v499_v62, %v498_v61  ;;  %v482_v2 = vld [vmem:[#allocation5 + $0xc50] sm:$0xff]  ;;  %v500_v7 = vld [vmem:[#allocation5 + $0xce0] sm:$0xff] }
  0xee   :  { %5943 = vmatprep.subr.bf16.mxu1 %v5942_v27  ;;  %2268 = vmatmul.mubr.f32.vlgmr.msra.gmra.mrb[8].mxu0 %v7041_v55  ;;  %v430_v55 = vld [vmem:[#allocation5 + $0xab0] sm:$0xff]  ;;  %v515_v6 = vld [vmem:[#allocation5 + $0xd58] sm:$0xff] }
  0xef   :  { %5913 = vmatpush3.bf16.msra.mxu0 %v5912_v36  ;;  %2407 = vmatprep.mubr.f32.mxu0 %v1365_v46  ;;  %v5922_v0 = vpack.c.bf16 %v431_v60, %v430_v55  ;;  %v450_v27 = vld [vmem:[#allocation5 + $0xb50] sm:$0xff]  ;;  %v469_v36 = vld [vmem:[#allocation5 + $0xbe8] sm:$0xff]  ;;  %v439_v46 = vld [vmem:[#allocation5 + $0xaf8] sm:$0xff] }
  0xf0   :  { %2338 = vmatmul.mubr.f32.vlgmr.msra.gmra.mrb[8].mxu1 %v7044_v58  ;;  %5915 = vmatprep.subr.bf16.mxu0 %v5914_v38  ;;  %v5952_v58 = vpack.c.bf16 %v445_v59, %v444_v57  ;;  %v5964_v38 = vpack.c.bf16 %v451_v29, %v450_v27  ;;  %v5966_v43 = vpack.c.bf16 %v469_v36, %v468_v34  ;;  %v454_v57 = vld [vmem:[#allocation5 + $0xb70] sm:$0xff]  ;;  %v455_v59 = vld [vmem:[#allocation5 + $0xb78] sm:$0xff]  ;;  %v488_v55 = vld [vmem:[#allocation5 + $0xc80] sm:$0xff] }
  0xf1   :  { %5945 = vmatpush3.bf16.msra.mxu1 %v5944_v37  ;;  %2477 = vmatprep.mubr.f32.mxu1 %v1366_v49  ;;  %v5932_v37 = vpack.c.bf16 %v419_v26, %v418_v25  ;;  %v5936_v49 = vpack.c.bf16 %v421_v40, %v420_v39  ;;  %v489_v60 = vld [vmem:[#allocation5 + $0xc88] sm:$0xff]  ;;  %v508_v34 = vld [vmem:[#allocation5 + $0xd20] sm:$0xff]  ;;  %v527_v39 = vld [vmem:[#allocation5 + $0xdb8] sm:$0xff]  ;;  %v5984_v40 = vpack.c.bf16 %v477_v32, %v476_v30 }
  0xf2   :  { %5947 = vmatprep.subr.bf16.mxu1 %v5946_v41  ;;  %v452_v41 = vld [vmem:[#allocation5 + $0xb60] sm:$0xff]  ;;  %v5974_v45 = vpack.c.bf16 %v489_v60, %v488_v55  ;;  %v525_v25 = vld [vmem:[#allocation5 + $0xda8] sm:$0xff]  ;;  %v486_v30 = vld [vmem:[#allocation5 + $0xc70] sm:$0xff] }
  0xf3   :  { %5917 = vmatpush3.bf16.msra.mxu0 %v5916_v50  ;;  %v76_v50 = vld [vmem:[#allocation2 + $0x30] sm:$0xff]  ;;  %v513_v60 = vld [vmem:[#allocation5 + $0xd48] sm:$0xff]  ;;  %v487_v32 = vld [vmem:[#allocation5 + $0xc78] sm:$0xff] }
  0xf4   :  { %5919 = vmatprep.subr.bf16.mxu0 %v5918_v53  ;;  %v5938_v53 = vpack.c.bf16 %v439_v46, %v438_v44  ;;  %v7065_v8 = vrot.slane %v76_v50, %v7002_v13  ;;  %v510_v44 = vld [vmem:[#allocation5 + $0xd30] sm:$0xff] }
  0xf5   :  { %5949 = vmatpush3.bf16.msra.mxu1 %v5948_v51  ;;  %v5968_v51 = vpack.c.bf16 %v453_v52, %v452_v41  ;;  %v479_v52 = vld [vmem:[#allocation5 + $0xc38] sm:$0xff]  ;;  %v570_v61 = vld [vmem:[#allocation5 + $0xf10] sm:$0xff] }
  0xf6   :  { %5951 = vmatprep.subr.bf16.mxu1 %v5950_v33  ;;  %v5970_v33 = vpack.c.bf16 %v471_v48, %v470_v47  ;;  %v511_v47 = vld [vmem:[#allocation5 + $0xd38] sm:$0xff]  ;;  %v496_v48 = vld [vmem:[#allocation5 + $0xcc0] sm:$0xff] }
  0xf7   :  { %5921 = vmatpush3.bf16.msra.mxu0 %v5920_v63  ;;  %v1367_v63 = vcombine.high %v76_v50, %v76_v50  ;;  %v528_v50 = vld [vmem:[#allocation5 + $0xdc0] sm:$0xff] }
  0xf8   :  { %5923 = vmatprep.subr.bf16.mxu0 %v5922_v0  ;;  %v5972_v0 = vpack.c.bf16 %v455_v59, %v454_v57  ;;  %v480_v57 = vld [vmem:[#allocation5 + $0xc40] sm:$0xff] }
  0xf9   :  { %5953 = vmatpush3.bf16.msra.mxu1 %v5952_v58  ;;  %v5940_v58 = vpack.c.bf16 %v423_v56, %v422_v54  ;;  %v6020_v54 = vpack.c.bf16 %v511_v47, %v510_v44  ;;  %v512_v59 = vld [vmem:[#allocation5 + $0xd40] sm:$0xff]  ;;  %v537_v44 = vld [vmem:[#allocation5 + $0xe08] sm:$0xff] }
  0xfa   :  { %5955 = vmatprep.subr.bf16.mxu1 %v5954_v3  ;;  %v504_v3 = vld [vmem:[#allocation5 + $0xd00] sm:$0xff] }
  0xfb   :  { %5925 = vmatpush3.bf16.msra.mxu0 %v5924_v9  ;;  %v522_v9 = vld [vmem:[#allocation5 + $0xd90] sm:$0xff]  ;;  %v6008_v16 = vpack.c.bf16 %v505_v5, %v504_v3  ;;  %v483_v3 = vld [vmem:[#allocation5 + $0xc58] sm:$0xff] }
  0xfc   :  { %5927 = vmatprep.subr.bf16.mxu0 %v5926_v12  ;;  %v7068_v12 = vrot.slane %v1367_v63, %v7002_v13  ;;  %v530_v63 = vld [vmem:[#allocation5 + $0xdd0] sm:$0xff] }
  0xfd   :  { %5957 = vmatpush3.bf16.msra.mxu1 %v5956_v10  ;;  %v523_v10 = vld [vmem:[#allocation5 + $0xd98] sm:$0xff] }
  0xfe   :  { %5959 = vmatprep.subr.bf16.mxu1 %v5958_v11  ;;  %v474_v11 = vld [vmem:[#allocation5 + $0xc10] sm:$0xff]  ;;  %v6010_v20 = vpack.c.bf16 %v523_v10, %v522_v9  ;;  %v1383_v26 = vcombine.high %v7068_v12, %v7068_v12  ;;  %v501_v9 = vld [vmem:[#allocation5 + $0xce8] sm:$0xff]  ;;  %v532_v10 = vld [vmem:[#allocation5 + $0xde0] sm:$0xff] }
  0xff   :  { %5929 = vmatpush3.bf16.msra.mxu0 %v5928_v22  ;;  %v493_v22 = vld [vmem:[#allocation5 + $0xca8] sm:$0xff]  ;;  %v5980_v27 = vpack.c.bf16 %v475_v18, %v474_v11  ;;  %v5998_v11 = vpack.c.bf16 %v501_v9, %v500_v7  ;;  %v484_v18 = vld [vmem:[#allocation5 + $0xc60] sm:$0xff] }
 0x100   :  { %5931 = vmatprep.subr.bf16.mxu0 %v5930_v24  ;;  %v524_v24 = vld [vmem:[#allocation5 + $0xda0] sm:$0xff]  ;;  %v5982_v29 = vpack.c.bf16 %v493_v22, %v492_v15  ;;  %v517_v15 = vld [vmem:[#allocation5 + $0xd68] sm:$0xff]  ;;  %v502_v22 = vld [vmem:[#allocation5 + $0xcf0] sm:$0xff] }
 0x101   :  { %5961 = vmatpush3.bf16.msra.mxu1 %v5960_v23  ;;  %v1382_v23 = vcombine.high %v7065_v8, %v7065_v8  ;;  %v6014_v36 = vpack.c.bf16 %v525_v25, %v524_v24  ;;  %v534_v24 = vld [vmem:[#allocation5 + $0xdf0] sm:$0xff]  ;;  %v535_v25 = vld [vmem:[#allocation5 + $0xdf8] sm:$0xff]  ;;  %v540_v7 = vld [vmem:[#allocation5 + $0xe20] sm:$0xff] }
 0x102   :  { %5963 = vmatprep.subr.bf16.mxu1 %v5962_v28  ;;  %v6012_v28 = vpack.c.bf16 %v507_v21, %v506_v19  ;;  %v485_v19 = vld [vmem:[#allocation5 + $0xc68] sm:$0xff] }
 0x103   :  { %5933 = vmatpush3.bf16.msra.mxu0 %v5932_v37  ;;  %v509_v37 = vld [vmem:[#allocation5 + $0xd28] sm:$0xff] }
 0x104   :  { %5935 = vmatprep.subr.bf16.mxu0 %v5934_v42  ;;  %v526_v42 = vld [vmem:[#allocation5 + $0xdb0] sm:$0xff]  ;;  %v541_v9 = vld [vmem:[#allocation5 + $0xe28] sm:$0xff] }
 0x105   :  { %5965 = vmatpush3.bf16.msra.mxu1 %v5964_v38  ;;  %v495_v38 = vld [vmem:[#allocation5 + $0xcb8] sm:$0xff]  ;;  %v6018_v46 = vpack.c.bf16 %v527_v39, %v526_v42  ;;  %v584_v42 = vld [vmem:[#allocation5 + $0xf80] sm:$0xff]  ;;  %v585_v39 = vld [vmem:[#allocation5 + $0xf88] sm:$0xff] }
 0x106   :  { %5967 = vmatprep.subr.bf16.mxu1 %v5966_v43  ;;  %v478_v43 = vld [vmem:[#allocation5 + $0xc30] sm:$0xff]  ;;  %v6070_v47 = vpack.c.bf16 %v585_v39, %v584_v42  ;;  %v563_v39 = vld [vmem:[#allocation5 + $0xed8] sm:$0xff] }
 0x107   :  { %5937 = vmatpush3.bf16.msra.mxu0 %v5936_v49  ;;  %v497_v49 = vld [vmem:[#allocation5 + $0xcc8] sm:$0xff]  ;;  %v562_v42 = vld [vmem:[#allocation5 + $0xed0] sm:$0xff] }
 0x108   :  { %5939 = vmatprep.subr.bf16.mxu0 %v5938_v53  ;;  %v5988_v53 = vpack.c.bf16 %v479_v52, %v478_v43  ;;  %v5990_v56 = vpack.c.bf16 %v497_v49, %v496_v48  ;;  %v536_v52 = vld [vmem:[#allocation5 + $0xe00] sm:$0xff]  ;;  %v569_v48 = vld [vmem:[#allocation5 + $0xf08] sm:$0xff]  ;;  %v554_v49 = vld [vmem:[#allocation5 + $0xe90] sm:$0xff] }
 0x109   :  { %5969 = vmatpush3.bf16.msra.mxu1 %v5968_v51  ;;  %v529_v51 = vld [vmem:[#allocation5 + $0xdc8] sm:$0xff] }
 0x10a   :  { %5971 = vmatprep.subr.bf16.mxu1 %v5970_v33  ;;  %v481_v33 = vld [vmem:[#allocation5 + $0xc48] sm:$0xff]  ;;  %v6022_v55 = vpack.c.bf16 %v529_v51, %v528_v50  ;;  %v555_v50 = vld [vmem:[#allocation5 + $0xe98] sm:$0xff] }
 0x10b   :  { %5941 = vmatpush3.bf16.msra.mxu0 %v5940_v58  ;;  %v531_v58 = vld [vmem:[#allocation5 + $0xdd8] sm:$0xff] }
 0x10c   :  { %5975 = vmatprep.subr.bf16.mxu0 %v5974_v45  ;;  %v6024_v45 = vpack.c.bf16 %v513_v60, %v512_v59  ;;  %v6026_v5 = vpack.c.bf16 %v531_v58, %v530_v63  ;;  %v6042_v59 = vpack.c.bf16 %v555_v50, %v554_v49  ;;  %v539_v60 = vld [vmem:[#allocation5 + $0xe18] sm:$0xff]  ;;  %v556_v58 = vld [vmem:[#allocation5 + $0xea0] sm:$0xff] }
 0x10d   :  { %5973 = vmatpush3.bf16.msra.mxu1 %v5972_v0  ;;  %v5992_v0 = vpack.c.bf16 %v481_v33, %v480_v57  ;;  %v6040_v57 = vpack.c.bf16 %v537_v44, %v536_v52  ;;  %v571_v63 = vld [vmem:[#allocation5 + $0xf18] sm:$0xff]  ;;  %v6058_v52 = vpack.c.bf16 %v563_v39, %v562_v42  ;;  %v546_v44 = vld [vmem:[#allocation5 + $0xe50] sm:$0xff]  ;;  %v564_v50 = vld [vmem:[#allocation5 + $0xee0] sm:$0xff] }
 0x10e   :  { %6007 = vmatprep.subr.bf16.mxu1 %v6006_v4  ;;  %2408 = vmatmul.mubr.f32.vlgmr.msra.gmra.mrb[10].mxu0 %v7053_v31  ;;  %v494_v31 = vld [vmem:[#allocation5 + $0xcb0] sm:$0xff]  ;;  %v579_v49 = vld [vmem:[#allocation5 + $0xf58] sm:$0xff] }
 0x10f   :  { %5977 = vmatpush3.bf16.msra.mxu0 %v5976_v14  ;;  %2547 = vmatprep.mubr.f32.mxu0 %v1382_v23  ;;  %v5986_v41 = vpack.c.bf16 %v495_v38, %v494_v31  ;;  %v514_v4 = vld [vmem:[#allocation5 + $0xd50] sm:$0xff]  ;;  %v533_v14 = vld [vmem:[#allocation5 + $0xde8] sm:$0xff]  ;;  %v503_v23 = vld [vmem:[#allocation5 + $0xcf8] sm:$0xff] }
 0x110   :  { %2478 = vmatmul.mubr.f32.vlgmr.msra.gmra.mrb[10].mxu1 %v7056_v35  ;;  %5979 = vmatprep.subr.bf16.mxu0 %v5978_v17  ;;  %v6016_v35 = vpack.c.bf16 %v509_v37, %v508_v34  ;;  %v6028_v17 = vpack.c.bf16 %v515_v6, %v514_v4  ;;  %v6030_v21 = vpack.c.bf16 %v533_v14, %v532_v10  ;;  %v518_v34 = vld [vmem:[#allocation5 + $0xd70] sm:$0xff]  ;;  %v519_v37 = vld [vmem:[#allocation5 + $0xd78] sm:$0xff]  ;;  %v552_v31 = vld [vmem:[#allocation5 + $0xe80] sm:$0xff] }
 0x111   :  { %6009 = vmatpush3.bf16.msra.mxu1 %v6008_v16  ;;  %2617 = vmatprep.mubr.f32.mxu1 %v1383_v26  ;;  %v5996_v16 = vpack.c.bf16 %v483_v3, %v482_v2  ;;  %v6000_v26 = vpack.c.bf16 %v485_v19, %v484_v18  ;;  %v553_v38 = vld [vmem:[#allocation5 + $0xe88] sm:$0xff]  ;;  %v572_v10 = vld [vmem:[#allocation5 + $0xf20] sm:$0xff]  ;;  %v591_v18 = vld [vmem:[#allocation5 + $0xfb8] sm:$0xff]  ;;  %v6048_v19 = vpack.c.bf16 %v541_v9, %v540_v7 }
 0x112   :  { %6011 = vmatprep.subr.bf16.mxu1 %v6010_v20  ;;  %v516_v20 = vld [vmem:[#allocation5 + $0xd60] sm:$0xff]  ;;  %v6038_v43 = vpack.c.bf16 %v553_v38, %v552_v31  ;;  %v589_v2 = vld [vmem:[#allocation5 + $0xfa8] sm:$0xff]  ;;  %v650_v39 = vld [vmem:[#allocation5 + $0x1190] sm:$0xff] }
 0x113   :  { %5981 = vmatpush3.bf16.msra.mxu0 %v5980_v27  ;;  %v77_v27 = vld [vmem:[#allocation2 + $0x38] sm:$0xff] }
 0x114   :  { %5983 = vmatprep.subr.bf16.mxu0 %v5982_v29  ;;  %v6002_v29 = vpack.c.bf16 %v503_v23, %v502_v22  ;;  %v7077_v51 = vrot.slane %v77_v27, %v7002_v13  ;;  %v574_v22 = vld [vmem:[#allocation5 + $0xf30] sm:$0xff]  ;;  %v577_v38 = vld [vmem:[#allocation5 + $0xf48] sm:$0xff] }
 0x115   :  { %6013 = vmatpush3.bf16.msra.mxu1 %v6012_v28  ;;  %v6032_v28 = vpack.c.bf16 %v517_v15, %v516_v20  ;;  %v543_v15 = vld [vmem:[#allocation5 + $0xe38] sm:$0xff] }
 0x116   :  { %6015 = vmatprep.subr.bf16.mxu1 %v6014_v36  ;;  %v6034_v36 = vpack.c.bf16 %v535_v25, %v534_v24  ;;  %v575_v24 = vld [vmem:[#allocation5 + $0xf38] sm:$0xff]  ;;  %v560_v25 = vld [vmem:[#allocation5 + $0xec0] sm:$0xff] }
 0x117   :  { %5985 = vmatpush3.bf16.msra.mxu0 %v5984_v40  ;;  %v1384_v40 = vcombine.high %v77_v27, %v77_v27  ;;  %v592_v27 = vld [vmem:[#allocation5 + $0xfc0] sm:$0xff] }
 0x118   :  { %5987 = vmatprep.subr.bf16.mxu0 %v5986_v41  ;;  %v6036_v41 = vpack.c.bf16 %v519_v37, %v518_v34  ;;  %v544_v34 = vld [vmem:[#allocation5 + $0xe40] sm:$0xff] }
 0x119   :  { %6017 = vmatpush3.bf16.msra.mxu1 %v6016_v35  ;;  %v6004_v35 = vpack.c.bf16 %v487_v32, %v486_v30  ;;  %v6084_v30 = vpack.c.bf16 %v575_v24, %v574_v22  ;;  %v576_v37 = vld [vmem:[#allocation5 + $0xf40] sm:$0xff]  ;;  %v617_v22 = vld [vmem:[#allocation5 + $0x1088] sm:$0xff] }
 0x11a   :  { %6019 = vmatprep.subr.bf16.mxu1 %v6018_v46  ;;  %v568_v46 = vld [vmem:[#allocation5 + $0xf00] sm:$0xff]  ;;  %v649_v24 = vld [vmem:[#allocation5 + $0x1188] sm:$0xff] }
 0x11b   :  { %5989 = vmatpush3.bf16.msra.mxu0 %v5988_v53  ;;  %v586_v53 = vld [vmem:[#allocation5 + $0xf90] sm:$0xff]  ;;  %v6072_v33 = vpack.c.bf16 %v569_v48, %v568_v46  ;;  %v547_v46 = vld [vmem:[#allocation5 + $0xe58] sm:$0xff] }
 0x11c   :  { %5991 = vmatprep.subr.bf16.mxu0 %v5990_v56  ;;  %v7080_v56 = vrot.slane %v1384_v40, %v7002_v13  ;;  %v594_v40 = vld [vmem:[#allocation5 + $0xfd0] sm:$0xff] }
 0x11d   :  { %6021 = vmatpush3.bf16.msra.mxu1 %v6020_v54  ;;  %v587_v54 = vld [vmem:[#allocation5 + $0xf98] sm:$0xff] }
 0x11e   :  { %6023 = vmatprep.subr.bf16.mxu1 %v6022_v55  ;;  %v538_v55 = vld [vmem:[#allocation5 + $0xe10] sm:$0xff]  ;;  %v6074_v62 = vpack.c.bf16 %v587_v54, %v586_v53  ;;  %v1400_v3 = vcombine.high %v7080_v56, %v7080_v56  ;;  %v565_v53 = vld [vmem:[#allocation5 + $0xee8] sm:$0xff]  ;;  %v596_v54 = vld [vmem:[#allocation5 + $0xfe0] sm:$0xff] }
 0x11f   :  { %5993 = vmatpush3.bf16.msra.mxu0 %v5992_v0  ;;  %v557_v0 = vld [vmem:[#allocation5 + $0xea8] sm:$0xff]  ;;  %v6044_v4 = vpack.c.bf16 %v539_v60, %v538_v55  ;;  %v6062_v55 = vpack.c.bf16 %v565_v53, %v564_v50  ;;  %v548_v60 = vld [vmem:[#allocation5 + $0xe60] sm:$0xff] }
 0x120   :  { %5995 = vmatprep.subr.bf16.mxu0 %v5994_v1  ;;  %v588_v1 = vld [vmem:[#allocation5 + $0xfa0] sm:$0xff]  ;;  %v6046_v6 = vpack.c.bf16 %v557_v0, %v556_v58  ;;  %v581_v0 = vld [vmem:[#allocation5 + $0xf68] sm:$0xff] }
 0x121   :  { %6025 = vmatpush3.bf16.msra.mxu1 %v6024_v45  ;;  %v1399_v45 = vcombine.high %v7077_v51, %v7077_v51  ;;  %v6078_v14 = vpack.c.bf16 %v589_v2, %v588_v1  ;;  %v567_v1 = vld [vmem:[#allocation5 + $0xef8] sm:$0xff]  ;;  %v4276_v2 = vld [vmem:[#allocation7] ss:$0 sm:$0xff]  ;;  %v621_v53 = vld [vmem:[#allocation5 + $0x10a8] sm:$0xff] }
 0x122   :  { %6027 = vmatprep.subr.bf16.mxu1 %v6026_v5  ;;  %v6076_v5 = vpack.c.bf16 %v571_v63, %v570_v61  ;;  %v549_v61 = vld [vmem:[#allocation5 + $0xe68] sm:$0xff]  ;;  %v620_v50 = vld [vmem:[#allocation5 + $0x10a0] sm:$0xff] }
 0x123   :  { %5997 = vmatpush3.bf16.msra.mxu0 %v5996_v16  ;;  %v573_v16 = vld [vmem:[#allocation5 + $0xf28] sm:$0xff] }
 0x124   :  { %5999 = vmatprep.subr.bf16.mxu0 %v5998_v11  ;;  %v590_v11 = vld [vmem:[#allocation5 + $0xfb0] sm:$0xff] }
 0x125   :  { %6029 = vmatpush3.bf16.msra.mxu1 %v6028_v17  ;;  %v559_v17 = vld [vmem:[#allocation5 + $0xeb8] sm:$0xff]  ;;  %v6082_v23 = vpack.c.bf16 %v591_v18, %v590_v11  ;;  %v550_v11 = vld [vmem:[#allocation5 + $0xe70] sm:$0xff] }
 0x126   :  { %6031 = vmatprep.subr.bf16.mxu1 %v6030_v21  ;;  %v542_v21 = vld [vmem:[#allocation5 + $0xe30] sm:$0xff]  ;;  %v551_v18 = vld [vmem:[#allocation5 + $0xe78] sm:$0xff] }
 0x127   :  { %6001 = vmatpush3.bf16.msra.mxu0 %v6000_v26  ;;  %v561_v26 = vld [vmem:[#allocation5 + $0xec8] sm:$0xff] }
 0x128   :  { %6003 = vmatprep.subr.bf16.mxu0 %v6002_v29  ;;  %v6052_v29 = vpack.c.bf16 %v543_v15, %v542_v21  ;;  %v6054_v32 = vpack.c.bf16 %v561_v26, %v560_v25  ;;  %v583_v21 = vld [vmem:[#allocation5 + $0xf78] sm:$0xff]  ;;  %v616_v15 = vld [vmem:[#allocation5 + $0x1080] sm:$0xff] }
 0x129   :  { %6033 = vmatpush3.bf16.msra.mxu1 %v6032_v28  ;;  %v593_v28 = vld [vmem:[#allocation5 + $0xfc8] sm:$0xff] }
 0x12a   :  { %6035 = vmatprep.subr.bf16.mxu1 %v6034_v36  ;;  %v545_v36 = vld [vmem:[#allocation5 + $0xe48] sm:$0xff]  ;;  %v6086_v31 = vpack.c.bf16 %v593_v28, %v592_v27  ;;  %v6068_v27 = vpack.c.bf16 %v551_v18, %v550_v11 }
 0x12b   :  { %6005 = vmatpush3.bf16.msra.mxu0 %v6004_v35  ;;  %v595_v35 = vld [vmem:[#allocation5 + $0xfd8] sm:$0xff]  ;;  %v657_v11 = vld [vmem:[#allocation5 + $0x11c8] sm:$0xff] }
 0x12c   :  { %6039 = vmatprep.subr.bf16.mxu0 %v6038_v43  ;;  %v6088_v43 = vpack.c.bf16 %v577_v38, %v576_v37  ;;  %v6090_v48 = vpack.c.bf16 %v595_v35, %v594_v40  ;;  %v633_v37 = vld [vmem:[#allocation5 + $0x1108] sm:$0xff]  ;;  %v619_v38 = vld [vmem:[#allocation5 + $0x1098] sm:$0xff] }
 0x12d   :  { %6037 = vmatpush3.bf16.msra.mxu1 %v6036_v41  ;;  %v6056_v41 = vpack.c.bf16 %v545_v36, %v544_v34  ;;  %v632_v34 = vld [vmem:[#allocation5 + $0x1100] sm:$0xff]  ;;  %v651_v40 = vld [vmem:[#allocation5 + $0x1198] sm:$0xff] }
 0x12e   :  { %6071 = vmatprep.subr.bf16.mxu1 %v6070_v47  ;;  %2548 = vmatmul.mubr.f32.vlgmr.msra.gmra.mrb[12].mxu0 %v7065_v8  ;;  %v558_v8 = vld [vmem:[#allocation5 + $0xeb0] sm:$0xff] }
 0x12f   :  { %6041 = vmatpush3.bf16.msra.mxu0 %v6040_v57  ;;  %2687 = vmatprep.mubr.f32.mxu0 %v1399_v45  ;;  %v6050_v20 = vpack.c.bf16 %v559_v17, %v558_v8  ;;  %v578_v47 = vld [vmem:[#allocation5 + $0xf50] sm:$0xff]  ;;  %v597_v57 = vld [vmem:[#allocation5 + $0xfe8] sm:$0xff] }
 0x130   :  { %2618 = vmatmul.mubr.f32.vlgmr.msra.gmra.mrb[12].mxu1 %v7068_v12  ;;  %6043 = vmatprep.subr.bf16.mxu0 %v6042_v59  ;;  %v6080_v12 = vpack.c.bf16 %v573_v16, %v572_v10  ;;  %v6092_v59 = vpack.c.bf16 %v579_v49, %v578_v47  ;;  %v6094_v58 = vpack.c.bf16 %v597_v57, %v596_v54  ;;  %v566_v45 = vld [vmem:[#allocation5 + $0xef0] sm:$0xff]  ;;  %v635_v49 = vld [vmem:[#allocation5 + $0x1118] sm:$0xff]  ;;  %v652_v57 = vld [vmem:[#allocation5 + $0x11a0] sm:$0xff] }
 0x131   :  { %6073 = vmatpush3.bf16.msra.mxu1 %v6072_v33  ;;  %2757 = vmatprep.mubr.f32.mxu1 %v1400_v3  ;;  %v6060_v33 = vpack.c.bf16 %v547_v46, %v546_v44  ;;  %v6064_v10 = vpack.c.bf16 %v549_v61, %v548_v60  ;;  %v6066_v17 = vpack.c.bf16 %v567_v1, %v566_v45  ;;  %v602_v44 = vld [vmem:[#allocation5 + $0x1010] sm:$0xff]  ;;  %v603_v46 = vld [vmem:[#allocation5 + $0x1018] sm:$0xff]  ;;  %v637_v45 = vld [vmem:[#allocation5 + $0x1128] sm:$0xff] }
 0x132   :  { %6075 = vmatprep.subr.bf16.mxu1 %v6074_v62  ;;  %v580_v62 = vld [vmem:[#allocation5 + $0xf60] sm:$0xff]  ;;  %v634_v47 = vld [vmem:[#allocation5 + $0x1110] sm:$0xff]  ;;  %v6110_v61 = vpack.c.bf16 %v621_v53, %v620_v50  ;;  %v623_v1 = vld [vmem:[#allocation5 + $0x10b8] sm:$0xff] }
 0x133   :  { %6045 = vmatpush3.bf16.msra.mxu0 %v6044_v4  ;;  %v6096_v8 = vpack.c.bf16 %v581_v0, %v580_v62  ;;  %v6140_v60 = vpack.c.bf16 %v635_v49, %v634_v47  ;;  %v604_v62 = vld [vmem:[#allocation5 + $0x1020] sm:$0xff] }
 0x134   :  { %6047 = vmatprep.subr.bf16.mxu0 %v6046_v6  ;;  %v599_v6 = vld [vmem:[#allocation5 + $0xff8] sm:$0xff]  ;;  %v612_v47 = vld [vmem:[#allocation5 + $0x1060] sm:$0xff] }
 0x135   :  { %6077 = vmatpush3.bf16.msra.mxu1 %v6076_v5  ;;  %v598_v5 = vld [vmem:[#allocation5 + $0xff0] sm:$0xff]  ;;  %v644_v49 = vld [vmem:[#allocation5 + $0x1160] sm:$0xff] }
 0x136   :  { %6079 = vmatprep.subr.bf16.mxu1 %v6078_v14  ;;  %v78_v14 = vld [vmem:[#allocation2 + $0x40] sm:$0xff] }
 0x137   :  { %6049 = vmatpush3.bf16.msra.mxu0 %v6048_v19  ;;  %v582_v19 = vld [vmem:[#allocation5 + $0xf70] sm:$0xff]  ;;  %v1401_v25 = vcombine.high %v78_v14, %v78_v14  ;;  %v7091_v42 = vrot.slane %v78_v14, %v7002_v13  ;;  %v639_v14 = vld [vmem:[#allocation5 + $0x1138] sm:$0xff] }
 0x138   :  { %6051 = vmatprep.subr.bf16.mxu0 %v6050_v20  ;;  %v6098_v20 = vpack.c.bf16 %v599_v6, %v598_v5  ;;  %v6100_v28 = vpack.c.bf16 %v583_v21, %v582_v19  ;;  %v606_v6 = vld [vmem:[#allocation5 + $0x1030] sm:$0xff]  ;;  %v609_v21 = vld [vmem:[#allocation5 + $0x1048] sm:$0xff] }
 0x139   :  { %6081 = vmatpush3.bf16.msra.mxu1 %v6080_v12  ;;  %v7094_v35 = vrot.slane %v1401_v25, %v7002_v13  ;;  %v1416_v54 = vcombine.high %v7091_v42, %v7091_v42  ;;  %v627_v25 = vld [vmem:[#allocation5 + $0x10d8] sm:$0xff] }
 0x13a   :  { %6083 = vmatprep.subr.bf16.mxu1 %v6082_v23  ;;  %v648_v23 = vld [vmem:[#allocation5 + $0x1180] sm:$0xff] }
 0x13b   :  { %6053 = vmatpush3.bf16.msra.mxu0 %v6052_v29  ;;  %v6102_v29 = vpack.c.bf16 %v617_v22, %v616_v15  ;;  %v6134_v36 = vpack.c.bf16 %v649_v24, %v648_v23  ;;  %v640_v15 = vld [vmem:[#allocation5 + $0x1140] sm:$0xff]  ;;  %v641_v23 = vld [vmem:[#allocation5 + $0x1148] sm:$0xff]  ;;  %v626_v24 = vld [vmem:[#allocation5 + $0x10d0] sm:$0xff] }
 0x13c   :  { %6055 = vmatprep.subr.bf16.mxu0 %v6054_v32  ;;  %v601_v32 = vld [vmem:[#allocation5 + $0x1008] sm:$0xff] }
 0x13d   :  { %6085 = vmatpush3.bf16.msra.mxu1 %v6084_v30  ;;  %v600_v30 = vld [vmem:[#allocation5 + $0x1000] sm:$0xff] }
 0x13e   :  { %6087 = vmatprep.subr.bf16.mxu1 %v6086_v31  ;;  %v618_v31 = vld [vmem:[#allocation5 + $0x1090] sm:$0xff] }
 0x13f   :  { %6057 = vmatpush3.bf16.msra.mxu0 %v6056_v41  ;;  %v6104_v41 = vpack.c.bf16 %v601_v32, %v600_v30  ;;  %v6152_v30 = vpack.c.bf16 %v641_v23, %v640_v15  ;;  %v6122_v32 = vpack.c.bf16 %v627_v25, %v626_v24  ;;  %v682_v15 = vld [vmem:[#allocation5 + $0x1290] sm:$0xff]  ;;  %v715_v25 = vld [vmem:[#allocation5 + $0x1398] sm:$0xff] }
 0x140   :  { %6059 = vmatprep.subr.bf16.mxu0 %v6058_v52  ;;  %v6106_v52 = vpack.c.bf16 %v619_v38, %v618_v31  ;;  %v643_v38 = vld [vmem:[#allocation5 + $0x1158] sm:$0xff]  ;;  %v714_v24 = vld [vmem:[#allocation5 + $0x1390] sm:$0xff] }
 0x141   :  { %6089 = vmatpush3.bf16.msra.mxu1 %v6088_v43  ;;  %v4310_v63 = vpop.f32.mrb[0].mxu0  ;;  %v6136_v43 = vpack.c.bf16 %v633_v37, %v632_v34  ;;  %v610_v34 = vld [vmem:[#allocation5 + $0x1050] sm:$0xff] }
 0x142   :  { %6091 = vmatprep.subr.bf16.mxu1 %v6090_v48  ;;  %v4311_v3 = vpop.f32.mrb[1].mxu0  ;;  %v6138_v48 = vpack.c.bf16 %v651_v40, %v650_v39  ;;  %v642_v37 = vld [vmem:[#allocation5 + $0x1150] sm:$0xff]  ;;  %v628_v39 = vld [vmem:[#allocation5 + $0x10e0] sm:$0xff]  ;;  %v629_v40 = vld [vmem:[#allocation5 + $0x10e8] sm:$0xff] }
 0x143   :  { %v4345_v4 = vpop.f32.mrb[0].mxu1  ;;  %v4312_v7 = vadd.f32 %v4311_v3, %v4310_v63  ;;  %6061 = vmatpush3.bf16.msra.mxu0 %v6060_v33  ;;  %v653_v33 = vld [vmem:[#allocation5 + $0x11a8] sm:$0xff]  ;;  %v655_v3 = vld [vmem:[#allocation5 + $0x11b8] sm:$0xff] }
 0x144   :  { %v4346_v9 = vpop.f32.mrb[1].mxu1  ;;  %6063 = vmatprep.subr.bf16.mxu0 %v6062_v55  ;;  %v6108_v55 = vpack.c.bf16 %v603_v46, %v602_v44  ;;  %v605_v63 = vld [vmem:[#allocation5 + $0x1028] sm:$0xff]  ;;  %v6142_v0 = vpack.c.bf16 %v653_v33, %v652_v57  ;;  %v6156_v44 = vpack.c.bf16 %v643_v38, %v642_v37  ;;  %v6126_v46 = vpack.c.bf16 %v629_v40, %v628_v39  ;;  %v630_v57 = vld [vmem:[#allocation5 + $0x10f0] sm:$0xff]  ;;  %v631_v33 = vld [vmem:[#allocation5 + $0x10f8] sm:$0xff] }
 0x145   :  { %v4347_v16 = vadd.f32 %v4346_v9, %v4345_v4  ;;  %6093 = vmatpush3.bf16.msra.mxu1 %v6092_v59  ;;  %v1710_v12 = vadd.f32 %v4312_v7, %v4276_v2  ;;  %v1417_v59 = vcombine.high %v7094_v35, %v7094_v35  ;;  %v654_v2 = vld [vmem:[#allocation5 + $0x11b0] sm:$0xff]  ;;  %v6112_v4 = vpack.c.bf16 %v605_v63, %v604_v62  ;;  %v607_v7 = vld [vmem:[#allocation5 + $0x1038] sm:$0xff]  ;;  %v684_v38 = vld [vmem:[#allocation5 + $0x12a0] sm:$0xff] }
 0x146   :  { %6095 = vmatprep.subr.bf16.mxu1 %v6094_v58  ;;  %v636_v58 = vld [vmem:[#allocation5 + $0x1120] sm:$0xff]  ;;  %v638_v9 = vld [vmem:[#allocation5 + $0x1130] sm:$0xff]  ;;  %v6116_v18 = vpack.c.bf16 %v607_v7, %v606_v6  ;;  %v647_v6 = vld [vmem:[#allocation5 + $0x1178] sm:$0xff]  ;;  %v6202_v37 = vpack.c.bf16 %v715_v25, %v714_v24 }
 0x147   :  { %v7088_v26 = vadd.f32 %v4347_v16, %v1710_v12  ;;  %6065 = vmatpush3.bf16.msra.mxu0 %v6064_v10  ;;  %v6146_v10 = vpack.c.bf16 %v655_v3, %v654_v2  ;;  %v624_v16 = vld [vmem:[#allocation5 + $0x10c0] sm:$0xff]  ;;  %v6148_v19 = vpack.c.bf16 %v639_v14, %v638_v9  ;;  %v614_v2 = vld [vmem:[#allocation5 + $0x1070] sm:$0xff]  ;;  %v615_v3 = vld [vmem:[#allocation5 + $0x1078] sm:$0xff] }
 0x148   :  { %6067 = vmatprep.subr.bf16.mxu0 %v6066_v17  ;;  %v656_v17 = vld [vmem:[#allocation5 + $0x11c0] sm:$0xff]  ;;  %v681_v9 = vld [vmem:[#allocation5 + $0x1288] sm:$0xff] }
 0x149   :  { %6097 = vmatpush3.bf16.msra.mxu1 %v6096_v8  ;;  %v625_v8 = vld [vmem:[#allocation5 + $0x10c8] sm:$0xff]  ;;  %v6150_v22 = vpack.c.bf16 %v657_v11, %v656_v17  ;;  %v680_v7 = vld [vmem:[#allocation5 + $0x1280] sm:$0xff]  ;;  %v6132_v17 = vpack.c.bf16 %v615_v3, %v614_v2 }
 0x14a   :  { %6099 = vmatprep.subr.bf16.mxu1 %v6098_v20  ;;  %v6118_v12 = vpack.c.bf16 %v625_v8, %v624_v16  ;;  %v608_v20 = vld [vmem:[#allocation5 + $0x1040] sm:$0xff]  ;;  %v713_v14 = vld [vmem:[#allocation5 + $0x1388] sm:$0xff] }
 0x14b   :  { %6069 = vmatpush3.bf16.msra.mxu0 %v6068_v27  ;;  %v658_v27 = vld [vmem:[#allocation5 + $0x11d0] sm:$0xff]  ;;  %v685_v39 = vld [vmem:[#allocation5 + $0x12a8] sm:$0xff]  ;;  %v692_v24 = vld [vmem:[#allocation5 + $0x12e0] sm:$0xff] }
 0x14c   :  { %6103 = vmatprep.subr.bf16.mxu0 %v6102_v29  ;;  %v6120_v29 = vpack.c.bf16 %v609_v21, %v608_v20  ;;  %v696_v20 = vld [vmem:[#allocation5 + $0x1300] sm:$0xff]  ;;  %v697_v21 = vld [vmem:[#allocation5 + $0x1308] sm:$0xff] }
 0x14d   :  { %6101 = vmatpush3.bf16.msra.mxu1 %v6100_v28  ;;  %v659_v28 = vld [vmem:[#allocation5 + $0x11d8] sm:$0xff]  ;;  %v721_v2 = vld [vmem:[#allocation5 + $0x13c8] sm:$0xff] }
 0x14e   :  { %6135 = vmatprep.subr.bf16.mxu1 %v6134_v36  ;;  %2688 = vmatmul.mubr.f32.vlgmr.msra.gmra.mrb[14].mxu0 %v7077_v51  ;;  %v622_v51 = vld [vmem:[#allocation5 + $0x10b0] sm:$0xff]  ;;  %v611_v36 = vld [vmem:[#allocation5 + $0x1058] sm:$0xff]  ;;  %v6154_v31 = vpack.c.bf16 %v659_v28, %v658_v27  ;;  %v693_v25 = vld [vmem:[#allocation5 + $0x12e8] sm:$0xff] }
 0x14f   :  { %6105 = vmatpush3.bf16.msra.mxu0 %v6104_v41  ;;  %2827 = vmatprep.mubr.f32.mxu0 %v1416_v54  ;;  %v6114_v5 = vpack.c.bf16 %v623_v1, %v622_v51  ;;  %v660_v41 = vld [vmem:[#allocation5 + $0x11e0] sm:$0xff]  ;;  %v645_v54 = vld [vmem:[#allocation5 + $0x1168] sm:$0xff]  ;;  %v6130_v1 = vpack.c.bf16 %v631_v33, %v630_v57  ;;  %v687_v57 = vld [vmem:[#allocation5 + $0x12b8] sm:$0xff] }
 0x150   :  { %2758 = vmatmul.mubr.f32.vlgmr.msra.gmra.mrb[14].mxu1 %v7080_v56  ;;  %6107 = vmatprep.subr.bf16.mxu0 %v6106_v52  ;;  %v6144_v56 = vpack.c.bf16 %v637_v45, %v636_v58  ;;  %v6124_v52 = vpack.c.bf16 %v611_v36, %v610_v34  ;;  %v6160_v51 = vpack.c.bf16 %v645_v54, %v644_v49  ;;  %v667_v34 = vld [vmem:[#allocation5 + $0x1218] sm:$0xff]  ;;  %v698_v36 = vld [vmem:[#allocation5 + $0x1310] sm:$0xff]  ;;  %v669_v49 = vld [vmem:[#allocation5 + $0x1228] sm:$0xff] }
 0x151   :  { %6137 = vmatpush3.bf16.msra.mxu1 %v6136_v43  ;;  %2897 = vmatprep.mubr.f32.mxu1 %v1417_v59  ;;  %v661_v43 = vld [vmem:[#allocation5 + $0x11e8] sm:$0xff]  ;;  %v718_v33 = vld [vmem:[#allocation5 + $0x13b0] sm:$0xff] }
 0x152   :  { %6139 = vmatprep.subr.bf16.mxu1 %v6138_v48  ;;  %v613_v48 = vld [vmem:[#allocation5 + $0x1068] sm:$0xff]  ;;  %v6158_v53 = vpack.c.bf16 %v661_v43, %v660_v41  ;;  %v716_v41 = vld [vmem:[#allocation5 + $0x13a0] sm:$0xff] }
 0x153   :  { %6109 = vmatpush3.bf16.msra.mxu0 %v6108_v55  ;;  %v6128_v58 = vpack.c.bf16 %v613_v48, %v612_v47  ;;  %v717_v43 = vld [vmem:[#allocation5 + $0x13a8] sm:$0xff]  ;;  %v6174_v47 = vpack.c.bf16 %v685_v39, %v684_v38  ;;  %v668_v48 = vld [vmem:[#allocation5 + $0x1220] sm:$0xff] }
 0x154   :  { %6111 = vmatprep.subr.bf16.mxu0 %v6110_v61  ;;  %v663_v61 = vld [vmem:[#allocation5 + $0x11f8] sm:$0xff]  ;;  %v701_v54 = vld [vmem:[#allocation5 + $0x1328] sm:$0xff] }
 0x155   :  { %6141 = vmatpush3.bf16.msra.mxu1 %v6140_v60  ;;  %v662_v60 = vld [vmem:[#allocation5 + $0x11f0] sm:$0xff] }
 0x156   :  { %6143 = vmatprep.subr.bf16.mxu1 %v6142_v0  ;;  %v79_v0 = vld [vmem:[#allocation2 + $0x48] sm:$0xff] }
 0x157   :  { %6113 = vmatpush3.bf16.msra.mxu0 %v6112_v4  ;;  %v646_v4 = vld [vmem:[#allocation5 + $0x1170] sm:$0xff]  ;;  %v1418_v16 = vcombine.high %v79_v0, %v79_v0  ;;  %v7106_v23 = vrot.slane %v79_v0, %v7002_v13  ;;  %v703_v0 = vld [vmem:[#allocation5 + $0x1338] sm:$0xff] }
 0x158   :  { %6115 = vmatprep.subr.bf16.mxu0 %v6114_v5  ;;  %v6162_v5 = vpack.c.bf16 %v663_v61, %v662_v60  ;;  %v6164_v11 = vpack.c.bf16 %v647_v6, %v646_v4  ;;  %v670_v61 = vld [vmem:[#allocation5 + $0x1230] sm:$0xff]  ;;  %v673_v6 = vld [vmem:[#allocation5 + $0x1248] sm:$0xff] }
 0x159   :  { %6145 = vmatpush3.bf16.msra.mxu1 %v6144_v56  ;;  %v7109_v27 = vrot.slane %v1418_v16, %v7002_v13  ;;  %v1433_v40 = vcombine.high %v7106_v23, %v7106_v23  ;;  %v691_v16 = vld [vmem:[#allocation5 + $0x12d8] sm:$0xff] }
 0x15a   :  { %6147 = vmatprep.subr.bf16.mxu1 %v6146_v10  ;;  %v712_v10 = vld [vmem:[#allocation5 + $0x1380] sm:$0xff] }
 0x15b   :  { %6117 = vmatpush3.bf16.msra.mxu0 %v6116_v18  ;;  %v6166_v18 = vpack.c.bf16 %v681_v9, %v680_v7  ;;  %v704_v7 = vld [vmem:[#allocation5 + $0x1340] sm:$0xff] }
 0x15c   :  { %6119 = vmatprep.subr.bf16.mxu0 %v6118_v12  ;;  %v665_v12 = vld [vmem:[#allocation5 + $0x1208] sm:$0xff] }
 0x15d   :  { %6149 = vmatpush3.bf16.msra.mxu1 %v6148_v19  ;;  %v664_v19 = vld [vmem:[#allocation5 + $0x1200] sm:$0xff] }
 0x15e   :  { %6151 = vmatprep.subr.bf16.mxu1 %v6150_v22  ;;  %v683_v22 = vld [vmem:[#allocation5 + $0x1298] sm:$0xff]  ;;  %v6168_v28 = vpack.c.bf16 %v665_v12, %v664_v19 }
 0x15f   :  { %6121 = vmatpush3.bf16.msra.mxu0 %v6120_v29  ;;  %v6200_v29 = vpack.c.bf16 %v697_v21, %v696_v20  ;;  %v674_v20 = vld [vmem:[#allocation5 + $0x1250] sm:$0xff] }
 0x160   :  { %6123 = vmatprep.subr.bf16.mxu0 %v6122_v32  ;;  %v666_v32 = vld [vmem:[#allocation5 + $0x1210] sm:$0xff] }
 0x161   :  { %6153 = vmatpush3.bf16.msra.mxu1 %v6152_v30  ;;  %v4380_v50 = vpop.f32.mrb[2].mxu0  ;;  %v6170_v30 = vpack.c.bf16 %v683_v22, %v682_v15  ;;  %v706_v21 = vld [vmem:[#allocation5 + $0x1350] sm:$0xff]  ;;  %v707_v22 = vld [vmem:[#allocation5 + $0x1358] sm:$0xff] }
 0x162   :  { %6155 = vmatprep.subr.bf16.mxu1 %v6154_v31  ;;  %v4381_v59 = vpop.f32.mrb[3].mxu0  ;;  %v699_v31 = vld [vmem:[#allocation5 + $0x1318] sm:$0xff] }
 0x163   :  { %v4415_v55 = vpop.f32.mrb[2].mxu1  ;;  %v4382_v62 = vadd.f32 %v4381_v59, %v4380_v50  ;;  %6125 = vmatpush3.bf16.msra.mxu0 %v6124_v52  ;;  %v1434_v52 = vcombine.high %v7109_v27, %v7109_v27  ;;  %v700_v50 = vld [vmem:[#allocation5 + $0x1320] sm:$0xff]  ;;  %v719_v59 = vld [vmem:[#allocation5 + $0x13b8] sm:$0xff] }
 0x164   :  { %v4416_v63 = vpop.f32.mrb[3].mxu1  ;;  %6127 = vmatprep.subr.bf16.mxu0 %v6126_v46  ;;  %v6204_v46 = vpack.c.bf16 %v699_v31, %v698_v36  ;;  %v676_v36 = vld [vmem:[#allocation5 + $0x1260] sm:$0xff] }
 0x165   :  { %v4417_v45 = vadd.f32 %v4416_v63, %v4415_v55  ;;  %6157 = vmatpush3.bf16.msra.mxu1 %v6156_v44  ;;  %v1850_v56 = vadd.f32 %v4382_v62, %v7088_v26  ;;  %v6198_v26 = vpack.c.bf16 %v713_v14, %v712_v10  ;;  %v6172_v44 = vpack.c.bf16 %v667_v34, %v666_v32  ;;  %v671_v62 = vld [vmem:[#allocation5 + $0x1238] sm:$0xff]  ;;  %v702_v63 = vld [vmem:[#allocation5 + $0x1330] sm:$0xff]  ;;  %v705_v10 = vld [vmem:[#allocation5 + $0x1348] sm:$0xff] }
 0x166   :  { %6159 = vmatprep.subr.bf16.mxu1 %v6158_v53  ;;  %v6206_v53 = vpack.c.bf16 %v717_v43, %v716_v41  ;;  %v6176_v55 = vpack.c.bf16 %v669_v49, %v668_v48  ;;  %v6180_v3 = vpack.c.bf16 %v671_v62, %v670_v61  ;;  %v6212_v4 = vpack.c.bf16 %v703_v0, %v702_v63  ;;  %v690_v14 = vld [vmem:[#allocation5 + $0x12d0] sm:$0xff]  ;;  %v708_v31 = vld [vmem:[#allocation5 + $0x1360] sm:$0xff]  ;;  %v695_v43 = vld [vmem:[#allocation5 + $0x12f8] sm:$0xff] }
 0x167   :  { %v7103_v8 = vadd.f32 %v4417_v45, %v1850_v56  ;;  %6129 = vmatpush3.bf16.msra.mxu0 %v6128_v58  ;;  %v6210_v58 = vpack.c.bf16 %v719_v59, %v718_v33  ;;  %v688_v45 = vld [vmem:[#allocation5 + $0x12c0] sm:$0xff]  ;;  %v6216_v19 = vpack.c.bf16 %v705_v10, %v704_v7  ;;  %v6186_v12 = vpack.c.bf16 %v691_v16, %v690_v14  ;;  %v694_v41 = vld [vmem:[#allocation5 + $0x12f0] sm:$0xff]  ;;  %v679_v59 = vld [vmem:[#allocation5 + $0x1278] sm:$0xff] }
 0x168   :  { %6131 = vmatprep.subr.bf16.mxu0 %v6130_v1  ;;  %v720_v1 = vld [vmem:[#allocation5 + $0x13c0] sm:$0xff]  ;;  %v6220_v32 = vpack.c.bf16 %v707_v22, %v706_v21  ;;  %v6190_v34 = vpack.c.bf16 %v693_v25, %v692_v24  ;;  %v678_v33 = vld [vmem:[#allocation5 + $0x1270] sm:$0xff]  ;;  %v711_v61 = vld [vmem:[#allocation5 + $0x1378] sm:$0xff] }
 0x169   :  { %6161 = vmatpush3.bf16.msra.mxu1 %v6160_v51  ;;  %v689_v51 = vld [vmem:[#allocation5 + $0x12c8] sm:$0xff]  ;;  %v6214_v9 = vpack.c.bf16 %v721_v2, %v720_v1  ;;  %v744_v62 = vld [vmem:[#allocation5 + $0x1480] sm:$0xff]  ;;  %v6196_v1 = vpack.c.bf16 %v679_v59, %v678_v33  ;;  %v746_v7 = vld [vmem:[#allocation5 + $0x1490] sm:$0xff] }
 0x16a   :  { %6163 = vmatprep.subr.bf16.mxu1 %v6162_v5  ;;  %v6182_v56 = vpack.c.bf16 %v689_v51, %v688_v45  ;;  %v672_v5 = vld [vmem:[#allocation5 + $0x1240] sm:$0xff]  ;;  %v745_v63 = vld [vmem:[#allocation5 + $0x1488] sm:$0xff]  ;;  %v778_v14 = vld [vmem:[#allocation5 + $0x1590] sm:$0xff] }
 0x16b   :  { %6133 = vmatpush3.bf16.msra.mxu0 %v6132_v17  ;;  %v722_v17 = vld [vmem:[#allocation5 + $0x13d0] sm:$0xff]  ;;  %v777_v0 = vld [vmem:[#allocation5 + $0x1588] sm:$0xff]  ;;  %v779_v16 = vld [vmem:[#allocation5 + $0x1598] sm:$0xff] }
 0x16c   :  { %6167 = vmatprep.subr.bf16.mxu0 %v6166_v18  ;;  %v6184_v18 = vpack.c.bf16 %v673_v6, %v672_v5  ;;  %v760_v5 = vld [vmem:[#allocation5 + $0x1500] sm:$0xff]  ;;  %v761_v6 = vld [vmem:[#allocation5 + $0x1508] sm:$0xff]  ;;  %v6266_v21 = vpack.c.bf16 %v779_v16, %v778_v14 }
 0x16d   :  { %6165 = vmatpush3.bf16.msra.mxu1 %v6164_v11  ;;  %v723_v11 = vld [vmem:[#allocation5 + $0x13d8] sm:$0xff]  ;;  %v748_v22 = vld [vmem:[#allocation5 + $0x14a0] sm:$0xff]  ;;  %v749_v24 = vld [vmem:[#allocation5 + $0x14a8] sm:$0xff] }
 0x16e   :  { %6199 = vmatprep.subr.bf16.mxu1 %v6198_v26  ;;  %2828 = vmatmul.mubr.f32.vlgmr.msra.gmra.mrb[16].mxu0 %v7091_v42  ;;  %v686_v42 = vld [vmem:[#allocation5 + $0x12b0] sm:$0xff]  ;;  %v675_v26 = vld [vmem:[#allocation5 + $0x1258] sm:$0xff]  ;;  %v6218_v15 = vpack.c.bf16 %v723_v11, %v722_v17  ;;  %v785_v33 = vld [vmem:[#allocation5 + $0x15c8] sm:$0xff] }
 0x16f   :  { %6169 = vmatpush3.bf16.msra.mxu0 %v6168_v28  ;;  %2967 = vmatprep.mubr.f32.mxu0 %v1433_v40  ;;  %v6178_v60 = vpack.c.bf16 %v687_v57, %v686_v42  ;;  %v724_v28 = vld [vmem:[#allocation5 + $0x13e0] sm:$0xff]  ;;  %v709_v40 = vld [vmem:[#allocation5 + $0x1368] sm:$0xff]  ;;  %v6194_v57 = vpack.c.bf16 %v695_v43, %v694_v41  ;;  %v751_v41 = vld [vmem:[#allocation5 + $0x14b8] sm:$0xff] }
 0x170   :  { %2898 = vmatmul.mubr.f32.vlgmr.msra.gmra.mrb[16].mxu1 %v7094_v35  ;;  %6171 = vmatprep.subr.bf16.mxu0 %v6170_v30  ;;  %v6208_v35 = vpack.c.bf16 %v701_v54, %v700_v50  ;;  %v6188_v30 = vpack.c.bf16 %v675_v26, %v674_v20  ;;  %v6224_v42 = vpack.c.bf16 %v709_v40, %v708_v31  ;;  %v731_v20 = vld [vmem:[#allocation5 + $0x1418] sm:$0xff]  ;;  %v762_v26 = vld [vmem:[#allocation5 + $0x1510] sm:$0xff]  ;;  %v733_v31 = vld [vmem:[#allocation5 + $0x1428] sm:$0xff] }
 0x171   :  { %6201 = vmatpush3.bf16.msra.mxu1 %v6200_v29  ;;  %3037 = vmatprep.mubr.f32.mxu1 %v1434_v52  ;;  %v725_v29 = vld [vmem:[#allocation5 + $0x13e8] sm:$0xff]  ;;  %v782_v43 = vld [vmem:[#allocation5 + $0x15b0] sm:$0xff]  ;;  %v756_v14 = vld [vmem:[#allocation5 + $0x14e0] sm:$0xff] }
 0x172   :  { %6203 = vmatprep.subr.bf16.mxu1 %v6202_v37  ;;  %v677_v37 = vld [vmem:[#allocation5 + $0x1268] sm:$0xff]  ;;  %v6222_v39 = vpack.c.bf16 %v725_v29, %v724_v28  ;;  %v780_v28 = vld [vmem:[#allocation5 + $0x15a0] sm:$0xff] }
 0x173   :  { %6173 = vmatpush3.bf16.msra.mxu0 %v6172_v44  ;;  %v6192_v50 = vpack.c.bf16 %v677_v37, %v676_v36  ;;  %v781_v29 = vld [vmem:[#allocation5 + $0x15a8] sm:$0xff]  ;;  %v6238_v36 = vpack.c.bf16 %v749_v24, %v748_v22  ;;  %v732_v37 = vld [vmem:[#allocation5 + $0x1420] sm:$0xff] }
 0x174   :  { %6175 = vmatprep.subr.bf16.mxu0 %v6174_v47  ;;  %v727_v47 = vld [vmem:[#allocation5 + $0x13f8] sm:$0xff]  ;;  %v765_v40 = vld [vmem:[#allocation5 + $0x1528] sm:$0xff] }
 0x175   :  { %6205 = vmatpush3.bf16.msra.mxu1 %v6204_v46  ;;  %v726_v46 = vld [vmem:[#allocation5 + $0x13f0] sm:$0xff]  ;;  %v757_v16 = vld [vmem:[#allocation5 + $0x14e8] sm:$0xff] }
 0x176   :  { %6207 = vmatprep.subr.bf16.mxu1 %v6206_v53  ;;  %v80_v53 = vld [vmem:[#allocation2 + $0x50] sm:$0xff] }
 0x177   :  { %6177 = vmatpush3.bf16.msra.mxu0 %v6176_v55  ;;  %v710_v55 = vld [vmem:[#allocation5 + $0x1370] sm:$0xff]  ;;  %v1435_v45 = vcombine.high %v80_v53, %v80_v53  ;;  %v7121_v10 = vrot.slane %v80_v53, %v7002_v13  ;;  %v767_v53 = vld [vmem:[#allocation5 + $0x1538] sm:$0xff] }
 0x178   :  { %6179 = vmatprep.subr.bf16.mxu0 %v6178_v60  ;;  %v6226_v60 = vpack.c.bf16 %v727_v47, %v726_v46  ;;  %v6228_v2 = vpack.c.bf16 %v711_v61, %v710_v55  ;;  %v734_v47 = vld [vmem:[#allocation5 + $0x1430] sm:$0xff]  ;;  %v737_v61 = vld [vmem:[#allocation5 + $0x1448] sm:$0xff] }
 0x179   :  { %6209 = vmatpush3.bf16.msra.mxu1 %v6208_v35  ;;  %v7124_v17 = vrot.slane %v1435_v45, %v7002_v13  ;;  %v1450_v25 = vcombine.high %v7121_v10, %v7121_v10  ;;  %v755_v45 = vld [vmem:[#allocation5 + $0x14d8] sm:$0xff] }
 0x17a   :  { %6211 = vmatprep.subr.bf16.mxu1 %v6210_v58  ;;  %v776_v58 = vld [vmem:[#allocation5 + $0x1580] sm:$0xff] }
 0x17b   :  { %6181 = vmatpush3.bf16.msra.mxu0 %v6180_v3  ;;  %v6230_v3 = vpack.c.bf16 %v745_v63, %v744_v62  ;;  %v768_v62 = vld [vmem:[#allocation5 + $0x1540] sm:$0xff] }
 0x17c   :  { %6183 = vmatprep.subr.bf16.mxu0 %v6182_v56  ;;  %v729_v56 = vld [vmem:[#allocation5 + $0x1408] sm:$0xff] }
 0x17d   :  { %6213 = vmatpush3.bf16.msra.mxu1 %v6212_v4  ;;  %v728_v4 = vld [vmem:[#allocation5 + $0x1400] sm:$0xff] }
 0x17e   :  { %6215 = vmatprep.subr.bf16.mxu1 %v6214_v9  ;;  %v747_v9 = vld [vmem:[#allocation5 + $0x1498] sm:$0xff]  ;;  %v6232_v11 = vpack.c.bf16 %v729_v56, %v728_v4 }
 0x17f   :  { %6185 = vmatpush3.bf16.msra.mxu0 %v6184_v18  ;;  %v6264_v18 = vpack.c.bf16 %v761_v6, %v760_v5  ;;  %v738_v5 = vld [vmem:[#allocation5 + $0x1450] sm:$0xff] }
 0x180   :  { %6187 = vmatprep.subr.bf16.mxu0 %v6186_v12  ;;  %v730_v12 = vld [vmem:[#allocation5 + $0x1410] sm:$0xff] }
 0x181   :  { %6217 = vmatpush3.bf16.msra.mxu1 %v6216_v19  ;;  %v4450_v38 = vpop.f32.mrb[4].mxu0  ;;  %v6234_v19 = vpack.c.bf16 %v747_v9, %v746_v7  ;;  %v770_v6 = vld [vmem:[#allocation5 + $0x1550] sm:$0xff]  ;;  %v771_v9 = vld [vmem:[#allocation5 + $0x1558] sm:$0xff] }
 0x182   :  { %6219 = vmatprep.subr.bf16.mxu1 %v6218_v15  ;;  %v4451_v52 = vpop.f32.mrb[5].mxu0  ;;  %v763_v15 = vld [vmem:[#allocation5 + $0x1518] sm:$0xff] }
 0x183   :  { %v4485_v44 = vpop.f32.mrb[4].mxu1  ;;  %v4452_v48 = vadd.f32 %v4451_v52, %v4450_v38  ;;  %6189 = vmatpush3.bf16.msra.mxu0 %v6188_v30  ;;  %v1451_v30 = vcombine.high %v7124_v17, %v7124_v17  ;;  %v764_v38 = vld [vmem:[#allocation5 + $0x1520] sm:$0xff]  ;;  %v783_v52 = vld [vmem:[#allocation5 + $0x15b8] sm:$0xff] }
 0x184   :  { %v4486_v49 = vpop.f32.mrb[5].mxu1  ;;  %6191 = vmatprep.subr.bf16.mxu0 %v6190_v34  ;;  %v6268_v34 = vpack.c.bf16 %v763_v15, %v762_v26  ;;  %v740_v26 = vld [vmem:[#allocation5 + $0x1460] sm:$0xff] }
 0x185   :  { %v4487_v54 = vadd.f32 %v4486_v49, %v4485_v44  ;;  %6221 = vmatpush3.bf16.msra.mxu1 %v6220_v32  ;;  %v1990_v35 = vadd.f32 %v4452_v48, %v7103_v8  ;;  %v6262_v8 = vpack.c.bf16 %v777_v0, %v776_v58  ;;  %v6236_v32 = vpack.c.bf16 %v731_v20, %v730_v12  ;;  %v735_v48 = vld [vmem:[#allocation5 + $0x1438] sm:$0xff]  ;;  %v766_v49 = vld [vmem:[#allocation5 + $0x1530] sm:$0xff]  ;;  %v769_v58 = vld [vmem:[#allocation5 + $0x1548] sm:$0xff] }
 0x186   :  { %6223 = vmatprep.subr.bf16.mxu1 %v6222_v39  ;;  %v6270_v39 = vpack.c.bf16 %v781_v29, %v780_v28  ;;  %v6240_v44 = vpack.c.bf16 %v733_v31, %v732_v37  ;;  %v6244_v59 = vpack.c.bf16 %v735_v48, %v734_v47  ;;  %v6276_v55 = vpack.c.bf16 %v767_v53, %v766_v49  ;;  %v754_v0 = vld [vmem:[#allocation5 + $0x14d0] sm:$0xff]  ;;  %v772_v15 = vld [vmem:[#allocation5 + $0x1560] sm:$0xff]  ;;  %v759_v29 = vld [vmem:[#allocation5 + $0x14f8] sm:$0xff] }
 0x187   :  { %v7118_v51 = vadd.f32 %v4487_v54, %v1990_v35  ;;  %6193 = vmatpush3.bf16.msra.mxu0 %v6192_v50  ;;  %v6274_v50 = vpack.c.bf16 %v783_v52, %v782_v43  ;;  %v752_v54 = vld [vmem:[#allocation5 + $0x14c0] sm:$0xff]  ;;  %v6280_v4 = vpack.c.bf16 %v769_v58, %v768_v62  ;;  %v6250_v56 = vpack.c.bf16 %v755_v45, %v754_v0  ;;  %v758_v28 = vld [vmem:[#allocation5 + $0x14f0] sm:$0xff]  ;;  %v743_v52 = vld [vmem:[#allocation5 + $0x1478] sm:$0xff] }
 0x188   :  { %6195 = vmatprep.subr.bf16.mxu0 %v6194_v57  ;;  %v784_v57 = vld [vmem:[#allocation5 + $0x15c0] sm:$0xff]  ;;  %v6284_v12 = vpack.c.bf16 %v771_v9, %v770_v6  ;;  %v6254_v20 = vpack.c.bf16 %v757_v16, %v756_v14  ;;  %v742_v43 = vld [vmem:[#allocation5 + $0x1470] sm:$0xff]  ;;  %v775_v47 = vld [vmem:[#allocation5 + $0x1578] sm:$0xff] }
 0x189   :  { %6225 = vmatpush3.bf16.msra.mxu1 %v6224_v42  ;;  %v753_v42 = vld [vmem:[#allocation5 + $0x14c8] sm:$0xff]  ;;  %v6278_v63 = vpack.c.bf16 %v785_v33, %v784_v57  ;;  %v808_v48 = vld [vmem:[#allocation5 + $0x1680] sm:$0xff]  ;;  %v6260_v57 = vpack.c.bf16 %v743_v52, %v742_v43  ;;  %v810_v62 = vld [vmem:[#allocation5 + $0x1690] sm:$0xff] }
 0x18a   :  { %6227 = vmatprep.subr.bf16.mxu1 %v6226_v60  ;;  %v6246_v35 = vpack.c.bf16 %v753_v42, %v752_v54  ;;  %v736_v60 = vld [vmem:[#allocation5 + $0x1440] sm:$0xff]  ;;  %v809_v49 = vld [vmem:[#allocation5 + $0x1688] sm:$0xff]  ;;  %v842_v0 = vld [vmem:[#allocation5 + $0x1790] sm:$0xff] }
 0x18b   :  { %6197 = vmatpush3.bf16.msra.mxu0 %v6196_v1  ;;  %v786_v1 = vld [vmem:[#allocation5 + $0x15d0] sm:$0xff]  ;;  %v841_v53 = vld [vmem:[#allocation5 + $0x1788] sm:$0xff]  ;;  %v843_v45 = vld [vmem:[#allocation5 + $0x1798] sm:$0xff] }
 0x18c   :  { %6231 = vmatprep.subr.bf16.mxu0 %v6230_v3  ;;  %v6248_v3 = vpack.c.bf16 %v737_v61, %v736_v60  ;;  %v824_v60 = vld [vmem:[#allocation5 + $0x1700] sm:$0xff]  ;;  %v825_v61 = vld [vmem:[#allocation5 + $0x1708] sm:$0xff]  ;;  %v6330_v6 = vpack.c.bf16 %v843_v45, %v842_v0 }
 0x18d   :  { %6229 = vmatpush3.bf16.msra.mxu1 %v6228_v2  ;;  %v787_v2 = vld [vmem:[#allocation5 + $0x15d8] sm:$0xff]  ;;  %v812_v9 = vld [vmem:[#allocation5 + $0x16a0] sm:$0xff]  ;;  %v813_v14 = vld [vmem:[#allocation5 + $0x16a8] sm:$0xff] }
 0x18e   :  { %6263 = vmatprep.subr.bf16.mxu1 %v6262_v8  ;;  %2968 = vmatmul.mubr.f32.vlgmr.msra.gmra.mrb[18].mxu0 %v7106_v23  ;;  %v750_v23 = vld [vmem:[#allocation5 + $0x14b0] sm:$0xff]  ;;  %v739_v8 = vld [vmem:[#allocation5 + $0x1458] sm:$0xff]  ;;  %v6282_v7 = vpack.c.bf16 %v787_v2, %v786_v1  ;;  %v849_v43 = vld [vmem:[#allocation5 + $0x17c8] sm:$0xff] }
 0x18f   :  { %6233 = vmatpush3.bf16.msra.mxu0 %v6232_v11  ;;  %3107 = vmatprep.mubr.f32.mxu0 %v1450_v25  ;;  %v6242_v46 = vpack.c.bf16 %v751_v41, %v750_v23  ;;  %v788_v11 = vld [vmem:[#allocation5 + $0x15e0] sm:$0xff]  ;;  %v773_v25 = vld [vmem:[#allocation5 + $0x1568] sm:$0xff]  ;;  %v6258_v41 = vpack.c.bf16 %v759_v29, %v758_v28  ;;  %v815_v28 = vld [vmem:[#allocation5 + $0x16b8] sm:$0xff] }
 0x190   :  { %3038 = vmatmul.mubr.f32.vlgmr.msra.gmra.mrb[18].mxu1 %v7109_v27  ;;  %6235 = vmatprep.subr.bf16.mxu0 %v6234_v19  ;;  %v6272_v27 = vpack.c.bf16 %v765_v40, %v764_v38  ;;  %v6252_v19 = vpack.c.bf16 %v739_v8, %v738_v5  ;;  %v6288_v23 = vpack.c.bf16 %v773_v25, %v772_v15  ;;  %v795_v5 = vld [vmem:[#allocation5 + $0x1618] sm:$0xff]  ;;  %v826_v8 = vld [vmem:[#allocation5 + $0x1710] sm:$0xff]  ;;  %v797_v15 = vld [vmem:[#allocation5 + $0x1628] sm:$0xff] }
 0x191   :  { %6265 = vmatpush3.bf16.msra.mxu1 %v6264_v18  ;;  %3177 = vmatprep.mubr.f32.mxu1 %v1451_v30  ;;  %v789_v18 = vld [vmem:[#allocation5 + $0x15e8] sm:$0xff]  ;;  %v846_v29 = vld [vmem:[#allocation5 + $0x17b0] sm:$0xff]  ;;  %v820_v0 = vld [vmem:[#allocation5 + $0x16e0] sm:$0xff] }
 0x192   :  { %6267 = vmatprep.subr.bf16.mxu1 %v6266_v21  ;;  %v741_v21 = vld [vmem:[#allocation5 + $0x1468] sm:$0xff]  ;;  %v6286_v24 = vpack.c.bf16 %v789_v18, %v788_v11  ;;  %v844_v11 = vld [vmem:[#allocation5 + $0x17a0] sm:$0xff] }
 0x193   :  { %6237 = vmatpush3.bf16.msra.mxu0 %v6236_v32  ;;  %v6256_v38 = vpack.c.bf16 %v741_v21, %v740_v26  ;;  %v845_v18 = vld [vmem:[#allocation5 + $0x17a8] sm:$0xff]  ;;  %v6302_v26 = vpack.c.bf16 %v813_v14, %v812_v9  ;;  %v796_v21 = vld [vmem:[#allocation5 + $0x1620] sm:$0xff] }
 0x194   :  { %6239 = vmatprep.subr.bf16.mxu0 %v6238_v36  ;;  %v791_v36 = vld [vmem:[#allocation5 + $0x15f8] sm:$0xff]  ;;  %v829_v25 = vld [vmem:[#allocation5 + $0x1728] sm:$0xff] }
 0x195   :  { %6269 = vmatpush3.bf16.msra.mxu1 %v6268_v34  ;;  %v790_v34 = vld [vmem:[#allocation5 + $0x15f0] sm:$0xff]  ;;  %v821_v45 = vld [vmem:[#allocation5 + $0x16e8] sm:$0xff] }
 0x196   :  { %6271 = vmatprep.subr.bf16.mxu1 %v6270_v39  ;;  %v81_v39 = vld [vmem:[#allocation2 + $0x58] sm:$0xff] }
 0x197   :  { %6241 = vmatpush3.bf16.msra.mxu0 %v6240_v44  ;;  %v774_v44 = vld [vmem:[#allocation5 + $0x1570] sm:$0xff]  ;;  %v1452_v54 = vcombine.high %v81_v39, %v81_v39  ;;  %v7136_v58 = vrot.slane %v81_v39, %v7002_v13  ;;  %v831_v39 = vld [vmem:[#allocation5 + $0x1738] sm:$0xff] }
 0x198   :  { %6243 = vmatprep.subr.bf16.mxu0 %v6242_v46  ;;  %v6290_v46 = vpack.c.bf16 %v791_v36, %v790_v34  ;;  %v6292_v33 = vpack.c.bf16 %v775_v47, %v774_v44  ;;  %v798_v36 = vld [vmem:[#allocation5 + $0x1630] sm:$0xff]  ;;  %v801_v47 = vld [vmem:[#allocation5 + $0x1648] sm:$0xff] }
 0x199   :  { %6273 = vmatpush3.bf16.msra.mxu1 %v6272_v27  ;;  %v7139_v1 = vrot.slane %v1452_v54, %v7002_v13  ;;  %v1467_v16 = vcombine.high %v7136_v58, %v7136_v58  ;;  %v819_v54 = vld [vmem:[#allocation5 + $0x16d8] sm:$0xff] }
 0x19a   :  { %6275 = vmatprep.subr.bf16.mxu1 %v6274_v50  ;;  %v840_v50 = vld [vmem:[#allocation5 + $0x1780] sm:$0xff] }
 0x19b   :  { %6245 = vmatpush3.bf16.msra.mxu0 %v6244_v59  ;;  %v6294_v59 = vpack.c.bf16 %v809_v49, %v808_v48  ;;  %v832_v48 = vld [vmem:[#allocation5 + $0x1740] sm:$0xff] }
 0x19c   :  { %6247 = vmatprep.subr.bf16.mxu0 %v6246_v35  ;;  %v793_v35 = vld [vmem:[#allocation5 + $0x1608] sm:$0xff] }
 0x19d   :  { %6277 = vmatpush3.bf16.msra.mxu1 %v6276_v55  ;;  %v792_v55 = vld [vmem:[#allocation5 + $0x1600] sm:$0xff] }
 0x19e   :  { %6279 = vmatprep.subr.bf16.mxu1 %v6278_v63  ;;  %v811_v63 = vld [vmem:[#allocation5 + $0x1698] sm:$0xff]  ;;  %v6296_v2 = vpack.c.bf16 %v793_v35, %v792_v55 }
 0x19f   :  { %6249 = vmatpush3.bf16.msra.mxu0 %v6248_v3  ;;  %v6328_v3 = vpack.c.bf16 %v825_v61, %v824_v60  ;;  %v802_v60 = vld [vmem:[#allocation5 + $0x1650] sm:$0xff] }
 0x1a0   :  { %6251 = vmatprep.subr.bf16.mxu0 %v6250_v56  ;;  %v794_v56 = vld [vmem:[#allocation5 + $0x1610] sm:$0xff] }
 0x1a1   :  { %6281 = vmatpush3.bf16.msra.mxu1 %v6280_v4  ;;  %v4520_v22 = vpop.f32.mrb[6].mxu0  ;;  %v6298_v4 = vpack.c.bf16 %v811_v63, %v810_v62  ;;  %v834_v61 = vld [vmem:[#allocation5 + $0x1750] sm:$0xff]  ;;  %v835_v63 = vld [vmem:[#allocation5 + $0x1758] sm:$0xff] }
 0x1a2   :  { %6283 = vmatprep.subr.bf16.mxu1 %v6282_v7  ;;  %v4521_v30 = vpop.f32.mrb[7].mxu0  ;;  %v827_v7 = vld [vmem:[#allocation5 + $0x1718] sm:$0xff] }
 0x1a3   :  { %v4555_v32 = vpop.f32.mrb[6].mxu1  ;;  %v4522_v37 = vadd.f32 %v4521_v30, %v4520_v22  ;;  %6253 = vmatpush3.bf16.msra.mxu0 %v6252_v19  ;;  %v1468_v19 = vcombine.high %v7139_v1, %v7139_v1  ;;  %v828_v22 = vld [vmem:[#allocation5 + $0x1720] sm:$0xff]  ;;  %v847_v30 = vld [vmem:[#allocation5 + $0x17b8] sm:$0xff] }
 0x1a4   :  { %v4556_v31 = vpop.f32.mrb[7].mxu1  ;;  %6255 = vmatprep.subr.bf16.mxu0 %v6254_v20  ;;  %v6332_v20 = vpack.c.bf16 %v827_v7, %v826_v8  ;;  %v804_v8 = vld [vmem:[#allocation5 + $0x1660] sm:$0xff] }
 0x1a5   :  { %v4557_v40 = vadd.f32 %v4556_v31, %v4555_v32  ;;  %6285 = vmatpush3.bf16.msra.mxu1 %v6284_v12  ;;  %v2130_v27 = vadd.f32 %v4522_v37, %v7118_v51  ;;  %v6326_v51 = vpack.c.bf16 %v841_v53, %v840_v50  ;;  %v6300_v12 = vpack.c.bf16 %v795_v5, %v794_v56  ;;  %v799_v37 = vld [vmem:[#allocation5 + $0x1638] sm:$0xff]  ;;  %v830_v31 = vld [vmem:[#allocation5 + $0x1730] sm:$0xff]  ;;  %v833_v50 = vld [vmem:[#allocation5 + $0x1748] sm:$0xff] }
 0x1a6   :  { %6287 = vmatprep.subr.bf16.mxu1 %v6286_v24  ;;  %v6334_v24 = vpack.c.bf16 %v845_v18, %v844_v11  ;;  %v6304_v32 = vpack.c.bf16 %v797_v15, %v796_v21  ;;  %v6308_v52 = vpack.c.bf16 %v799_v37, %v798_v36  ;;  %v6340_v44 = vpack.c.bf16 %v831_v39, %v830_v31  ;;  %v818_v53 = vld [vmem:[#allocation5 + $0x16d0] sm:$0xff]  ;;  %v836_v7 = vld [vmem:[#allocation5 + $0x1760] sm:$0xff]  ;;  %v823_v18 = vld [vmem:[#allocation5 + $0x16f8] sm:$0xff] }
 0x1a7   :  { %v7133_v42 = vadd.f32 %v4557_v40, %v2130_v27  ;;  %6257 = vmatpush3.bf16.msra.mxu0 %v6256_v38  ;;  %v6338_v38 = vpack.c.bf16 %v847_v30, %v846_v29  ;;  %v816_v40 = vld [vmem:[#allocation5 + $0x16c0] sm:$0xff]  ;;  %v6344_v55 = vpack.c.bf16 %v833_v50, %v832_v48  ;;  %v6314_v35 = vpack.c.bf16 %v819_v54, %v818_v53  ;;  %v822_v11 = vld [vmem:[#allocation5 + $0x16f0] sm:$0xff]  ;;  %v807_v30 = vld [vmem:[#allocation5 + $0x1678] sm:$0xff] }
 0x1a8   :  { %6259 = vmatprep.subr.bf16.mxu0 %v6258_v41  ;;  %v848_v41 = vld [vmem:[#allocation5 + $0x17c0] sm:$0xff]  ;;  %v6348_v56 = vpack.c.bf16 %v835_v63, %v834_v61  ;;  %v6318_v5 = vpack.c.bf16 %v821_v45, %v820_v0  ;;  %v806_v29 = vld [vmem:[#allocation5 + $0x1670] sm:$0xff]  ;;  %v839_v36 = vld [vmem:[#allocation5 + $0x1778] sm:$0xff] }
 0x1a9   :  { %6289 = vmatpush3.bf16.msra.mxu1 %v6288_v23  ;;  %v817_v23 = vld [vmem:[#allocation5 + $0x16c8] sm:$0xff]  ;;  %v6342_v49 = vpack.c.bf16 %v849_v43, %v848_v41  ;;  %v872_v37 = vld [vmem:[#allocation5 + $0x1880] sm:$0xff]  ;;  %v6324_v41 = vpack.c.bf16 %v807_v30, %v806_v29  ;;  %v874_v48 = vld [vmem:[#allocation5 + $0x1890] sm:$0xff] }
 0x1aa   :  { %6291 = vmatprep.subr.bf16.mxu1 %v6290_v46  ;;  %v6310_v27 = vpack.c.bf16 %v817_v23, %v816_v40  ;;  %v800_v46 = vld [vmem:[#allocation5 + $0x1640] sm:$0xff]  ;;  %v873_v31 = vld [vmem:[#allocation5 + $0x1888] sm:$0xff]  ;;  %v906_v53 = vld [vmem:[#allocation5 + $0x1990] sm:$0xff] }
 0x1ab   :  { %6261 = vmatpush3.bf16.msra.mxu0 %v6260_v57  ;;  %v850_v57 = vld [vmem:[#allocation5 + $0x17d0] sm:$0xff]  ;;  %v905_v39 = vld [vmem:[#allocation5 + $0x1988] sm:$0xff]  ;;  %v907_v54 = vld [vmem:[#allocation5 + $0x1998] sm:$0xff] }
 0x1ac   :  { %6295 = vmatprep.subr.bf16.mxu0 %v6294_v59  ;;  %v6312_v59 = vpack.c.bf16 %v801_v47, %v800_v46  ;;  %v888_v46 = vld [vmem:[#allocation5 + $0x1900] sm:$0xff]  ;;  %v889_v47 = vld [vmem:[#allocation5 + $0x1908] sm:$0xff]  ;;  %v6394_v61 = vpack.c.bf16 %v907_v54, %v906_v53 }
 0x1ad   :  { %6293 = vmatpush3.bf16.msra.mxu1 %v6292_v33  ;;  %v851_v33 = vld [vmem:[#allocation5 + $0x17d8] sm:$0xff]  ;;  %v876_v63 = vld [vmem:[#allocation5 + $0x18a0] sm:$0xff]  ;;  %v877_v0 = vld [vmem:[#allocation5 + $0x18a8] sm:$0xff] }
 0x1ae   :  { %6327 = vmatprep.subr.bf16.mxu1 %v6326_v51  ;;  %3108 = vmatmul.mubr.f32.vlgmr.msra.gmra.mrb[20].mxu0 %v7121_v10  ;;  %v814_v10 = vld [vmem:[#allocation5 + $0x16b0] sm:$0xff]  ;;  %v803_v51 = vld [vmem:[#allocation5 + $0x1658] sm:$0xff]  ;;  %v6346_v62 = vpack.c.bf16 %v851_v33, %v850_v57  ;;  %v913_v29 = vld [vmem:[#allocation5 + $0x19c8] sm:$0xff] }
 0x1af   :  { %6297 = vmatpush3.bf16.msra.mxu0 %v6296_v2  ;;  %3247 = vmatprep.mubr.f32.mxu0 %v1467_v16  ;;  %v6306_v34 = vpack.c.bf16 %v815_v28, %v814_v10  ;;  %v852_v2 = vld [vmem:[#allocation5 + $0x17e0] sm:$0xff]  ;;  %v837_v16 = vld [vmem:[#allocation5 + $0x1768] sm:$0xff]  ;;  %v6322_v28 = vpack.c.bf16 %v823_v18, %v822_v11  ;;  %v879_v11 = vld [vmem:[#allocation5 + $0x18b8] sm:$0xff] }
 0x1b0   :  { %3178 = vmatmul.mubr.f32.vlgmr.msra.gmra.mrb[20].mxu1 %v7124_v17  ;;  %6299 = vmatprep.subr.bf16.mxu0 %v6298_v4  ;;  %v6336_v17 = vpack.c.bf16 %v829_v25, %v828_v22  ;;  %v6316_v4 = vpack.c.bf16 %v803_v51, %v802_v60  ;;  %v6352_v10 = vpack.c.bf16 %v837_v16, %v836_v7  ;;  %v859_v60 = vld [vmem:[#allocation5 + $0x1818] sm:$0xff]  ;;  %v890_v51 = vld [vmem:[#allocation5 + $0x1910] sm:$0xff]  ;;  %v861_v7 = vld [vmem:[#allocation5 + $0x1828] sm:$0xff] }
 0x1b1   :  { %6329 = vmatpush3.bf16.msra.mxu1 %v6328_v3  ;;  %3317 = vmatprep.mubr.f32.mxu1 %v1468_v19  ;;  %v853_v3 = vld [vmem:[#allocation5 + $0x17e8] sm:$0xff]  ;;  %v910_v18 = vld [vmem:[#allocation5 + $0x19b0] sm:$0xff]  ;;  %v884_v53 = vld [vmem:[#allocation5 + $0x18e0] sm:$0xff] }
 0x1b2   :  { %6331 = vmatprep.subr.bf16.mxu1 %v6330_v6  ;;  %v805_v6 = vld [vmem:[#allocation5 + $0x1668] sm:$0xff]  ;;  %v6350_v14 = vpack.c.bf16 %v853_v3, %v852_v2  ;;  %v908_v2 = vld [vmem:[#allocation5 + $0x19a0] sm:$0xff] }
 0x1b3   :  { %6301 = vmatpush3.bf16.msra.mxu0 %v6300_v12  ;;  %v6320_v22 = vpack.c.bf16 %v805_v6, %v804_v8  ;;  %v909_v3 = vld [vmem:[#allocation5 + $0x19a8] sm:$0xff]  ;;  %v6366_v8 = vpack.c.bf16 %v877_v0, %v876_v63  ;;  %v860_v6 = vld [vmem:[#allocation5 + $0x1820] sm:$0xff] }
 0x1b4   :  { %6303 = vmatprep.subr.bf16.mxu0 %v6302_v26  ;;  %v855_v26 = vld [vmem:[#allocation5 + $0x17f8] sm:$0xff]  ;;  %v893_v16 = vld [vmem:[#allocation5 + $0x1928] sm:$0xff] }
 0x1b5   :  { %6333 = vmatpush3.bf16.msra.mxu1 %v6332_v20  ;;  %v854_v20 = vld [vmem:[#allocation5 + $0x17f0] sm:$0xff]  ;;  %v885_v54 = vld [vmem:[#allocation5 + $0x18e8] sm:$0xff] }
 0x1b6   :  { %6335 = vmatprep.subr.bf16.mxu1 %v6334_v24  ;;  %v82_v24 = vld [vmem:[#allocation2 + $0x60] sm:$0xff] }
 0x1b7   :  { %6305 = vmatpush3.bf16.msra.mxu0 %v6304_v32  ;;  %v838_v32 = vld [vmem:[#allocation5 + $0x1770] sm:$0xff]  ;;  %v1469_v40 = vcombine.high %v82_v24, %v82_v24  ;;  %v7151_v50 = vrot.slane %v82_v24, %v7002_v13  ;;  %v895_v24 = vld [vmem:[#allocation5 + $0x1938] sm:$0xff] }
 0x1b8   :  { %6307 = vmatprep.subr.bf16.mxu0 %v6306_v34  ;;  %v6354_v34 = vpack.c.bf16 %v855_v26, %v854_v20  ;;  %v6356_v43 = vpack.c.bf16 %v839_v36, %v838_v32  ;;  %v862_v26 = vld [vmem:[#allocation5 + $0x1830] sm:$0xff]  ;;  %v865_v36 = vld [vmem:[#allocation5 + $0x1848] sm:$0xff] }
 0x1b9   :  { %6337 = vmatpush3.bf16.msra.mxu1 %v6336_v17  ;;  %v7154_v57 = vrot.slane %v1469_v40, %v7002_v13  ;;  %v1484_v45 = vcombine.high %v7151_v50, %v7151_v50  ;;  %v883_v40 = vld [vmem:[#allocation5 + $0x18d8] sm:$0xff] }
 0x1ba   :  { %6339 = vmatprep.subr.bf16.mxu1 %v6338_v38  ;;  %v904_v38 = vld [vmem:[#allocation5 + $0x1980] sm:$0xff] }
 0x1bb   :  { %6309 = vmatpush3.bf16.msra.mxu0 %v6308_v52  ;;  %v6358_v52 = vpack.c.bf16 %v873_v31, %v872_v37  ;;  %v896_v37 = vld [vmem:[#allocation5 + $0x1940] sm:$0xff] }
 0x1bc   :  { %6311 = vmatprep.subr.bf16.mxu0 %v6310_v27  ;;  %v857_v27 = vld [vmem:[#allocation5 + $0x1808] sm:$0xff] }
 0x1bd   :  { %6341 = vmatpush3.bf16.msra.mxu1 %v6340_v44  ;;  %v856_v44 = vld [vmem:[#allocation5 + $0x1800] sm:$0xff] }
 0x1be   :  { %6343 = vmatprep.subr.bf16.mxu1 %v6342_v49  ;;  %v875_v49 = vld [vmem:[#allocation5 + $0x1898] sm:$0xff]  ;;  %v6360_v33 = vpack.c.bf16 %v857_v27, %v856_v44 }
 0x1bf   :  { %6313 = vmatpush3.bf16.msra.mxu0 %v6312_v59  ;;  %v6392_v59 = vpack.c.bf16 %v889_v47, %v888_v46  ;;  %v866_v46 = vld [vmem:[#allocation5 + $0x1850] sm:$0xff] }
 0x1c0   :  { %6315 = vmatprep.subr.bf16.mxu0 %v6314_v35  ;;  %v858_v35 = vld [vmem:[#allocation5 + $0x1810] sm:$0xff] }
 0x1c1   :  { %6345 = vmatpush3.bf16.msra.mxu1 %v6344_v55  ;;  %v4590_v9 = vpop.f32.mrb[8].mxu0  ;;  %v6362_v55 = vpack.c.bf16 %v875_v49, %v874_v48  ;;  %v898_v47 = vld [vmem:[#allocation5 + $0x1950] sm:$0xff]  ;;  %v899_v49 = vld [vmem:[#allocation5 + $0x1958] sm:$0xff] }
 0x1c2   :  { %6347 = vmatprep.subr.bf16.mxu1 %v6346_v62  ;;  %v4591_v19 = vpop.f32.mrb[9].mxu0  ;;  %v891_v62 = vld [vmem:[#allocation5 + $0x1918] sm:$0xff] }
 0x1c3   :  { %v4625_v12 = vpop.f32.mrb[8].mxu1  ;;  %v4592_v21 = vadd.f32 %v4591_v19, %v4590_v9  ;;  %6317 = vmatpush3.bf16.msra.mxu0 %v6316_v4  ;;  %v1485_v4 = vcombine.high %v7154_v57, %v7154_v57  ;;  %v892_v9 = vld [vmem:[#allocation5 + $0x1920] sm:$0xff]  ;;  %v911_v19 = vld [vmem:[#allocation5 + $0x19b8] sm:$0xff] }
 0x1c4   :  { %v4626_v15 = vpop.f32.mrb[9].mxu1  ;;  %6319 = vmatprep.subr.bf16.mxu0 %v6318_v5  ;;  %v6396_v5 = vpack.c.bf16 %v891_v62, %v890_v51  ;;  %v868_v51 = vld [vmem:[#allocation5 + $0x1860] sm:$0xff] }
 0x1c5   :  { %v4627_v25 = vadd.f32 %v4626_v15, %v4625_v12  ;;  %6349 = vmatpush3.bf16.msra.mxu1 %v6348_v56  ;;  %v2270_v17 = vadd.f32 %v4592_v21, %v7133_v42  ;;  %v6390_v42 = vpack.c.bf16 %v905_v39, %v904_v38  ;;  %v6364_v56 = vpack.c.bf16 %v859_v60, %v858_v35  ;;  %v863_v21 = vld [vmem:[#allocation5 + $0x1838] sm:$0xff]  ;;  %v894_v15 = vld [vmem:[#allocation5 + $0x1930] sm:$0xff]  ;;  %v897_v38 = vld [vmem:[#allocation5 + $0x1948] sm:$0xff] }
 0x1c6   :  { %6351 = vmatprep.subr.bf16.mxu1 %v6350_v14  ;;  %v6398_v14 = vpack.c.bf16 %v909_v3, %v908_v2  ;;  %v6368_v12 = vpack.c.bf16 %v861_v7, %v860_v6  ;;  %v6372_v30 = vpack.c.bf16 %v863_v21, %v862_v26  ;;  %v6404_v32 = vpack.c.bf16 %v895_v24, %v894_v15  ;;  %v882_v39 = vld [vmem:[#allocation5 + $0x18d0] sm:$0xff]  ;;  %v900_v62 = vld [vmem:[#allocation5 + $0x1960] sm:$0xff]  ;;  %v887_v3 = vld [vmem:[#allocation5 + $0x18f8] sm:$0xff] }
 0x1c7   :  { %v7148_v23 = vadd.f32 %v4627_v25, %v2270_v17  ;;  %6321 = vmatpush3.bf16.msra.mxu0 %v6320_v22  ;;  %v6402_v22 = vpack.c.bf16 %v911_v19, %v910_v18  ;;  %v880_v25 = vld [vmem:[#allocation5 + $0x18c0] sm:$0xff]  ;;  %v6408_v44 = vpack.c.bf16 %v897_v38, %v896_v37  ;;  %v6378_v27 = vpack.c.bf16 %v883_v40, %v882_v39  ;;  %v886_v2 = vld [vmem:[#allocation5 + $0x18f0] sm:$0xff]  ;;  %v871_v19 = vld [vmem:[#allocation5 + $0x1878] sm:$0xff] }
 0x1c8   :  { %6323 = vmatprep.subr.bf16.mxu0 %v6322_v28  ;;  %v912_v28 = vld [vmem:[#allocation5 + $0x19c0] sm:$0xff]  ;;  %v6412_v35 = vpack.c.bf16 %v899_v49, %v898_v47  ;;  %v6382_v60 = vpack.c.bf16 %v885_v54, %v884_v53  ;;  %v870_v18 = vld [vmem:[#allocation5 + $0x1870] sm:$0xff]  ;;  %v903_v26 = vld [vmem:[#allocation5 + $0x1978] sm:$0xff] }
 0x1c9   :  { %6353 = vmatpush3.bf16.msra.mxu1 %v6352_v10  ;;  %v881_v10 = vld [vmem:[#allocation5 + $0x18c8] sm:$0xff]  ;;  %v6406_v31 = vpack.c.bf16 %v913_v29, %v912_v28  ;;  %v936_v21 = vld [vmem:[#allocation5 + $0x1a80] sm:$0xff]  ;;  %v6388_v28 = vpack.c.bf16 %v871_v19, %v870_v18  ;;  %v938_v37 = vld [vmem:[#allocation5 + $0x1a90] sm:$0xff] }
 0x1ca   :  { %6355 = vmatprep.subr.bf16.mxu1 %v6354_v34  ;;  %v6374_v17 = vpack.c.bf16 %v881_v10, %v880_v25  ;;  %v864_v34 = vld [vmem:[#allocation5 + $0x1840] sm:$0xff]  ;;  %v937_v15 = vld [vmem:[#allocation5 + $0x1a88] sm:$0xff]  ;;  %v970_v39 = vld [vmem:[#allocation5 + $0x1b90] sm:$0xff] }
 0x1cb   :  { %6325 = vmatpush3.bf16.msra.mxu0 %v6324_v41  ;;  %v914_v41 = vld [vmem:[#allocation5 + $0x19d0] sm:$0xff]  ;;  %v969_v24 = vld [vmem:[#allocation5 + $0x1b88] sm:$0xff]  ;;  %v971_v40 = vld [vmem:[#allocation5 + $0x1b98] sm:$0xff] }
 0x1cc   :  { %6359 = vmatprep.subr.bf16.mxu0 %v6358_v52  ;;  %v6376_v52 = vpack.c.bf16 %v865_v36, %v864_v34  ;;  %v952_v34 = vld [vmem:[#allocation5 + $0x1b00] sm:$0xff]  ;;  %v953_v36 = vld [vmem:[#allocation5 + $0x1b08] sm:$0xff]  ;;  %v6458_v47 = vpack.c.bf16 %v971_v40, %v970_v39 }
 0x1cd   :  { %6357 = vmatpush3.bf16.msra.mxu1 %v6356_v43  ;;  %v915_v43 = vld [vmem:[#allocation5 + $0x19d8] sm:$0xff]  ;;  %v940_v49 = vld [vmem:[#allocation5 + $0x1aa0] sm:$0xff]  ;;  %v941_v53 = vld [vmem:[#allocation5 + $0x1aa8] sm:$0xff] }
 0x1ce   :  { %6391 = vmatprep.subr.bf16.mxu1 %v6390_v42  ;;  %3248 = vmatmul.mubr.f32.vlgmr.msra.gmra.mrb[22].mxu0 %v7136_v58  ;;  %v878_v58 = vld [vmem:[#allocation5 + $0x18b0] sm:$0xff]  ;;  %v867_v42 = vld [vmem:[#allocation5 + $0x1858] sm:$0xff]  ;;  %v6410_v48 = vpack.c.bf16 %v915_v43, %v914_v41  ;;  %v977_v18 = vld [vmem:[#allocation5 + $0x1bc8] sm:$0xff] }
 0x1cf   :  { %6361 = vmatpush3.bf16.msra.mxu0 %v6360_v33  ;;  %3387 = vmatprep.mubr.f32.mxu0 %v1484_v45  ;;  %v6370_v20 = vpack.c.bf16 %v879_v11, %v878_v58  ;;  %v916_v33 = vld [vmem:[#allocation5 + $0x19e0] sm:$0xff]  ;;  %v901_v45 = vld [vmem:[#allocation5 + $0x1968] sm:$0xff]  ;;  %v6386_v11 = vpack.c.bf16 %v887_v3, %v886_v2  ;;  %v943_v2 = vld [vmem:[#allocation5 + $0x1ab8] sm:$0xff] }
 0x1d0   :  { %3318 = vmatmul.mubr.f32.vlgmr.msra.gmra.mrb[22].mxu1 %v7139_v1  ;;  %6363 = vmatprep.subr.bf16.mxu0 %v6362_v55  ;;  %v6400_v1 = vpack.c.bf16 %v893_v16, %v892_v9  ;;  %v6380_v55 = vpack.c.bf16 %v867_v42, %v866_v46  ;;  %v6416_v58 = vpack.c.bf16 %v901_v45, %v900_v62  ;;  %v923_v46 = vld [vmem:[#allocation5 + $0x1a18] sm:$0xff]  ;;  %v954_v42 = vld [vmem:[#allocation5 + $0x1b10] sm:$0xff]  ;;  %v925_v62 = vld [vmem:[#allocation5 + $0x1a28] sm:$0xff] }
 0x1d1   :  { %6393 = vmatpush3.bf16.msra.mxu1 %v6392_v59  ;;  %3457 = vmatprep.mubr.f32.mxu1 %v1485_v4  ;;  %v917_v59 = vld [vmem:[#allocation5 + $0x19e8] sm:$0xff]  ;;  %v974_v3 = vld [vmem:[#allocation5 + $0x1bb0] sm:$0xff]  ;;  %v948_v39 = vld [vmem:[#allocation5 + $0x1ae0] sm:$0xff] }
 0x1d2   :  { %6395 = vmatprep.subr.bf16.mxu1 %v6394_v61  ;;  %v869_v61 = vld [vmem:[#allocation5 + $0x1868] sm:$0xff]  ;;  %v6414_v0 = vpack.c.bf16 %v917_v59, %v916_v33  ;;  %v972_v33 = vld [vmem:[#allocation5 + $0x1ba0] sm:$0xff] }
 0x1d3   :  { %6365 = vmatpush3.bf16.msra.mxu0 %v6364_v56  ;;  %v6384_v9 = vpack.c.bf16 %v869_v61, %v868_v51  ;;  %v973_v59 = vld [vmem:[#allocation5 + $0x1ba8] sm:$0xff]  ;;  %v6430_v51 = vpack.c.bf16 %v941_v53, %v940_v49  ;;  %v924_v61 = vld [vmem:[#allocation5 + $0x1a20] sm:$0xff] }
 0x1d4   :  { %6367 = vmatprep.subr.bf16.mxu0 %v6366_v8  ;;  %v919_v8 = vld [vmem:[#allocation5 + $0x19f8] sm:$0xff]  ;;  %v957_v45 = vld [vmem:[#allocation5 + $0x1b28] sm:$0xff] }
 0x1d5   :  { %6397 = vmatpush3.bf16.msra.mxu1 %v6396_v5  ;;  %v918_v5 = vld [vmem:[#allocation5 + $0x19f0] sm:$0xff]  ;;  %v949_v40 = vld [vmem:[#allocation5 + $0x1ae8] sm:$0xff] }
 0x1d6   :  { %6399 = vmatprep.subr.bf16.mxu1 %v6398_v14  ;;  %v83_v14 = vld [vmem:[#allocation2 + $0x68] sm:$0xff] }
 0x1d7   :  { %6369 = vmatpush3.bf16.msra.mxu0 %v6368_v12  ;;  %v902_v12 = vld [vmem:[#allocation5 + $0x1970] sm:$0xff]  ;;  %v1486_v25 = vcombine.high %v83_v14, %v83_v14  ;;  %v7166_v38 = vrot.slane %v83_v14, %v7002_v13  ;;  %v959_v14 = vld [vmem:[#allocation5 + $0x1b38] sm:$0xff] }
 0x1d8   :  { %6371 = vmatprep.subr.bf16.mxu0 %v6370_v20  ;;  %v6418_v20 = vpack.c.bf16 %v919_v8, %v918_v5  ;;  %v6420_v29 = vpack.c.bf16 %v903_v26, %v902_v12  ;;  %v926_v8 = vld [vmem:[#allocation5 + $0x1a30] sm:$0xff]  ;;  %v929_v26 = vld [vmem:[#allocation5 + $0x1a48] sm:$0xff] }
 0x1d9   :  { %6401 = vmatpush3.bf16.msra.mxu1 %v6400_v1  ;;  %v7169_v41 = vrot.slane %v1486_v25, %v7002_v13  ;;  %v1501_v54 = vcombine.high %v7166_v38, %v7166_v38  ;;  %v947_v25 = vld [vmem:[#allocation5 + $0x1ad8] sm:$0xff] }
 0x1da   :  { %6403 = vmatprep.subr.bf16.mxu1 %v6402_v22  ;;  %v968_v22 = vld [vmem:[#allocation5 + $0x1b80] sm:$0xff] }
 0x1db   :  { %6373 = vmatpush3.bf16.msra.mxu0 %v6372_v30  ;;  %v6422_v30 = vpack.c.bf16 %v937_v15, %v936_v21  ;;  %v960_v21 = vld [vmem:[#allocation5 + $0x1b40] sm:$0xff] }
 0x1dc   :  { %6375 = vmatprep.subr.bf16.mxu0 %v6374_v17  ;;  %v921_v17 = vld [vmem:[#allocation5 + $0x1a08] sm:$0xff] }
 0x1dd   :  { %6405 = vmatpush3.bf16.msra.mxu1 %v6404_v32  ;;  %v920_v32 = vld [vmem:[#allocation5 + $0x1a00] sm:$0xff] }
 0x1de   :  { %6407 = vmatprep.subr.bf16.mxu1 %v6406_v31  ;;  %v939_v31 = vld [vmem:[#allocation5 + $0x1a98] sm:$0xff]  ;;  %v6424_v43 = vpack.c.bf16 %v921_v17, %v920_v32 }
 0x1df   :  { %6377 = vmatpush3.bf16.msra.mxu0 %v6376_v52  ;;  %v6456_v52 = vpack.c.bf16 %v953_v36, %v952_v34  ;;  %v930_v34 = vld [vmem:[#allocation5 + $0x1a50] sm:$0xff] }
 0x1e0   :  { %6379 = vmatprep.subr.bf16.mxu0 %v6378_v27  ;;  %v922_v27 = vld [vmem:[#allocation5 + $0x1a10] sm:$0xff] }
 0x1e1   :  { %6409 = vmatpush3.bf16.msra.mxu1 %v6408_v44  ;;  %v4660_v63 = vpop.f32.mrb[10].mxu0  ;;  %v6426_v44 = vpack.c.bf16 %v939_v31, %v938_v37  ;;  %v962_v36 = vld [vmem:[#allocation5 + $0x1b50] sm:$0xff]  ;;  %v963_v31 = vld [vmem:[#allocation5 + $0x1b58] sm:$0xff] }
 0x1e2   :  { %6411 = vmatprep.subr.bf16.mxu1 %v6410_v48  ;;  %v4661_v4 = vpop.f32.mrb[11].mxu0  ;;  %v955_v48 = vld [vmem:[#allocation5 + $0x1b18] sm:$0xff] }
 0x1e3   :  { %v4695_v56 = vpop.f32.mrb[10].mxu1  ;;  %v4662_v6 = vadd.f32 %v4661_v4, %v4660_v63  ;;  %6381 = vmatpush3.bf16.msra.mxu0 %v6380_v55  ;;  %v1502_v55 = vcombine.high %v7169_v41, %v7169_v41  ;;  %v956_v63 = vld [vmem:[#allocation5 + $0x1b20] sm:$0xff]  ;;  %v975_v4 = vld [vmem:[#allocation5 + $0x1bb8] sm:$0xff] }
 0x1e4   :  { %v4696_v7 = vpop.f32.mrb[11].mxu1  ;;  %6383 = vmatprep.subr.bf16.mxu0 %v6382_v60  ;;  %v6460_v60 = vpack.c.bf16 %v955_v48, %v954_v42  ;;  %v932_v42 = vld [vmem:[#allocation5 + $0x1a60] sm:$0xff] }
 0x1e5   :  { %v4697_v16 = vadd.f32 %v4696_v7, %v4695_v56  ;;  %6413 = vmatpush3.bf16.msra.mxu1 %v6412_v35  ;;  %v2410_v1 = vadd.f32 %v4662_v6, %v7148_v23  ;;  %v6454_v23 = vpack.c.bf16 %v969_v24, %v968_v22  ;;  %v6428_v35 = vpack.c.bf16 %v923_v46, %v922_v27  ;;  %v927_v6 = vld [vmem:[#allocation5 + $0x1a38] sm:$0xff]  ;;  %v958_v7 = vld [vmem:[#allocation5 + $0x1b30] sm:$0xff]  ;;  %v961_v22 = vld [vmem:[#allocation5 + $0x1b48] sm:$0xff] }
 0x1e6   :  { %6415 = vmatprep.subr.bf16.mxu1 %v6414_v0  ;;  %v6462_v0 = vpack.c.bf16 %v973_v59, %v972_v33  ;;  %v6432_v56 = vpack.c.bf16 %v925_v62, %v924_v61  ;;  %v6436_v19 = vpack.c.bf16 %v927_v6, %v926_v8  ;;  %v6468_v12 = vpack.c.bf16 %v959_v14, %v958_v7  ;;  %v946_v24 = vld [vmem:[#allocation5 + $0x1ad0] sm:$0xff]  ;;  %v964_v48 = vld [vmem:[#allocation5 + $0x1b60] sm:$0xff]  ;;  %v951_v59 = vld [vmem:[#allocation5 + $0x1af8] sm:$0xff] }
 0x1e7   :  { %v7163_v10 = vadd.f32 %v4697_v16, %v2410_v1  ;;  %6385 = vmatpush3.bf16.msra.mxu0 %v6384_v9  ;;  %v6466_v9 = vpack.c.bf16 %v975_v4, %v974_v3  ;;  %v944_v16 = vld [vmem:[#allocation5 + $0x1ac0] sm:$0xff]  ;;  %v6472_v32 = vpack.c.bf16 %v961_v22, %v960_v21  ;;  %v6442_v17 = vpack.c.bf16 %v947_v25, %v946_v24  ;;  %v950_v33 = vld [vmem:[#allocation5 + $0x1af0] sm:$0xff]  ;;  %v935_v4 = vld [vmem:[#allocation5 + $0x1a78] sm:$0xff] }
 0x1e8   :  { %6387 = vmatprep.subr.bf16.mxu0 %v6386_v11  ;;  %v976_v11 = vld [vmem:[#allocation5 + $0x1bc0] sm:$0xff]  ;;  %v6476_v27 = vpack.c.bf16 %v963_v31, %v962_v36  ;;  %v6446_v46 = vpack.c.bf16 %v949_v40, %v948_v39  ;;  %v934_v3 = vld [vmem:[#allocation5 + $0x1a70] sm:$0xff]  ;;  %v967_v8 = vld [vmem:[#allocation5 + $0x1b78] sm:$0xff] }
 0x1e9   :  { %6417 = vmatpush3.bf16.msra.mxu1 %v6416_v58  ;;  %v945_v58 = vld [vmem:[#allocation5 + $0x1ac8] sm:$0xff]  ;;  %v6470_v15 = vpack.c.bf16 %v977_v18, %v976_v11  ;;  %v1000_v6 = vld [vmem:[#allocation5 + $0x1c80] sm:$0xff]  ;;  %v6452_v11 = vpack.c.bf16 %v935_v4, %v934_v3  ;;  %v1002_v21 = vld [vmem:[#allocation5 + $0x1c90] sm:$0xff] }
 0x1ea   :  { %6419 = vmatprep.subr.bf16.mxu1 %v6418_v20  ;;  %v6438_v1 = vpack.c.bf16 %v945_v58, %v944_v16  ;;  %v928_v20 = vld [vmem:[#allocation5 + $0x1a40] sm:$0xff]  ;;  %v1001_v7 = vld [vmem:[#allocation5 + $0x1c88] sm:$0xff]  ;;  %v1034_v24 = vld [vmem:[#allocation5 + $0x1d90] sm:$0xff] }
 0x1eb   :  { %6389 = vmatpush3.bf16.msra.mxu0 %v6388_v28  ;;  %v978_v28 = vld [vmem:[#allocation5 + $0x1bd0] sm:$0xff]  ;;  %v1033_v14 = vld [vmem:[#allocation5 + $0x1d88] sm:$0xff]  ;;  %v1035_v25 = vld [vmem:[#allocation5 + $0x1d98] sm:$0xff] }
 0x1ec   :  { %6423 = vmatprep.subr.bf16.mxu0 %v6422_v30  ;;  %v6440_v30 = vpack.c.bf16 %v929_v26, %v928_v20  ;;  %v1016_v20 = vld [vmem:[#allocation5 + $0x1d00] sm:$0xff]  ;;  %v1017_v26 = vld [vmem:[#allocation5 + $0x1d08] sm:$0xff]  ;;  %v6522_v36 = vpack.c.bf16 %v1035_v25, %v1034_v24 }
 0x1ed   :  { %6421 = vmatpush3.bf16.msra.mxu1 %v6420_v29  ;;  %v979_v29 = vld [vmem:[#allocation5 + $0x1bd8] sm:$0xff]  ;;  %v1004_v31 = vld [vmem:[#allocation5 + $0x1ca0] sm:$0xff]  ;;  %v1005_v39 = vld [vmem:[#allocation5 + $0x1ca8] sm:$0xff] }
 0x1ee   :  { %6455 = vmatprep.subr.bf16.mxu1 %v6454_v23  ;;  %3388 = vmatmul.mubr.f32.vlgmr.msra.gmra.mrb[24].mxu0 %v7151_v50  ;;  %v942_v50 = vld [vmem:[#allocation5 + $0x1ab0] sm:$0xff]  ;;  %v931_v23 = vld [vmem:[#allocation5 + $0x1a58] sm:$0xff]  ;;  %v6474_v37 = vpack.c.bf16 %v979_v29, %v978_v28  ;;  %v1041_v3 = vld [vmem:[#allocation5 + $0x1dc8] sm:$0xff] }
 0x1ef   :  { %6425 = vmatpush3.bf16.msra.mxu0 %v6424_v43  ;;  %3527 = vmatprep.mubr.f32.mxu0 %v1501_v54  ;;  %v6434_v5 = vpack.c.bf16 %v943_v2, %v942_v50  ;;  %v980_v43 = vld [vmem:[#allocation5 + $0x1be0] sm:$0xff]  ;;  %v965_v54 = vld [vmem:[#allocation5 + $0x1b68] sm:$0xff]  ;;  %v6450_v2 = vpack.c.bf16 %v951_v59, %v950_v33  ;;  %v1007_v33 = vld [vmem:[#allocation5 + $0x1cb8] sm:$0xff] }
 0x1f0   :  { %3458 = vmatmul.mubr.f32.vlgmr.msra.gmra.mrb[24].mxu1 %v7154_v57  ;;  %6427 = vmatprep.subr.bf16.mxu0 %v6426_v44  ;;  %v6464_v57 = vpack.c.bf16 %v957_v45, %v956_v63  ;;  %v6444_v44 = vpack.c.bf16 %v931_v23, %v930_v34  ;;  %v6480_v50 = vpack.c.bf16 %v965_v54, %v964_v48  ;;  %v987_v34 = vld [vmem:[#allocation5 + $0x1c18] sm:$0xff]  ;;  %v1018_v23 = vld [vmem:[#allocation5 + $0x1d10] sm:$0xff]  ;;  %v989_v48 = vld [vmem:[#allocation5 + $0x1c28] sm:$0xff] }
 0x1f1   :  { %6457 = vmatpush3.bf16.msra.mxu1 %v6456_v52  ;;  %3597 = vmatprep.mubr.f32.mxu1 %v1502_v55  ;;  %v981_v52 = vld [vmem:[#allocation5 + $0x1be8] sm:$0xff]  ;;  %v1038_v59 = vld [vmem:[#allocation5 + $0x1db0] sm:$0xff]  ;;  %v1012_v24 = vld [vmem:[#allocation5 + $0x1ce0] sm:$0xff] }
 0x1f2   :  { %6459 = vmatprep.subr.bf16.mxu1 %v6458_v47  ;;  %v933_v47 = vld [vmem:[#allocation5 + $0x1a68] sm:$0xff]  ;;  %v6478_v53 = vpack.c.bf16 %v981_v52, %v980_v43  ;;  %v1036_v43 = vld [vmem:[#allocation5 + $0x1da0] sm:$0xff] }
 0x1f3   :  { %6429 = vmatpush3.bf16.msra.mxu0 %v6428_v35  ;;  %v6448_v63 = vpack.c.bf16 %v933_v47, %v932_v42  ;;  %v1037_v52 = vld [vmem:[#allocation5 + $0x1da8] sm:$0xff]  ;;  %v6494_v42 = vpack.c.bf16 %v1005_v39, %v1004_v31  ;;  %v988_v47 = vld [vmem:[#allocation5 + $0x1c20] sm:$0xff] }
 0x1f4   :  { %6431 = vmatprep.subr.bf16.mxu0 %v6430_v51  ;;  %v983_v51 = vld [vmem:[#allocation5 + $0x1bf8] sm:$0xff]  ;;  %v1021_v54 = vld [vmem:[#allocation5 + $0x1d28] sm:$0xff] }
 0x1f5   :  { %6461 = vmatpush3.bf16.msra.mxu1 %v6460_v60  ;;  %v982_v60 = vld [vmem:[#allocation5 + $0x1bf0] sm:$0xff]  ;;  %v1013_v25 = vld [vmem:[#allocation5 + $0x1ce8] sm:$0xff] }
 0x1f6   :  { %6463 = vmatprep.subr.bf16.mxu1 %v6462_v0  ;;  %v84_v0 = vld [vmem:[#allocation2 + $0x70] sm:$0xff] }
 0x1f7   :  { %6433 = vmatpush3.bf16.msra.mxu0 %v6432_v56  ;;  %v966_v56 = vld [vmem:[#allocation5 + $0x1b70] sm:$0xff]  ;;  %v1503_v16 = vcombine.high %v84_v0, %v84_v0  ;;  %v7181_v22 = vrot.slane %v84_v0, %v7002_v13  ;;  %v1023_v0 = vld [vmem:[#allocation5 + $0x1d38] sm:$0xff] }
 0x1f8   :  { %6435 = vmatprep.subr.bf16.mxu0 %v6434_v5  ;;  %v6482_v5 = vpack.c.bf16 %v983_v51, %v982_v60  ;;  %v6484_v18 = vpack.c.bf16 %v967_v8, %v966_v56  ;;  %v990_v51 = vld [vmem:[#allocation5 + $0x1c30] sm:$0xff]  ;;  %v993_v8 = vld [vmem:[#allocation5 + $0x1c48] sm:$0xff] }
 0x1f9   :  { %6465 = vmatpush3.bf16.msra.mxu1 %v6464_v57  ;;  %v7184_v28 = vrot.slane %v1503_v16, %v7002_v13  ;;  %v1518_v40 = vcombine.high %v7181_v22, %v7181_v22  ;;  %v1011_v16 = vld [vmem:[#allocation5 + $0x1cd8] sm:$0xff] }
 0x1fa   :  { %6467 = vmatprep.subr.bf16.mxu1 %v6466_v9  ;;  %v1032_v9 = vld [vmem:[#allocation5 + $0x1d80] sm:$0xff] }
 0x1fb   :  { %6437 = vmatpush3.bf16.msra.mxu0 %v6436_v19  ;;  %v6486_v19 = vpack.c.bf16 %v1001_v7, %v1000_v6  ;;  %v1024_v6 = vld [vmem:[#allocation5 + $0x1d40] sm:$0xff] }
 0x1fc   :  { %6439 = vmatprep.subr.bf16.mxu0 %v6438_v1  ;;  %v985_v1 = vld [vmem:[#allocation5 + $0x1c08] sm:$0xff] }
 0x1fd   :  { %6469 = vmatpush3.bf16.msra.mxu1 %v6468_v12  ;;  %v984_v12 = vld [vmem:[#allocation5 + $0x1c00] sm:$0xff] }
 0x1fe   :  { %6471 = vmatprep.subr.bf16.mxu1 %v6470_v15  ;;  %v1003_v15 = vld [vmem:[#allocation5 + $0x1c98] sm:$0xff]  ;;  %v6488_v29 = vpack.c.bf16 %v985_v1, %v984_v12 }
 0x1ff   :  { %6441 = vmatpush3.bf16.msra.mxu0 %v6440_v30  ;;  %v6520_v30 = vpack.c.bf16 %v1017_v26, %v1016_v20  ;;  %v994_v20 = vld [vmem:[#allocation5 + $0x1c50] sm:$0xff] }
 0x200   :  { %6443 = vmatprep.subr.bf16.mxu0 %v6442_v17  ;;  %v986_v17 = vld [vmem:[#allocation5 + $0x1c10] sm:$0xff] }
 0x201   :  { %6473 = vmatpush3.bf16.msra.mxu1 %v6472_v32  ;;  %v4730_v49 = vpop.f32.mrb[12].mxu0  ;;  %v6490_v32 = vpack.c.bf16 %v1003_v15, %v1002_v21  ;;  %v1026_v26 = vld [vmem:[#allocation5 + $0x1d50] sm:$0xff]  ;;  %v1027_v15 = vld [vmem:[#allocation5 + $0x1d58] sm:$0xff] }
 0x202   :  { %6475 = vmatprep.subr.bf16.mxu1 %v6474_v37  ;;  %v4731_v55 = vpop.f32.mrb[13].mxu0  ;;  %v1019_v37 = vld [vmem:[#allocation5 + $0x1d18] sm:$0xff] }
 0x203   :  { %v4765_v35 = vpop.f32.mrb[12].mxu1  ;;  %v4732_v61 = vadd.f32 %v4731_v55, %v4730_v49  ;;  %6445 = vmatpush3.bf16.msra.mxu0 %v6444_v44  ;;  %v1519_v44 = vcombine.high %v7184_v28, %v7184_v28  ;;  %v1020_v49 = vld [vmem:[#allocation5 + $0x1d20] sm:$0xff]  ;;  %v1039_v55 = vld [vmem:[#allocation5 + $0x1db8] sm:$0xff] }
 0x204   :  { %v4766_v62 = vpop.f32.mrb[13].mxu1  ;;  %6447 = vmatprep.subr.bf16.mxu0 %v6446_v46  ;;  %v6524_v46 = vpack.c.bf16 %v1019_v37, %v1018_v23  ;;  %v996_v23 = vld [vmem:[#allocation5 + $0x1c60] sm:$0xff] }
 0x205   :  { %v4767_v45 = vadd.f32 %v4766_v62, %v4765_v35  ;;  %6477 = vmatpush3.bf16.msra.mxu1 %v6476_v27  ;;  %v2550_v57 = vadd.f32 %v4732_v61, %v7163_v10  ;;  %v6518_v10 = vpack.c.bf16 %v1033_v14, %v1032_v9  ;;  %v6492_v27 = vpack.c.bf16 %v987_v34, %v986_v17  ;;  %v991_v61 = vld [vmem:[#allocation5 + $0x1c38] sm:$0xff]  ;;  %v1022_v62 = vld [vmem:[#allocation5 + $0x1d30] sm:$0xff]  ;;  %v1025_v9 = vld [vmem:[#allocation5 + $0x1d48] sm:$0xff] }
 0x206   :  { %6479 = vmatprep.subr.bf16.mxu1 %v6478_v53  ;;  %v6526_v53 = vpack.c.bf16 %v1037_v52, %v1036_v43  ;;  %v6496_v35 = vpack.c.bf16 %v989_v48, %v988_v47  ;;  %v6500_v4 = vpack.c.bf16 %v991_v61, %v990_v51  ;;  %v6532_v56 = vpack.c.bf16 %v1023_v0, %v1022_v62  ;;  %v1010_v14 = vld [vmem:[#allocation5 + $0x1cd0] sm:$0xff]  ;;  %v1028_v37 = vld [vmem:[#allocation5 + $0x1d60] sm:$0xff]  ;;  %v1015_v52 = vld [vmem:[#allocation5 + $0x1cf8] sm:$0xff] }
 0x207   :  { %v7178_v58 = vadd.f32 %v4767_v45, %v2550_v57  ;;  %6449 = vmatpush3.bf16.msra.mxu0 %v6448_v63  ;;  %v6530_v63 = vpack.c.bf16 %v1039_v55, %v1038_v59  ;;  %v1008_v45 = vld [vmem:[#allocation5 + $0x1cc0] sm:$0xff]  ;;  %v6536_v12 = vpack.c.bf16 %v1025_v9, %v1024_v6  ;;  %v6506_v1 = vpack.c.bf16 %v1011_v16, %v1010_v14  ;;  %v1014_v43 = vld [vmem:[#allocation5 + $0x1cf0] sm:$0xff]  ;;  %v999_v55 = vld [vmem:[#allocation5 + $0x1c78] sm:$0xff] }
 0x208   :  { %6451 = vmatprep.subr.bf16.mxu0 %v6450_v2  ;;  %v1040_v2 = vld [vmem:[#allocation5 + $0x1dc0] sm:$0xff]  ;;  %v6540_v17 = vpack.c.bf16 %v1027_v15, %v1026_v26  ;;  %v6510_v34 = vpack.c.bf16 %v1013_v25, %v1012_v24  ;;  %v998_v59 = vld [vmem:[#allocation5 + $0x1c70] sm:$0xff]  ;;  %v1031_v51 = vld [vmem:[#allocation5 + $0x1d78] sm:$0xff] }
 0x209   :  { %6481 = vmatpush3.bf16.msra.mxu1 %v6480_v50  ;;  %v1009_v50 = vld [vmem:[#allocation5 + $0x1cc8] sm:$0xff]  ;;  %v6534_v7 = vpack.c.bf16 %v1041_v3, %v1040_v2  ;;  %v1064_v61 = vld [vmem:[#allocation5 + $0x1e80] sm:$0xff]  ;;  %v6516_v2 = vpack.c.bf16 %v999_v55, %v998_v59  ;;  %v1066_v6 = vld [vmem:[#allocation5 + $0x1e90] sm:$0xff] }
 0x20a   :  { %6483 = vmatprep.subr.bf16.mxu1 %v6482_v5  ;;  %v6502_v57 = vpack.c.bf16 %v1009_v50, %v1008_v45  ;;  %v992_v5 = vld [vmem:[#allocation5 + $0x1c40] sm:$0xff]  ;;  %v1065_v62 = vld [vmem:[#allocation5 + $0x1e88] sm:$0xff]  ;;  %v1098_v14 = vld [vmem:[#allocation5 + $0x1f90] sm:$0xff] }
 0x20b   :  { %6453 = vmatpush3.bf16.msra.mxu0 %v6452_v11  ;;  %v1042_v11 = vld [vmem:[#allocation5 + $0x1dd0] sm:$0xff]  ;;  %v1097_v0 = vld [vmem:[#allocation5 + $0x1f88] sm:$0xff]  ;;  %v1099_v16 = vld [vmem:[#allocation5 + $0x1f98] sm:$0xff] }
 0x20c   :  { %6487 = vmatprep.subr.bf16.mxu0 %v6486_v19  ;;  %v6504_v19 = vpack.c.bf16 %v993_v8, %v992_v5  ;;  %v1080_v5 = vld [vmem:[#allocation5 + $0x1f00] sm:$0xff]  ;;  %v1081_v8 = vld [vmem:[#allocation5 + $0x1f08] sm:$0xff]  ;;  %v6586_v26 = vpack.c.bf16 %v1099_v16, %v1098_v14 }
 0x20d   :  { %6485 = vmatpush3.bf16.msra.mxu1 %v6484_v18  ;;  %v1043_v18 = vld [vmem:[#allocation5 + $0x1dd8] sm:$0xff]  ;;  %v1068_v15 = vld [vmem:[#allocation5 + $0x1ea0] sm:$0xff]  ;;  %v1069_v24 = vld [vmem:[#allocation5 + $0x1ea8] sm:$0xff] }
 0x20e   :  { %6519 = vmatprep.subr.bf16.mxu1 %v6518_v10  ;;  %3528 = vmatmul.mubr.f32.vlgmr.msra.gmra.mrb[26].mxu0 %v7166_v38  ;;  %v1006_v38 = vld [vmem:[#allocation5 + $0x1cb0] sm:$0xff]  ;;  %v995_v10 = vld [vmem:[#allocation5 + $0x1c58] sm:$0xff]  ;;  %v6538_v21 = vpack.c.bf16 %v1043_v18, %v1042_v11  ;;  %v1105_v59 = vld [vmem:[#allocation5 + $0x1fc8] sm:$0xff] }
 0x20f   :  { %6489 = vmatpush3.bf16.msra.mxu0 %v6488_v29  ;;  %3667 = vmatprep.mubr.f32.mxu0 %v1518_v40  ;;  %v6498_v60 = vpack.c.bf16 %v1007_v33, %v1006_v38  ;;  %v1044_v29 = vld [vmem:[#allocation5 + $0x1de0] sm:$0xff]  ;;  %v1029_v40 = vld [vmem:[#allocation5 + $0x1d68] sm:$0xff]  ;;  %v6514_v33 = vpack.c.bf16 %v1015_v52, %v1014_v43  ;;  %v1071_v43 = vld [vmem:[#allocation5 + $0x1eb8] sm:$0xff] }
 0x210   :  { %3598 = vmatmul.mubr.f32.vlgmr.msra.gmra.mrb[26].mxu1 %v7169_v41  ;;  %6491 = vmatprep.subr.bf16.mxu0 %v6490_v32  ;;  %v6528_v41 = vpack.c.bf16 %v1021_v54, %v1020_v49  ;;  %v6508_v32 = vpack.c.bf16 %v995_v10, %v994_v20  ;;  %v6544_v38 = vpack.c.bf16 %v1029_v40, %v1028_v37  ;;  %v1051_v20 = vld [vmem:[#allocation5 + $0x1e18] sm:$0xff]  ;;  %v1082_v10 = vld [vmem:[#allocation5 + $0x1f10] sm:$0xff]  ;;  %v1053_v37 = vld [vmem:[#allocation5 + $0x1e28] sm:$0xff] }
 0x211   :  { %6521 = vmatpush3.bf16.msra.mxu1 %v6520_v30  ;;  %3737 = vmatprep.mubr.f32.mxu1 %v1519_v44  ;;  %v1045_v30 = vld [vmem:[#allocation5 + $0x1de8] sm:$0xff]  ;;  %v1102_v52 = vld [vmem:[#allocation5 + $0x1fb0] sm:$0xff]  ;;  %v1076_v14 = vld [vmem:[#allocation5 + $0x1ee0] sm:$0xff] }
 0x212   :  { %6523 = vmatprep.subr.bf16.mxu1 %v6522_v36  ;;  %v997_v36 = vld [vmem:[#allocation5 + $0x1c68] sm:$0xff]  ;;  %v6542_v39 = vpack.c.bf16 %v1045_v30, %v1044_v29  ;;  %v1100_v29 = vld [vmem:[#allocation5 + $0x1fa0] sm:$0xff] }
 0x213   :  { %6493 = vmatpush3.bf16.msra.mxu0 %v6492_v27  ;;  %v6512_v49 = vpack.c.bf16 %v997_v36, %v996_v23  ;;  %v1101_v30 = vld [vmem:[#allocation5 + $0x1fa8] sm:$0xff]  ;;  %v6558_v23 = vpack.c.bf16 %v1069_v24, %v1068_v15  ;;  %v1052_v36 = vld [vmem:[#allocation5 + $0x1e20] sm:$0xff] }
 0x214   :  { %6495 = vmatprep.subr.bf16.mxu0 %v6494_v42  ;;  %v1047_v42 = vld [vmem:[#allocation5 + $0x1df8] sm:$0xff]  ;;  %v1085_v40 = vld [vmem:[#allocation5 + $0x1f28] sm:$0xff] }
 0x215   :  { %6525 = vmatpush3.bf16.msra.mxu1 %v6524_v46  ;;  %v1046_v46 = vld [vmem:[#allocation5 + $0x1df0] sm:$0xff]  ;;  %v1077_v16 = vld [vmem:[#allocation5 + $0x1ee8] sm:$0xff] }
 0x216   :  { %6527 = vmatprep.subr.bf16.mxu1 %v6526_v53  ;;  %v85_v53 = vld [vmem:[#allocation2 + $0x78] sm:$0xff] }
 0x217   :  { %6497 = vmatpush3.bf16.msra.mxu0 %v6496_v35  ;;  %v1030_v35 = vld [vmem:[#allocation5 + $0x1d70] sm:$0xff]  ;;  %v1520_v45 = vcombine.high %v85_v53, %v85_v53  ;;  %v7196_v9 = vrot.slane %v85_v53, %v7002_v13  ;;  %v1087_v53 = vld [vmem:[#allocation5 + $0x1f38] sm:$0xff] }
 0x218   :  { %6499 = vmatprep.subr.bf16.mxu0 %v6498_v60  ;;  %v6546_v60 = vpack.c.bf16 %v1047_v42, %v1046_v46  ;;  %v6548_v3 = vpack.c.bf16 %v1031_v51, %v1030_v35  ;;  %v1054_v42 = vld [vmem:[#allocation5 + $0x1e30] sm:$0xff]  ;;  %v1057_v51 = vld [vmem:[#allocation5 + $0x1e48] sm:$0xff] }
 0x219   :  { %6529 = vmatpush3.bf16.msra.mxu1 %v6528_v41  ;;  %v7199_v11 = vrot.slane %v1520_v45, %v7002_v13  ;;  %v1535_v25 = vcombine.high %v7196_v9, %v7196_v9  ;;  %v1075_v45 = vld [vmem:[#allocation5 + $0x1ed8] sm:$0xff] }
 0x21a   :  { %6531 = vmatprep.subr.bf16.mxu1 %v6530_v63  ;;  %v1096_v63 = vld [vmem:[#allocation5 + $0x1f80] sm:$0xff] }
 0x21b   :  { %6501 = vmatpush3.bf16.msra.mxu0 %v6500_v4  ;;  %v6550_v4 = vpack.c.bf16 %v1065_v62, %v1064_v61  ;;  %v1088_v61 = vld [vmem:[#allocation5 + $0x1f40] sm:$0xff] }
 0x21c   :  { %6503 = vmatprep.subr.bf16.mxu0 %v6502_v57  ;;  %v1049_v57 = vld [vmem:[#allocation5 + $0x1e08] sm:$0xff] }
 0x21d   :  { %6533 = vmatpush3.bf16.msra.mxu1 %v6532_v56  ;;  %v1048_v56 = vld [vmem:[#allocation5 + $0x1e00] sm:$0xff] }
 0x21e   :  { %6535 = vmatprep.subr.bf16.mxu1 %v6534_v7  ;;  %v1067_v7 = vld [vmem:[#allocation5 + $0x1e98] sm:$0xff]  ;;  %v6552_v18 = vpack.c.bf16 %v1049_v57, %v1048_v56 }
 0x21f   :  { %6505 = vmatpush3.bf16.msra.mxu0 %v6504_v19  ;;  %v6584_v19 = vpack.c.bf16 %v1081_v8, %v1080_v5  ;;  %v1058_v5 = vld [vmem:[#allocation5 + $0x1e50] sm:$0xff] }
 0x220   :  { %6507 = vmatprep.subr.bf16.mxu0 %v6506_v1  ;;  %v1050_v1 = vld [vmem:[#allocation5 + $0x1e10] sm:$0xff] }
 0x221   :  { %6537 = vmatpush3.bf16.msra.mxu1 %v6536_v12  ;;  %v4800_v31 = vpop.f32.mrb[14].mxu0  ;;  %v6554_v12 = vpack.c.bf16 %v1067_v7, %v1066_v6  ;;  %v1090_v8 = vld [vmem:[#allocation5 + $0x1f50] sm:$0xff]  ;;  %v1091_v7 = vld [vmem:[#allocation5 + $0x1f58] sm:$0xff] }
 0x222   :  { %6539 = vmatprep.subr.bf16.mxu1 %v6538_v21  ;;  %v4801_v44 = vpop.f32.mrb[15].mxu0  ;;  %v1083_v21 = vld [vmem:[#allocation5 + $0x1f18] sm:$0xff] }
 0x223   :  { %v4835_v27 = vpop.f32.mrb[14].mxu1  ;;  %v4802_v47 = vadd.f32 %v4801_v44, %v4800_v31  ;;  %6509 = vmatpush3.bf16.msra.mxu0 %v6508_v32  ;;  %v1536_v32 = vcombine.high %v7199_v11, %v7199_v11  ;;  %v1084_v31 = vld [vmem:[#allocation5 + $0x1f20] sm:$0xff]  ;;  %v1103_v44 = vld [vmem:[#allocation5 + $0x1fb8] sm:$0xff] }
 0x224   :  { %v4836_v48 = vpop.f32.mrb[15].mxu1  ;;  %6511 = vmatprep.subr.bf16.mxu0 %v6510_v34  ;;  %v6588_v34 = vpack.c.bf16 %v1083_v21, %v1082_v10  ;;  %v1060_v10 = vld [vmem:[#allocation5 + $0x1e60] sm:$0xff] }
 0x225   :  { %v4837_v54 = vadd.f32 %v4836_v48, %v4835_v27  ;;  %6541 = vmatpush3.bf16.msra.mxu1 %v6540_v17  ;;  %v2690_v41 = vadd.f32 %v4802_v47, %v7178_v58  ;;  %v6582_v58 = vpack.c.bf16 %v1097_v0, %v1096_v63  ;;  %v6556_v17 = vpack.c.bf16 %v1051_v20, %v1050_v1  ;;  %v1055_v47 = vld [vmem:[#allocation5 + $0x1e38] sm:$0xff]  ;;  %v1086_v48 = vld [vmem:[#allocation5 + $0x1f30] sm:$0xff]  ;;  %v1089_v63 = vld [vmem:[#allocation5 + $0x1f48] sm:$0xff] }
 0x226   :  { %6543 = vmatprep.subr.bf16.mxu1 %v6542_v39  ;;  %v6590_v39 = vpack.c.bf16 %v1101_v30, %v1100_v29  ;;  %v6560_v27 = vpack.c.bf16 %v1053_v37, %v1052_v36  ;;  %v6564_v55 = vpack.c.bf16 %v1055_v47, %v1054_v42  ;;  %v6596_v35 = vpack.c.bf16 %v1087_v53, %v1086_v48  ;;  %v1074_v0 = vld [vmem:[#allocation5 + $0x1ed0] sm:$0xff]  ;;  %v1092_v21 = vld [vmem:[#allocation5 + $0x1f60] sm:$0xff]  ;;  %v1079_v30 = vld [vmem:[#allocation5 + $0x1ef8] sm:$0xff] }
 0x227   :  { %v7193_v50 = vadd.f32 %v4837_v54, %v2690_v41  ;;  %6513 = vmatpush3.bf16.msra.mxu0 %v6512_v49  ;;  %v6594_v49 = vpack.c.bf16 %v1103_v44, %v1102_v52  ;;  %v1072_v54 = vld [vmem:[#allocation5 + $0x1ec0] sm:$0xff]  ;;  %v6600_v56 = vpack.c.bf16 %v1089_v63, %v1088_v61  ;;  %v6570_v57 = vpack.c.bf16 %v1075_v45, %v1074_v0  ;;  %v1078_v29 = vld [vmem:[#allocation5 + $0x1ef0] sm:$0xff]  ;;  %v1063_v44 = vld [vmem:[#allocation5 + $0x1e78] sm:$0xff] }
 0x228   :  { %6515 = vmatprep.subr.bf16.mxu0 %v6514_v33  ;;  %v1104_v33 = vld [vmem:[#allocation5 + $0x1fc0] sm:$0xff]  ;;  %v6604_v1 = vpack.c.bf16 %v1091_v7, %v1090_v8  ;;  %v6574_v20 = vpack.c.bf16 %v1077_v16, %v1076_v14  ;;  %v1062_v52 = vld [vmem:[#allocation5 + $0x1e70] sm:$0xff]  ;;  %v1095_v42 = vld [vmem:[#allocation5 + $0x1f78] sm:$0xff] }
 0x229   :  { %6545 = vmatpush3.bf16.msra.mxu1 %v6544_v38  ;;  %v1073_v38 = vld [vmem:[#allocation5 + $0x1ec8] sm:$0xff]  ;;  %v6598_v62 = vpack.c.bf16 %v1105_v59, %v1104_v33  ;;  %v1128_v47 = vld [vmem:[#allocation5 + $0x2080] sm:$0xff]  ;;  %v6580_v33 = vpack.c.bf16 %v1063_v44, %v1062_v52  ;;  %v1130_v61 = vld [vmem:[#allocation5 + $0x2090] sm:$0xff] }
 0x22a   :  { %6547 = vmatprep.subr.bf16.mxu1 %v6546_v60  ;;  %v6566_v41 = vpack.c.bf16 %v1073_v38, %v1072_v54  ;;  %v1056_v60 = vld [vmem:[#allocation5 + $0x1e40] sm:$0xff]  ;;  %v1129_v48 = vld [vmem:[#allocation5 + $0x2088] sm:$0xff]  ;;  %v1162_v0 = vld [vmem:[#allocation5 + $0x2190] sm:$0xff] }
 0x22b   :  { %6517 = vmatpush3.bf16.msra.mxu0 %v6516_v2  ;;  %v1106_v2 = vld [vmem:[#allocation5 + $0x1fd0] sm:$0xff]  ;;  %v1161_v53 = vld [vmem:[#allocation5 + $0x2188] sm:$0xff]  ;;  %v1163_v45 = vld [vmem:[#allocation5 + $0x2198] sm:$0xff] }
 0x22c   :  { %6551 = vmatprep.subr.bf16.mxu0 %v6550_v4  ;;  %v6568_v4 = vpack.c.bf16 %v1057_v51, %v1056_v60  ;;  %v1144_v60 = vld [vmem:[#allocation5 + $0x2100] sm:$0xff]  ;;  %v1145_v51 = vld [vmem:[#allocation5 + $0x2108] sm:$0xff]  ;;  %v6650_v8 = vpack.c.bf16 %v1163_v45, %v1162_v0 }
 0x22d   :  { %6549 = vmatpush3.bf16.msra.mxu1 %v6548_v3  ;;  %v1107_v3 = vld [vmem:[#allocation5 + $0x1fd8] sm:$0xff]  ;;  %v1132_v7 = vld [vmem:[#allocation5 + $0x20a0] sm:$0xff]  ;;  %v1133_v14 = vld [vmem:[#allocation5 + $0x20a8] sm:$0xff] }
 0x22e   :  { %6583 = vmatprep.subr.bf16.mxu1 %v6582_v58  ;;  %3668 = vmatmul.mubr.f32.vlgmr.msra.gmra.mrb[28].mxu0 %v7181_v22  ;;  %v1070_v22 = vld [vmem:[#allocation5 + $0x1eb0] sm:$0xff]  ;;  %v1059_v58 = vld [vmem:[#allocation5 + $0x1e58] sm:$0xff]  ;;  %v6602_v6 = vpack.c.bf16 %v1107_v3, %v1106_v2  ;;  %v1169_v52 = vld [vmem:[#allocation5 + $0x21c8] sm:$0xff] }
 0x22f   :  { %6553 = vmatpush3.bf16.msra.mxu0 %v6552_v18  ;;  %3807 = vmatprep.mubr.f32.mxu0 %v1535_v25  ;;  %v6562_v46 = vpack.c.bf16 %v1071_v43, %v1070_v22  ;;  %v1108_v18 = vld [vmem:[#allocation5 + $0x1fe0] sm:$0xff]  ;;  %v1093_v25 = vld [vmem:[#allocation5 + $0x1f68] sm:$0xff]  ;;  %v6578_v43 = vpack.c.bf16 %v1079_v30, %v1078_v29  ;;  %v1135_v29 = vld [vmem:[#allocation5 + $0x20b8] sm:$0xff] }
 0x230   :  { %3738 = vmatmul.mubr.f32.vlgmr.msra.gmra.mrb[28].mxu1 %v7184_v28  ;;  %6555 = vmatprep.subr.bf16.mxu0 %v6554_v12  ;;  %v6592_v28 = vpack.c.bf16 %v1085_v40, %v1084_v31  ;;  %v6572_v12 = vpack.c.bf16 %v1059_v58, %v1058_v5  ;;  %v6608_v22 = vpack.c.bf16 %v1093_v25, %v1092_v21  ;;  %v1115_v5 = vld [vmem:[#allocation5 + $0x2018] sm:$0xff]  ;;  %v1146_v58 = vld [vmem:[#allocation5 + $0x2110] sm:$0xff]  ;;  %v1117_v21 = vld [vmem:[#allocation5 + $0x2028] sm:$0xff] }
 0x231   :  { %6585 = vmatpush3.bf16.msra.mxu1 %v6584_v19  ;;  %3877 = vmatprep.mubr.f32.mxu1 %v1536_v32  ;;  %v1109_v19 = vld [vmem:[#allocation5 + $0x1fe8] sm:$0xff]  ;;  %v1166_v30 = vld [vmem:[#allocation5 + $0x21b0] sm:$0xff]  ;;  %v1140_v0 = vld [vmem:[#allocation5 + $0x20e0] sm:$0xff] }
 0x232   :  { %6587 = vmatprep.subr.bf16.mxu1 %v6586_v26  ;;  %v1061_v26 = vld [vmem:[#allocation5 + $0x1e68] sm:$0xff]  ;;  %v6606_v24 = vpack.c.bf16 %v1109_v19, %v1108_v18  ;;  %v1164_v18 = vld [vmem:[#allocation5 + $0x21a0] sm:$0xff] }
 0x233   :  { %6557 = vmatpush3.bf16.msra.mxu0 %v6556_v17  ;;  %v6576_v31 = vpack.c.bf16 %v1061_v26, %v1060_v10  ;;  %v1165_v19 = vld [vmem:[#allocation5 + $0x21a8] sm:$0xff]  ;;  %v6622_v10 = vpack.c.bf16 %v1133_v14, %v1132_v7  ;;  %v1116_v26 = vld [vmem:[#allocation5 + $0x2020] sm:$0xff] }
 0x234   :  { %6559 = vmatprep.subr.bf16.mxu0 %v6558_v23  ;;  %v1111_v23 = vld [vmem:[#allocation5 + $0x1ff8] sm:$0xff]  ;;  %v1149_v25 = vld [vmem:[#allocation5 + $0x2128] sm:$0xff] }
 0x235   :  { %6589 = vmatpush3.bf16.msra.mxu1 %v6588_v34  ;;  %v1110_v34 = vld [vmem:[#allocation5 + $0x1ff0] sm:$0xff]  ;;  %v1141_v45 = vld [vmem:[#allocation5 + $0x20e8] sm:$0xff] }
 0x236   :  { %6591 = vmatprep.subr.bf16.mxu1 %v6590_v39  ;;  %v86_v39 = vld [vmem:[#allocation2 + $0x80] sm:$0xff] }
 0x237   :  { %6561 = vmatpush3.bf16.msra.mxu0 %v6560_v27  ;;  %v1094_v27 = vld [vmem:[#allocation5 + $0x1f70] sm:$0xff]  ;;  %v1537_v54 = vcombine.high %v86_v39, %v86_v39  ;;  %v7211_v63 = vrot.slane %v86_v39, %v7002_v13  ;;  %v1151_v39 = vld [vmem:[#allocation5 + $0x2138] sm:$0xff] }
 0x238   :  { %6563 = vmatprep.subr.bf16.mxu0 %v6562_v46  ;;  %v6610_v46 = vpack.c.bf16 %v1111_v23, %v1110_v34  ;;  %v6612_v59 = vpack.c.bf16 %v1095_v42, %v1094_v27  ;;  %v1118_v23 = vld [vmem:[#allocation5 + $0x2030] sm:$0xff]  ;;  %v1121_v42 = vld [vmem:[#allocation5 + $0x2048] sm:$0xff] }
 0x239   :  { %6593 = vmatpush3.bf16.msra.mxu1 %v6592_v28  ;;  %v7214_v2 = vrot.slane %v1537_v54, %v7002_v13  ;;  %v1552_v16 = vcombine.high %v7211_v63, %v7211_v63  ;;  %v1139_v54 = vld [vmem:[#allocation5 + $0x20d8] sm:$0xff] }
 0x23a   :  { %6595 = vmatprep.subr.bf16.mxu1 %v6594_v49  ;;  %v1160_v49 = vld [vmem:[#allocation5 + $0x2180] sm:$0xff] }
 0x23b   :  { %6565 = vmatpush3.bf16.msra.mxu0 %v6564_v55  ;;  %v6614_v55 = vpack.c.bf16 %v1129_v48, %v1128_v47  ;;  %v1152_v47 = vld [vmem:[#allocation5 + $0x2140] sm:$0xff] }
 0x23c   :  { %6567 = vmatprep.subr.bf16.mxu0 %v6566_v41  ;;  %v1113_v41 = vld [vmem:[#allocation5 + $0x2008] sm:$0xff] }
 0x23d   :  { %6597 = vmatpush3.bf16.msra.mxu1 %v6596_v35  ;;  %v1112_v35 = vld [vmem:[#allocation5 + $0x2000] sm:$0xff] }
 0x23e   :  { %6599 = vmatprep.subr.bf16.mxu1 %v6598_v62  ;;  %v1131_v62 = vld [vmem:[#allocation5 + $0x2098] sm:$0xff]  ;;  %v6616_v3 = vpack.c.bf16 %v1113_v41, %v1112_v35 }
 0x23f   :  { %6569 = vmatpush3.bf16.msra.mxu0 %v6568_v4  ;;  %v6648_v4 = vpack.c.bf16 %v1145_v51, %v1144_v60  ;;  %v1122_v60 = vld [vmem:[#allocation5 + $0x2050] sm:$0xff] }
 0x240   :  { %6571 = vmatprep.subr.bf16.mxu0 %v6570_v57  ;;  %v1114_v57 = vld [vmem:[#allocation5 + $0x2010] sm:$0xff] }
 0x241   :  { %6601 = vmatpush3.bf16.msra.mxu1 %v6600_v56  ;;  %v4870_v15 = vpop.f32.mrb[16].mxu0  ;;  %v6618_v56 = vpack.c.bf16 %v1131_v62, %v1130_v61  ;;  %v1154_v51 = vld [vmem:[#allocation5 + $0x2150] sm:$0xff]  ;;  %v1155_v62 = vld [vmem:[#allocation5 + $0x2158] sm:$0xff] }
 0x242   :  { %6603 = vmatprep.subr.bf16.mxu1 %v6602_v6  ;;  %v4871_v32 = vpop.f32.mrb[17].mxu0  ;;  %v1147_v6 = vld [vmem:[#allocation5 + $0x2118] sm:$0xff] }
 0x243   :  { %v4905_v17 = vpop.f32.mrb[16].mxu1  ;;  %v4872_v36 = vadd.f32 %v4871_v32, %v4870_v15  ;;  %6573 = vmatpush3.bf16.msra.mxu0 %v6572_v12  ;;  %v1553_v12 = vcombine.high %v7214_v2, %v7214_v2  ;;  %v1148_v15 = vld [vmem:[#allocation5 + $0x2120] sm:$0xff]  ;;  %v1167_v32 = vld [vmem:[#allocation5 + $0x21b8] sm:$0xff] }
 0x244   :  { %v4906_v37 = vpop.f32.mrb[17].mxu1  ;;  %6575 = vmatprep.subr.bf16.mxu0 %v6574_v20  ;;  %v6652_v20 = vpack.c.bf16 %v1147_v6, %v1146_v58  ;;  %v1124_v58 = vld [vmem:[#allocation5 + $0x2060] sm:$0xff] }
 0x245   :  { %v4907_v40 = vadd.f32 %v4906_v37, %v4905_v17  ;;  %6605 = vmatpush3.bf16.msra.mxu1 %v6604_v1  ;;  %v2830_v28 = vadd.f32 %v4872_v36, %v7193_v50  ;;  %v6646_v50 = vpack.c.bf16 %v1161_v53, %v1160_v49  ;;  %v6620_v1 = vpack.c.bf16 %v1115_v5, %v1114_v57  ;;  %v1119_v36 = vld [vmem:[#allocation5 + $0x2038] sm:$0xff]  ;;  %v1150_v37 = vld [vmem:[#allocation5 + $0x2130] sm:$0xff]  ;;  %v1153_v49 = vld [vmem:[#allocation5 + $0x2148] sm:$0xff] }
 0x246   :  { %6607 = vmatprep.subr.bf16.mxu1 %v6606_v24  ;;  %v6654_v24 = vpack.c.bf16 %v1165_v19, %v1164_v18  ;;  %v6624_v17 = vpack.c.bf16 %v1117_v21, %v1116_v26  ;;  %v6628_v44 = vpack.c.bf16 %v1119_v36, %v1118_v23  ;;  %v6660_v27 = vpack.c.bf16 %v1151_v39, %v1150_v37  ;;  %v1138_v53 = vld [vmem:[#allocation5 + $0x20d0] sm:$0xff]  ;;  %v1156_v6 = vld [vmem:[#allocation5 + $0x2160] sm:$0xff]  ;;  %v1143_v19 = vld [vmem:[#allocation5 + $0x20f8] sm:$0xff] }
 0x247   :  { %v7208_v38 = vadd.f32 %v4907_v40, %v2830_v28  ;;  %6577 = vmatpush3.bf16.msra.mxu0 %v6576_v31  ;;  %v6658_v31 = vpack.c.bf16 %v1167_v32, %v1166_v30  ;;  %v1136_v40 = vld [vmem:[#allocation5 + $0x20c0] sm:$0xff]  ;;  %v6664_v35 = vpack.c.bf16 %v1153_v49, %v1152_v47  ;;  %v6634_v41 = vpack.c.bf16 %v1139_v54, %v1138_v53  ;;  %v1142_v18 = vld [vmem:[#allocation5 + $0x20f0] sm:$0xff]  ;;  %v1127_v32 = vld [vmem:[#allocation5 + $0x2078] sm:$0xff] }
 0x248   :  { %6579 = vmatprep.subr.bf16.mxu0 %v6578_v43  ;;  %v1168_v43 = vld [vmem:[#allocation5 + $0x21c0] sm:$0xff]  ;;  %v6668_v57 = vpack.c.bf16 %v1155_v62, %v1154_v51  ;;  %v6638_v5 = vpack.c.bf16 %v1141_v45, %v1140_v0  ;;  %v1126_v30 = vld [vmem:[#allocation5 + $0x2070] sm:$0xff]  ;;  %v1159_v23 = vld [vmem:[#allocation5 + $0x2178] sm:$0xff] }
 0x249   :  { %6609 = vmatpush3.bf16.msra.mxu1 %v6608_v22  ;;  %v1137_v22 = vld [vmem:[#allocation5 + $0x20c8] sm:$0xff]  ;;  %v6662_v48 = vpack.c.bf16 %v1169_v52, %v1168_v43  ;;  %v1192_v36 = vld [vmem:[#allocation5 + $0x2280] sm:$0xff]  ;;  %v6644_v43 = vpack.c.bf16 %v1127_v32, %v1126_v30  ;;  %v1194_v47 = vld [vmem:[#allocation5 + $0x2290] sm:$0xff] }
 0x24a   :  { %6611 = vmatprep.subr.bf16.mxu1 %v6610_v46  ;;  %v6630_v28 = vpack.c.bf16 %v1137_v22, %v1136_v40  ;;  %v1120_v46 = vld [vmem:[#allocation5 + $0x2040] sm:$0xff]  ;;  %v1193_v37 = vld [vmem:[#allocation5 + $0x2288] sm:$0xff]  ;;  %v1226_v53 = vld [vmem:[#allocation5 + $0x2390] sm:$0xff] }
 0x24b   :  { %6581 = vmatpush3.bf16.msra.mxu0 %v6580_v33  ;;  %v1170_v33 = vld [vmem:[#allocation5 + $0x21d0] sm:$0xff]  ;;  %v1225_v39 = vld [vmem:[#allocation5 + $0x2388] sm:$0xff]  ;;  %v1227_v54 = vld [vmem:[#allocation5 + $0x2398] sm:$0xff] }
 0x24c   :  { %6615 = vmatprep.subr.bf16.mxu0 %v6614_v55  ;;  %v6632_v55 = vpack.c.bf16 %v1121_v42, %v1120_v46  ;;  %v1208_v46 = vld [vmem:[#allocation5 + $0x2300] sm:$0xff]  ;;  %v1209_v42 = vld [vmem:[#allocation5 + $0x2308] sm:$0xff]  ;;  %v6714_v51 = vpack.c.bf16 %v1227_v54, %v1226_v53 }
 0x24d   :  { %6613 = vmatpush3.bf16.msra.mxu1 %v6612_v59  ;;  %v1171_v59 = vld [vmem:[#allocation5 + $0x21d8] sm:$0xff]  ;;  %v1196_v62 = vld [vmem:[#allocation5 + $0x22a0] sm:$0xff]  ;;  %v1197_v0 = vld [vmem:[#allocation5 + $0x22a8] sm:$0xff] }
 0x24e   :  { %6647 = vmatprep.subr.bf16.mxu1 %v6646_v50  ;;  %3808 = vmatmul.mubr.f32.vlgmr.msra.gmra.mrb[30].mxu0 %v7196_v9  ;;  %v1134_v9 = vld [vmem:[#allocation5 + $0x20b0] sm:$0xff]  ;;  %v1123_v50 = vld [vmem:[#allocation5 + $0x2058] sm:$0xff]  ;;  %v6666_v61 = vpack.c.bf16 %v1171_v59, %v1170_v33  ;;  %v1205_v53 = vld [vmem:[#allocation5 + $0x22e8] sm:$0xff] }
 0x24f   :  { %6617 = vmatpush3.bf16.msra.mxu0 %v6616_v3  ;;  %3947 = vmatprep.mubr.f32.mxu0 %v1552_v16  ;;  %v6626_v34 = vpack.c.bf16 %v1135_v29, %v1134_v9  ;;  %v1172_v3 = vld [vmem:[#allocation5 + $0x21e0] sm:$0xff]  ;;  %v1157_v16 = vld [vmem:[#allocation5 + $0x2168] sm:$0xff]  ;;  %v6642_v29 = vpack.c.bf16 %v1143_v19, %v1142_v18  ;;  %v1230_v18 = vld [vmem:[#allocation5 + $0x23b0] sm:$0xff] }
 0x250   :  { %3878 = vmatmul.mubr.f32.vlgmr.msra.gmra.mrb[30].mxu1 %v7199_v11  ;;  %6619 = vmatprep.subr.bf16.mxu0 %v6618_v56  ;;  %v6656_v11 = vpack.c.bf16 %v1149_v25, %v1148_v15  ;;  %v6636_v56 = vpack.c.bf16 %v1123_v50, %v1122_v60  ;;  %v6672_v9 = vpack.c.bf16 %v1157_v16, %v1156_v6  ;;  %v1179_v60 = vld [vmem:[#allocation5 + $0x2218] sm:$0xff]  ;;  %v1210_v50 = vld [vmem:[#allocation5 + $0x2310] sm:$0xff]  ;;  %v1212_v6 = vld [vmem:[#allocation5 + $0x2320] sm:$0xff] }
 0x251   :  { %6649 = vmatpush3.bf16.msra.mxu1 %v6648_v4  ;;  %4017 = vmatprep.mubr.f32.mxu1 %v1553_v12  ;;  %v1173_v4 = vld [vmem:[#allocation5 + $0x21e8] sm:$0xff]  ;;  %v1199_v16 = vld [vmem:[#allocation5 + $0x22b8] sm:$0xff]  ;;  %v1236_v54 = vld [vmem:[#allocation5 + $0x23e0] sm:$0xff] }
 0x252   :  { %6651 = vmatprep.subr.bf16.mxu1 %v6650_v8  ;;  %v1125_v8 = vld [vmem:[#allocation5 + $0x2068] sm:$0xff]  ;;  %v6670_v14 = vpack.c.bf16 %v1173_v4, %v1172_v3  ;;  %v1231_v19 = vld [vmem:[#allocation5 + $0x23b8] sm:$0xff] }
 0x253   :  { %6621 = vmatpush3.bf16.msra.mxu0 %v6620_v1  ;;  %v6640_v15 = vpack.c.bf16 %v1125_v8, %v1124_v58  ;;  %v1229_v3 = vld [vmem:[#allocation5 + $0x23a8] sm:$0xff]  ;;  %v1180_v58 = vld [vmem:[#allocation5 + $0x2220] sm:$0xff] }
 0x254   :  { %6623 = vmatprep.subr.bf16.mxu0 %v6622_v10  ;;  %v1175_v10 = vld [vmem:[#allocation5 + $0x21f8] sm:$0xff]  ;;  %v1181_v8 = vld [vmem:[#allocation5 + $0x2228] sm:$0xff] }
 0x255   :  { %6653 = vmatpush3.bf16.msra.mxu1 %v6652_v20  ;;  %v1174_v20 = vld [vmem:[#allocation5 + $0x21f0] sm:$0xff] }
 0x256   :  { %6655 = vmatprep.subr.bf16.mxu1 %v6654_v24  ;;  %v87_v24 = vld [vmem:[#allocation2 + $0x88] sm:$0xff] }
 0x257   :  { %6625 = vmatpush3.bf16.msra.mxu0 %v6624_v17  ;;  %v1158_v17 = vld [vmem:[#allocation5 + $0x2170] sm:$0xff]  ;;  %v1554_v40 = vcombine.high %v87_v24, %v87_v24  ;;  %v7226_v49 = vrot.slane %v87_v24, %v7002_v13  ;;  %v1200_v24 = vld [vmem:[#allocation5 + $0x22c0] sm:$0xff] }
 0x258   :  { %6627 = vmatprep.subr.bf16.mxu0 %v6626_v34  ;;  %v6674_v34 = vpack.c.bf16 %v1175_v10, %v1174_v20  ;;  %v6676_v52 = vpack.c.bf16 %v1159_v23, %v1158_v17  ;;  %v1182_v20 = vld [vmem:[#allocation5 + $0x2230] sm:$0xff]  ;;  %v1183_v10 = vld [vmem:[#allocation5 + $0x2238] sm:$0xff]  ;;  %v1216_v23 = vld [vmem:[#allocation5 + $0x2340] sm:$0xff] }
 0x259   :  { %6657 = vmatpush3.bf16.msra.mxu1 %v6656_v11  ;;  %v7229_v33 = vrot.slane %v1554_v40, %v7002_v13  ;;  %v1569_v45 = vcombine.high %v7226_v49, %v7226_v49  ;;  %v1228_v13 = vld [vmem:[#allocation5 + $0x23a0] sm:$0xff]  ;;  %v6692_v30 = vpack.c.bf16 %v1183_v10, %v1182_v20  ;;  %v1234_v40 = vld [vmem:[#allocation5 + $0x23d0] sm:$0xff] }
 0x25a   :  { %6659 = vmatprep.subr.bf16.mxu1 %v6658_v31  ;;  %v1224_v31 = vld [vmem:[#allocation5 + $0x2380] sm:$0xff] }
 0x25b   :  { %6629 = vmatpush3.bf16.msra.mxu0 %v6628_v44  ;;  %v6678_v44 = vpack.c.bf16 %v1193_v37, %v1192_v36  ;;  %v1570_v4 = vcombine.high %v7229_v33, %v7229_v33  ;;  %v1217_v37 = vld [vmem:[#allocation5 + $0x2348] sm:$0xff] }
 0x25c   :  { %6631 = vmatprep.subr.bf16.mxu0 %v6630_v28  ;;  %v1177_v28 = vld [vmem:[#allocation5 + $0x2208] sm:$0xff] }
 0x25d   :  { %6661 = vmatpush3.bf16.msra.mxu1 %v6660_v27  ;;  %v1176_v27 = vld [vmem:[#allocation5 + $0x2200] sm:$0xff] }
 0x25e   :  { %6663 = vmatprep.subr.bf16.mxu1 %v6662_v48  ;;  %v1195_v48 = vld [vmem:[#allocation5 + $0x2298] sm:$0xff]  ;;  %v6680_v59 = vpack.c.bf16 %v1177_v28, %v1176_v27  ;;  %v1186_v28 = vld [vmem:[#allocation5 + $0x2250] sm:$0xff] }
 0x25f   :  { %6633 = vmatpush3.bf16.msra.mxu0 %v6632_v55  ;;  %v6712_v55 = vpack.c.bf16 %v1209_v42, %v1208_v46  ;;  %v1187_v46 = vld [vmem:[#allocation5 + $0x2258] sm:$0xff] }
 0x260   :  { %6635 = vmatprep.subr.bf16.mxu0 %v6634_v41  ;;  %v1178_v41 = vld [vmem:[#allocation5 + $0x2210] sm:$0xff] }
 0x261   :  { %6665 = vmatpush3.bf16.msra.mxu1 %v6664_v35  ;;  %v4940_v7 = vpop.f32.mrb[18].mxu0  ;;  %v6682_v35 = vpack.c.bf16 %v1195_v48, %v1194_v47  ;;  %v1219_v47 = vld [vmem:[#allocation5 + $0x2358] sm:$0xff]  ;;  %v1204_v48 = vld [vmem:[#allocation5 + $0x22e0] sm:$0xff] }
 0x262   :  { %6667 = vmatprep.subr.bf16.mxu1 %v6666_v61  ;;  %v4941_v12 = vpop.f32.mrb[19].mxu0  ;;  %v1211_v61 = vld [vmem:[#allocation5 + $0x2318] sm:$0xff] }
 0x263   :  { %v4975_v1 = vpop.f32.mrb[18].mxu1  ;;  %v4942_v26 = vadd.f32 %v4941_v12, %v4940_v7  ;;  %6637 = vmatpush3.bf16.msra.mxu0 %v6636_v56  ;;  %v6684_v56 = vpack.c.bf16 %v1179_v60, %v1178_v41  ;;  %v6718_v7 = vpack.c.bf16 %v1229_v3, %v1228_v13  ;;  %v6688_v12 = vpack.c.bf16 %v1181_v8, %v1180_v58  ;;  %v1188_v60 = vld [vmem:[#allocation5 + $0x2260] sm:$0xff]  ;;  %v1207_v13 = vld [vmem:[#allocation5 + $0x22f8] sm:$0xff] }
 0x264   :  { %v4976_v21 = vpop.f32.mrb[19].mxu1  ;;  %6639 = vmatprep.subr.bf16.mxu0 %v6638_v5  ;;  %v6686_v5 = vpack.c.bf16 %v1197_v0, %v1196_v62  ;;  %v6702_v41 = vpack.c.bf16 %v1205_v53, %v1204_v48  ;;  %v1221_v0 = vld [vmem:[#allocation5 + $0x2368] sm:$0xff]  ;;  %v4173_v48 = vld [vmem:[%s7303_s3 + $0x48] sm:$0xff] }
 0x265   :  { %v4977_v25 = vadd.f32 %v4976_v21, %v4975_v1  ;;  %6669 = vmatpush3.bf16.msra.mxu1 %v6668_v57  ;;  %v2970_v11 = vadd.f32 %v4942_v26, %v7208_v38  ;;  %v6710_v38 = vpack.c.bf16 %v1225_v39, %v1224_v31  ;;  %v6716_v57 = vpack.c.bf16 %v1211_v61, %v1210_v50  ;;  %v1214_v26 = vld [vmem:[#allocation5 + $0x2330] sm:$0xff]  ;;  %v1203_v39 = vld [vmem:[#allocation5 + $0x22d8] sm:$0xff]  ;;  %v1189_v50 = vld [vmem:[#allocation5 + $0x2268] sm:$0xff] }
 0x266   :  { %6671 = vmatprep.subr.bf16.mxu1 %v6670_v14  ;;  %v1213_v14 = vld [vmem:[#allocation5 + $0x2328] sm:$0xff]  ;;  %v6722_v21 = vpack.c.bf16 %v1231_v19, %v1230_v18  ;;  %v1202_v31 = vld [vmem:[#allocation5 + $0x22d0] sm:$0xff]  ;;  %v6704_v8 = vpack.c.bf16 %v1189_v50, %v1188_v60  ;;  %v4177_v60 = vld [vmem:[%s7303_s3 + $0x68] sm:$0xff] }
 0x267   :  { %v7223_v22 = vadd.f32 %v4977_v25, %v2970_v11  ;;  %6641 = vmatpush3.bf16.msra.mxu0 %v6640_v15  ;;  %v1215_v15 = vld [vmem:[#allocation5 + $0x2338] sm:$0xff]  ;;  %v1201_v25 = vld [vmem:[#allocation5 + $0x22c8] sm:$0xff]  ;;  %v1184_v11 = vld [vmem:[#allocation5 + $0x2240] sm:$0xff]  ;;  %v6698_v27 = vpack.c.bf16 %v1203_v39, %v1202_v31  ;;  %v6920_v39 = vmov 0.0|0.0  }
 0x268   :  { %6643 = vmatprep.subr.bf16.mxu0 %v6642_v29  ;;  %v1233_v29 = vld [vmem:[#allocation5 + $0x23c8] sm:$0xff]  ;;  %v6724_v32 = vpack.c.bf16 %v1215_v15, %v1214_v26  ;;  %v6694_v17 = vpack.c.bf16 %v1201_v25, %v1200_v24  ;;  %v4166_v31 = vld [vmem:[%s7303_s3 + $0x10] sm:$0xff] }
 0x269   :  { %6673 = vmatpush3.bf16.msra.mxu1 %v6672_v9  ;;  %v1232_v9 = vld [vmem:[#allocation5 + $0x23c0] sm:$0xff] }
 0x26a   :  { %6675 = vmatprep.subr.bf16.mxu1 %v6674_v34  ;;  %v1185_v34 = vld [vmem:[#allocation5 + $0x2248] sm:$0xff]  ;;  %v6726_v36 = vpack.c.bf16 %v1233_v29, %v1232_v9 }
 0x26b   :  { %6645 = vmatpush3.bf16.msra.mxu0 %v6644_v43  ;;  %v1235_v43 = vld [vmem:[#allocation5 + $0x23d8] sm:$0xff] }
 0x26c   :  { %6679 = vmatprep.subr.bf16.mxu0 %v6678_v44  ;;  %v6728_v44 = vpack.c.bf16 %v1217_v37, %v1216_v23  ;;  %v6730_v42 = vpack.c.bf16 %v1235_v43, %v1234_v40  ;;  %v4167_v43 = vld [vmem:[%s7303_s3 + $0x18] sm:$0xff] }
 0x26d   :  { %6677 = vmatpush3.bf16.msra.mxu1 %v6676_v52  ;;  %v6696_v52 = vpack.c.bf16 %v1185_v34, %v1184_v11 }
 0x26e   :  { %6711 = vmatprep.subr.bf16.mxu1 %v6710_v38  ;;  %3948 = vmatmul.mubr.f32.vlgmr.msra.gmra.mrb[32].mxu0 %v7211_v63  ;;  %v1198_v63 = vld [vmem:[#allocation5 + $0x22b0] sm:$0xff] }
 0x26f   :  { %6681 = vmatpush3.bf16.msra.mxu0 %v6680_v59  ;;  %4087 = vmatprep.mubr.f32.mxu0 %v1569_v45  ;;  %v6690_v1 = vpack.c.bf16 %v1199_v16, %v1198_v63  ;;  %v1218_v38 = vld [vmem:[#allocation5 + $0x2350] sm:$0xff]  ;;  %v1237_v59 = vld [vmem:[#allocation5 + $0x23e8] sm:$0xff]  ;;  %v1191_v16 = vld [vmem:[#allocation5 + $0x2278] sm:$0xff] }
 0x270   :  { %4018 = vmatmul.mubr.f32.vlgmr.msra.gmra.mrb[32].mxu1 %v7214_v2  ;;  %6683 = vmatprep.subr.bf16.mxu0 %v6682_v35  ;;  %v6720_v2 = vpack.c.bf16 %v1213_v14, %v1212_v6  ;;  %v6732_v35 = vpack.c.bf16 %v1219_v47, %v1218_v38  ;;  %v6734_v62 = vpack.c.bf16 %v1237_v59, %v1236_v54  ;;  %v1206_v45 = vld [vmem:[#allocation5 + $0x22f0] sm:$0xff]  ;;  %v4171_v38 = vld [vmem:[%s7303_s3 + $0x38] sm:$0xff]  ;;  %v4174_v54 = vld [vmem:[%s7303_s3 + $0x50] sm:$0xff] }
 0x271   :  { %6713 = vmatpush3.bf16.msra.mxu1 %v6712_v55  ;;  %4157 = vmatprep.mubr.f32.mxu1 %v1570_v4  ;;  %v6700_v55 = vpack.c.bf16 %v1187_v46, %v1186_v28  ;;  %v6706_v14 = vpack.c.bf16 %v1207_v13, %v1206_v45  ;;  %v1190_v63 = vld [vmem:[#allocation5 + $0x2270] sm:$0xff]  ;;  %v4170_v46 = vld [vmem:[%s7303_s3 + $0x30] sm:$0xff]  ;;  %v4175_v59 = vld [vmem:[%s7303_s3 + $0x58] sm:$0xff] }
 0x272   :  { %6715 = vmatprep.subr.bf16.mxu1 %v6714_v51  ;;  %v1220_v51 = vld [vmem:[#allocation5 + $0x2360] sm:$0xff]  ;;  %v6708_v20 = vpack.c.bf16 %v1191_v16, %v1190_v63  ;;  %v4172_v47 = vld [vmem:[%s7303_s3 + $0x40] sm:$0xff] }
 0x273   :  { %6685 = vmatpush3.bf16.msra.mxu0 %v6684_v56  ;;  %v1238_v56 = vld [vmem:[#allocation5 + $0x23f0] sm:$0xff]  ;;  %v6755_v53 = vpack.c.bf16 %v4173_v48, %v4172_v47 }
 0x274   :  { %6687 = vmatprep.subr.bf16.mxu0 %v6686_v5 }
 0x275   :  { %6717 = vmatpush3.bf16.msra.mxu1 %v6716_v57  ;;  %v1239_v57 = vld [vmem:[#allocation5 + $0x23f8] sm:$0xff] }
 0x276   :  { %6719 = vmatprep.subr.bf16.mxu1 %v6718_v7  ;;  %v6736_v7 = vpack.c.bf16 %v1221_v0, %v1220_v51  ;;  %v6738_v19 = vpack.c.bf16 %v1239_v57, %v1238_v56 }
 0x277   :  { %6689 = vmatpush3.bf16.msra.mxu0 %v6688_v12  ;;  %v1222_v12 = vld [vmem:[#allocation5 + $0x2370] sm:$0xff] }
 0x278   :  { %6691 = vmatprep.subr.bf16.mxu0 %v6690_v1 }
 0x279   :  { %6721 = vmatpush3.bf16.msra.mxu1 %v6720_v2  ;;  %v1223_v2 = vld [vmem:[#allocation5 + $0x2378] sm:$0xff] }
 0x27a   :  { %6723 = vmatprep.subr.bf16.mxu1 %v6722_v21  ;;  %v6740_v10 = vpack.c.bf16 %v1223_v2, %v1222_v12 }
 0x27b   :  { %6693 = vmatpush3.bf16.msra.mxu0 %v6692_v30 }
 0x27c   :  { %6695 = vmatprep.subr.bf16.mxu0 %v6694_v17 }
 0x27d   :  { %6725 = vmatpush3.bf16.msra.mxu1 %v6724_v32 }
 0x27e   :  { %6727 = vmatprep.subr.bf16.mxu1 %v6726_v36 }
 0x27f   :  { %6697 = vmatpush3.bf16.msra.mxu0 %v6696_v52  ;;  %v6746_v52 = vpack.c.bf16 %v4167_v43, %v4166_v31 }
 0x280   :  { %6699 = vmatprep.subr.bf16.mxu0 %v6698_v27  ;;  %v4169_v27 = vld [vmem:[%s7303_s3 + $0x28] sm:$0xff] }
 0x281   :  { %6729 = vmatpush3.bf16.msra.mxu1 %v6728_v44  ;;  %v5010_v61 = vpop.f32.mrb[20].mxu0  ;;  %v4168_v44 = vld [vmem:[%s7303_s3 + $0x20] sm:$0xff] }
 0x282   :  { %6731 = vmatprep.subr.bf16.mxu1 %v6730_v42  ;;  %v5011_v3 = vpop.f32.mrb[21].mxu0  ;;  %v6749_v28 = vpack.c.bf16 %v4169_v27, %v4168_v44  ;;  %v6752_v42 = vpack.c.bf16 %v4171_v38, %v4170_v46 }
 0x283   :  { %v5045_v4 = vpop.f32.mrb[20].mxu1  ;;  %v5012_v5 = vadd.f32 %v5011_v3, %v5010_v61  ;;  %6701 = vmatpush3.bf16.msra.mxu0 %v6700_v55  ;;  %v6758_v55 = vpack.c.bf16 %v4175_v59, %v4174_v54  ;;  %v4178_v3 = vld [vmem:[%s7303_s3 + $0x70] sm:$0xff] }
 0x284   :  { %v5046_v58 = vpop.f32.mrb[21].mxu1  ;;  %6703 = vmatprep.subr.bf16.mxu0 %v6702_v41  ;;  %v4176_v41 = vld [vmem:[%s7303_s3 + $0x60] sm:$0xff] }
 0x285   :  { %v5047_v6 = vadd.f32 %v5046_v58, %v5045_v4  ;;  %6733 = vmatpush3.bf16.msra.mxu1 %v6732_v35  ;;  %v3110_v18 = vadd.f32 %v5012_v5, %v7223_v22  ;;  %v6761_v61 = vpack.c.bf16 %v4177_v60, %v4176_v41  ;;  %v4179_v4 = vld [vmem:[%s7303_s3 + $0x78] sm:$0xff]  ;;  %v6922_v5 = vmov 0.0  }
 0x286   :  { %6735 = vmatprep.subr.bf16.mxu1 %v6734_v62  ;;  %v6764_v56 = vpack.c.bf16 %v4179_v4, %v4178_v3 }
 0x287   :  { %v3180_v1 = vadd.f32 %v5047_v6, %v3110_v18  ;;  %6705 = vmatpush3.bf16.msra.mxu0 %v6704_v8 }
 0x288   :  { %6707 = vmatprep.subr.bf16.mxu0 %v6706_v14 }
 0x289   :  { %6737 = vmatpush3.bf16.msra.mxu1 %v6736_v7 }
 0x28a   :  { %6739 = vmatprep.subr.bf16.mxu1 %v6738_v19 }
 0x28b   :  { %6709 = vmatpush3.bf16.msra.mxu0 %v6708_v20 }
 0x28c   :  { %6742 = vmatprep.subr.bf16.mxu0 %v6920_v39 }
 0x28d   :  { %6741 = vmatpush3.bf16.msra.mxu1 %v6740_v10 }
 0x28e   :  { %4088 = vmatmul.mubr.f32.vlgmr.msra.gmra.mrb[34].mxu0 %v7226_v49  ;;  %v4164_v49 = vld [vmem:[%s7303_s3] sm:$0xff] }
 0x28f   :  { %5587 = vmatprep.mubr.msk.f32.mxu0 %vm6921_vm0, %v6922_v5 }
 0x290   :  { %4158 = vmatmul.mubr.f32.vlgmr.msra.gmra.mrb[34].mxu1 %v7229_v33  ;;  %v4165_v33 = vld [vmem:[%s7303_s3 + $0x8] sm:$0xff]  ;;  %s6923_s3 = smov [#allocation10]  }
 0x291   :  { %v6743_v40 = vpack.c.bf16 %v4165_v33, %v4164_v49  ;;  %s4265_s18 = sshll.u32 %s6923_s3, 4  ;;  %s4266_s18 = int_to_ptr.vmem [resolvable:$true] %s4265_s18 }
 0x292   :  { %s6883_s19 = scalar_lea.vmem %s4266_s18, 32  ;;  %p6888_p5 = scmp.lt.s32.totalorder %s4266_s18, %s4266_s18 }
 0x293   :  { %6744 = vmatpush3.bf16.msra.mxu0 %v6743_v40  ;;  %p6884_p4 = scmp.ne.s32.totalorder %s4266_s18, %s6883_s19  ;;  %p6889_p6 = scmp.lt.s32.totalorder %s6883_s19, %s6883_s19 }
 0x294   :  { %6745 = vmatprep.subr.bf16.mxu0 %v6920_v39 }
 0x295   :  { %p6890_p7 = por %p6889_p6, %p6888_p5 }
 0x297   :  { %6747 = vmatpush3.bf16.msra.mxu0 %v6746_v52  ;;  %p6891_p8 = pnand %p6890_p7, %p6884_p4 }
 0x298   :  { %6748 = vmatprep.subr.bf16.mxu0 %v6920_v39 }
 0x29b   :  { %6750 = vmatpush3.bf16.msra.mxu0 %v6749_v28 }
 0x29c   :  { %6751 = vmatprep.subr.bf16.mxu0 %v6920_v39 }
 0x29f   :  { %6753 = vmatpush3.bf16.msra.mxu0 %v6752_v42 }
 0x2a0   :  { %6754 = vmatprep.subr.bf16.mxu0 %v6920_v39 }
 0x2a1   :  { %v5080_v26 = vpop.f32.mrb[22].mxu0 }
 0x2a2   :  { %v5081_v21 = vpop.f32.mrb[23].mxu0 }
 0x2a3   :  { %v5115_v22 = vpop.f32.mrb[22].mxu1  ;;  %v5082_v15 = vadd.f32 %v5081_v21, %v5080_v26  ;;  %6756 = vmatpush3.bf16.msra.mxu0 %v6755_v53 }
 0x2a4   :  { %v5116_v24 = vpop.f32.mrb[23].mxu1  ;;  %6757 = vmatprep.subr.bf16.mxu0 %v6920_v39 }
 0x2a5   :  { %v5117_v25 = vadd.f32 %v5116_v24, %v5115_v22  ;;  %v3250_v9 = vadd.f32 %v5082_v15, %v3180_v1 }
 0x2a7   :  { %v3320_v29 = vadd.f32 %v5117_v25, %v3250_v9  ;;  %6759 = vmatpush3.bf16.msra.mxu0 %v6758_v55 }
 0x2a8   :  { %6760 = vmatprep.subr.bf16.mxu0 %v6920_v39 }
 0x2ab   :  { %6762 = vmatpush3.bf16.msra.mxu0 %v6761_v61 }
 0x2ac   :  { %6763 = vmatprep.subr.bf16.mxu0 %v6920_v39  ;;  %v4277_v39 = vld [vmem:[#allocation8] ss:$0 sm:$0xff] }
 0x2af   :  { %6765 = vmatpush3.bf16.msra.mxu0 %v6764_v56 }
 0x2c1   :  { %v5150_v30 = vpop.f32.mrb[24].mxu0 }
 0x2c2   :  { %v5151_v32 = vpop.f32.mrb[25].mxu0 }
 0x2c3   :  { %v5185_v17 = vpop.f32.mrb[24].mxu1  ;;  %v5152_v11 = vadd.f32 %v5151_v32, %v5150_v30 }
 0x2c4   :  { %v5186_v34 = vpop.f32.mrb[25].mxu1 }
 0x2c5   :  { %v5187_v23 = vadd.f32 %v5186_v34, %v5185_v17  ;;  %v3390_v36 = vadd.f32 %v5152_v11, %v3320_v29 }
 0x2c7   :  { %v3460_v37 = vadd.f32 %v5187_v23, %v3390_v36 }
 0x2e1   :  { %v5220_v35 = vpop.f32.mrb[26].mxu0 }
 0x2e2   :  { %v5221_v50 = vpop.f32.mrb[27].mxu0 }
 0x2e3   :  { %v5255_v51 = vpop.f32.mrb[26].mxu1  ;;  %v5222_v62 = vadd.f32 %v5221_v50, %v5220_v35 }
 0x2e4   :  { %v5256_v0 = vpop.f32.mrb[27].mxu1 }
 0x2e5   :  { %v5257_v45 = vadd.f32 %v5256_v0, %v5255_v51  ;;  %v3530_v13 = vadd.f32 %v5222_v62, %v3460_v37 }
 0x2e7   :  { %v3600_v57 = vadd.f32 %v5257_v45, %v3530_v13 }
 0x301   :  { %v5290_v58 = vpop.f32.mrb[28].mxu0 }
 0x302   :  { %v5291_v8 = vpop.f32.mrb[29].mxu0 }
 0x303   :  { %v5325_v6 = vpop.f32.mrb[28].mxu1  ;;  %v5292_v7 = vadd.f32 %v5291_v8, %v5290_v58 }
 0x304   :  { %v5326_v14 = vpop.f32.mrb[29].mxu1 }
 0x305   :  { %v5327_v63 = vadd.f32 %v5326_v14, %v5325_v6  ;;  %v3670_v16 = vadd.f32 %v5292_v7, %v3600_v57 }
 0x307   :  { %v3740_v18 = vadd.f32 %v5327_v63, %v3670_v16 }
 0x321   :  { %v5360_v19 = vpop.f32.mrb[30].mxu0 }
 0x322   :  { %v5361_v12 = vpop.f32.mrb[31].mxu0 }
 0x323   :  { %v5395_v2 = vpop.f32.mrb[30].mxu1  ;;  %v5362_v1 = vadd.f32 %v5361_v12, %v5360_v19 }
 0x324   :  { %v5396_v20 = vpop.f32.mrb[31].mxu1 }
 0x325   :  { %v5397_v10 = vadd.f32 %v5396_v20, %v5395_v2  ;;  %v3810_v26 = vadd.f32 %v5362_v1, %v3740_v18 }
 0x327   :  { %v3880_v21 = vadd.f32 %v5397_v10, %v3810_v26 }
 0x341   :  { %v5430_v22 = vpop.f32.mrb[32].mxu0 }
 0x342   :  { %v5431_v15 = vpop.f32.mrb[33].mxu0 }
 0x343   :  { %v5465_v24 = vpop.f32.mrb[32].mxu1  ;;  %v5432_v25 = vadd.f32 %v5431_v15, %v5430_v22 }
 0x344   :  { %v5466_v9 = vpop.f32.mrb[33].mxu1 }
 0x345   :  { %v5467_v29 = vadd.f32 %v5466_v9, %v5465_v24  ;;  %v3950_v30 = vadd.f32 %v5432_v25, %v3880_v21 }
 0x347   :  { %v4020_v32 = vadd.f32 %v5467_v29, %v3950_v30 }
 0x361   :  { %v5500_v17 = vpop.f32.mrb[34].mxu0 }
 0x362   :  { %v5501_v11 = vpop.f32.mrb[35].mxu0 }
 0x363   :  { %v5535_v34 = vpop.f32.mrb[34].mxu1  ;;  %v5502_v23 = vadd.f32 %v5501_v11, %v5500_v17 }
 0x364   :  { %v5536_v36 = vpop.f32.mrb[35].mxu1 }
 0x365   :  { %v5537_v37 = vadd.f32 %v5536_v36, %v5535_v34  ;;  %v4090_v49 = vadd.f32 %v5502_v23, %v4020_v32 }
 0x367   :  { %v4160_v33 = vadd.f32 %v5537_v37, %v4090_v49 }
 0x369   :  { %v4163_v31 = vmax.f32 %v4160_v33, 0.0 }
 0x36b   :  { %5588 = vmatmul.mubr.f32.vlgmr.msra.gmra.mrb[36].mxu0 %v4163_v31 }
 0x43e   :  { %v4253_v40 = vpop.f32.mrb[36].mxu0 }
 0x43f   :  { %v4254_v43 = vadd.f32 %v4277_v39, %v4253_v40  ;;  %v5589_v52 = vpop.f32.mrb[37].mxu0 }
 0x441   :  { %4258 = vst.msk [vmem:[#allocation10] sm:$0x3] %vm4257_vm1, %v4254_v43 }
 0x442   :  { %6894 = shalt.err (!%p6891_p8)
}
 0x443   :  { %s6895_s22 = scalar_lea.hbm %s7305_s5, 32 }
 0x444   :  { %p6896_p9 = scmp.ne.s32.totalorder %s7305_s5, %s6895_s22  ;;  %p6899_p10 = scmp.lt.u32.totalorder %s6895_s22, %s7305_s5 }
 0x446   :  { %p6901_p11 = pnand %p6899_p10, %p6896_p9 }
 0x448   :  { %6904 = shalt.err (!%p6901_p11)
}
 0x449   :  { %4268 = dma.vmem_to_hbm [thread:$0]  %s4266_s18, 32, %s7305_s5, [#allocation4]  }
 0x44a   :  { %6911 = dma.done.wait [#allocation4], 32  }
 0x44b   :  { %6912 = vsyncadd [#allocation4], 4294967264 }
 0x44c   :  { %4272 = vsyncpa [#allocation3], 1 }
 0x44d   :  { %4273 = vsyncpa [#allocation6], 1 }
 0x44e   :  { %4274 = vsyncpa [#allocation9], 1 }
 0x44f   :  { %4275 = vsyncpa [#allocation4], 1 }

</bundles_post_ra>
